<compile_context>
chip_gen: v7x
topology: tpu7x:2x2x1
jax: 0.10.0
libtpu: 0.0.40
codegen_flags: <defaults>
</compile_context>

<pallas_src>
import functools

import jax
import jax.numpy as jnp
from jax.experimental import pallas as pl
from jax.experimental.pallas import tpu as pltpu

OUT_SIZE = 256                    # EmoNetLoss.size = (256, 256)
PATCH = 16                        # synthetic emonet: 16x16 stride-16 patchify conv
GRID = OUT_SIZE // PATCH          # 16
N_PATCHES = GRID * GRID           # 256 patches per image
CONV_OUT = 64                     # real channels of 'emo_feat'
CONV_PAD = 128                    # padded to lane width (zero channels)
FEAT2 = 128                       # dim of 'emo_feat_2'
N_EXPRESSION = 8                  # emonet_8: 8 expressions + valence + arousal
HEAD_OUT = N_EXPRESSION + 2       # 10
HEAD_PAD = 128                    # padded head output (zero columns)

_VMEM_LIMIT = 32 * 1024 * 1024    # safe scoped-VMEM budget on v5e / v6e / v7x


# ---------------------------------------------------------------------------
# Bilinear interpolation matrix (PyTorch align_corners=False semantics). f32.
# ---------------------------------------------------------------------------
def _bilinear_matrix(in_size, out_size, dtype=jnp.float32):
    scale = in_size / out_size
    i = jnp.arange(out_size, dtype=jnp.float32)
    src = jnp.maximum((i + 0.5) * scale - 0.5, 0.0)
    i0 = jnp.minimum(jnp.floor(src).astype(jnp.int32), in_size - 1)
    i1 = jnp.minimum(i0 + 1, in_size - 1)
    frac = src - i0.astype(jnp.float32)
    rows = jnp.arange(out_size)
    w = jnp.zeros((out_size, in_size), dtype)
    w = w.at[rows, i0].add(1.0 - frac)
    w = w.at[rows, i1].add(frac)
    return w


# ---------------------------------------------------------------------------
# Kernel 1: (optional unnormalize) + bilinear resize of one NCHW image.
#   column pass: (C*H, W) @ (W, 256)   -- one matmul for all channels
#   row pass:    (256, H) @ (H, 256)   -- per channel (C is tiny and static)
# Output written lane-dense (last dim 256) in bf16.
# ---------------------------------------------------------------------------
def _resize_kernel(x_ref, wr_ref, wct_ref, o_ref, *, unnormalize):
    x = x_ref[0]                                   # (C, H, W) f32
    if unnormalize:
        x = (x + 1.0) * 0.5                        # folded in: free under the MXU
    C, H, W = x.shape
    t = jnp.dot(x.reshape(C * H, W), wct_ref[...],
                preferred_element_type=jnp.float32)          # (C*H, 256)
    t = t.reshape(C, H, OUT_SIZE)
    for c in range(C):                              # static unroll (C == 3)
        r = jnp.dot(wr_ref[...], t[c],
                    preferred_element_type=jnp.float32)      # (256, 256)
        o_ref[0, c, :, :] = r.astype(o_ref.dtype)


def bilinear_resize(images, out_h, out_w, unnormalize=False):
    B, C, H, W = images.shape
    wr = _bilinear_matrix(H, out_h)                 # (256, H)  f32
    wct = _bilinear_matrix(W, out_w).T              # (W, 256)  f32
    kernel = functools.partial(_resize_kernel, unnormalize=unnormalize)
    return pl.pallas_call(
        kernel,
        out_shape=jax.ShapeDtypeStruct((B, C, out_h, out_w), jnp.bfloat16),
        grid=(B,),
        in_specs=[
            pl.BlockSpec((1, C, H, W), lambda i: (i, 0, 0, 0)),
            pl.BlockSpec((out_h, H), lambda i: (0, 0)),
            pl.BlockSpec((W, out_w), lambda i: (0, 0)),
        ],
        out_specs=pl.BlockSpec((1, C, out_h, out_w), lambda i: (i, 0, 0, 0)),
        compiler_params=pltpu.CompilerParams(
            dimension_semantics=("parallel",),
            vmem_limit_bytes=_VMEM_LIMIT),
    )(images, wr, wct)


# ---------------------------------------------------------------------------
# Kernel 2: fused patchify-conv (matmul + bias + ReLU) + global average pool
#           + two-layer MLP head. One image (256 patches) per grid step.
# Matmul operands are bf16, accumulation f32; bias/ReLU/pool in f32.
# ---------------------------------------------------------------------------
def _conv_pool_head_kernel(p_ref, wc_ref, bc_ref, w1_ref, b1_ref, w2_ref, b2_ref,
                           feat_ref, feat2_ref, pred_ref):
    # patch conv: (256, 768) @ (768, 128) -> (256, 128), lane-dense output
    acc = jnp.dot(p_ref[...], wc_ref[...], preferred_element_type=jnp.float32)
    acc = jnp.maximum(acc + bc_ref[...], 0.0)
    feat_ref[0, :, :] = acc.astype(feat_ref.dtype)

    # global average pool over the 256 spatial positions of this image
    pooled = jnp.sum(acc, axis=0, keepdims=True) * (1.0 / N_PATCHES)   # (1, 128)

    # two-layer head (tiny; fused here to avoid a separate launch + HBM re-read)
    h = jnp.dot(pooled.astype(jnp.bfloat16), w1_ref[...],
                preferred_element_type=jnp.float32) + b1_ref[...]
    h = jnp.maximum(h, 0.0)                                            # (1, 128)
    feat2_ref[0, :, :] = h.astype(feat2_ref.dtype)

    p = jnp.dot(h.astype(jnp.bfloat16), w2_ref[...],
                preferred_element_type=jnp.float32) + b2_ref[...]      # (1, 128)
    pred_ref[0, :, :] = p.astype(pred_ref.dtype)


def conv_pool_head(patches, wc, bc, w1, b1, w2, b2, batch):
    M, K = patches.shape                            # M = batch * 256, K = 768
    return pl.pallas_call(
        _conv_pool_head_kernel,
        out_shape=(jax.ShapeDtypeStruct((batch, N_PATCHES, CONV_PAD), jnp.float32),
                   jax.ShapeDtypeStruct((batch, 1, FEAT2), jnp.float32),
                   jax.ShapeDtypeStruct((batch, 1, HEAD_PAD), jnp.float32)),
        grid=(batch,),
        in_specs=[
            pl.BlockSpec((N_PATCHES, K), lambda i: (i, 0)),
            pl.BlockSpec((K, CONV_PAD), lambda i: (0, 0)),
            pl.BlockSpec((1, CONV_PAD), lambda i: (0, 0)),
            pl.BlockSpec((CONV_PAD, FEAT2), lambda i: (0, 0)),
            pl.BlockSpec((1, FEAT2), lambda i: (0, 0)),
            pl.BlockSpec((FEAT2, HEAD_PAD), lambda i: (0, 0)),
            pl.BlockSpec((1, HEAD_PAD), lambda i: (0, 0)),
        ],
        out_specs=(pl.BlockSpec((1, N_PATCHES, CONV_PAD), lambda i: (i, 0, 0)),
                   pl.BlockSpec((1, 1, FEAT2), lambda i: (i, 0, 0)),
                   pl.BlockSpec((1, 1, HEAD_PAD), lambda i: (i, 0, 0))),
        compiler_params=pltpu.CompilerParams(
            dimension_semantics=("parallel",),
            vmem_limit_bytes=_VMEM_LIMIT),
    )(patches, wc, bc, w1, b1, w2, b2)


# ---------------------------------------------------------------------------
# EmoNetLoss (Pallas). forward(images) == emonet_out(images).
# ---------------------------------------------------------------------------
class EmoNetLossPallas:
    def __init__(self, key, unnormalize=False, feat_metric='l1'):
        self.size = (OUT_SIZE, OUT_SIZE)
        self.unnormalize = unnormalize
        self.feat_metric = feat_metric
        self.input_emotion = None
        self.output_emotion = None

        k1, k2, k3 = jax.random.split(key, 3)
        K = 3 * PATCH * PATCH
        w_conv = jax.random.normal(k1, (K, CONV_OUT), jnp.float32) / jnp.sqrt(K)
        w1 = jax.random.normal(k2, (CONV_OUT, FEAT2), jnp.float32) / jnp.sqrt(CONV_OUT)
        w2 = jax.random.normal(k3, (FEAT2, HEAD_OUT), jnp.float32) / jnp.sqrt(FEAT2)

        # Zero-pad to 128-lane shapes (pad channels stay exactly 0 through bias+ReLU;
        # w1 has zero rows for them; padded head columns are sliced off afterwards).
        self.w_conv = jnp.pad(w_conv, ((0, 0), (0, CONV_PAD - CONV_OUT))).astype(jnp.bfloat16)
        self.b_conv = jnp.zeros((1, CONV_PAD), jnp.float32)
        self.w1 = jnp.pad(w1, ((0, CONV_PAD - CONV_OUT), (0, 0))).astype(jnp.bfloat16)
        self.b1 = jnp.zeros((1, FEAT2), jnp.float32)
        self.w2 = jnp.pad(w2, ((0, 0), (0, HEAD_PAD - HEAD_OUT))).astype(jnp.bfloat16)
        self.b2 = jnp.zeros((1, HEAD_PAD), jnp.float32)

        self._emonet_out_jit = jax.jit(self._emonet_out)

    # ---- torch.nn.Module-ish API parity (no-ops for JAX) ----
    def to(self, *args, **kwargs):
        return self

    def eval(self):
        return self

    def train(self, mode=True):
        return self

    def forward(self, images):
        return self.emonet_out(images)

    def __call__(self, images):
        return self.forward(images)

    # ---- forward ----
    def emonet_out(self, images):
        return self._emonet_out_jit(images)

    def _emonet_out(self, images):
        B, C, H, W = images.shape
        # unnormalize (optional) + F.interpolate(..., 'bilinear') fused in kernel 1
        resized = bilinear_resize(images, OUT_SIZE, OUT_SIZE, unnormalize=self.unnormalize)
        # TODO(synk): patchify interleave kept as one cheap XLA transpose on the bf16 tensor.
        patches = resized.reshape(B, C, GRID, PATCH, GRID, PATCH)
        patches = patches.transpose(0, 2, 4, 1, 3, 5).reshape(B * N_PATCHES, C * PATCH * PATCH)
        feat, feat2, preds = conv_pool_head(patches, self.w_conv, self.b_conv,
                                            self.w1, self.b1, self.w2, self.b2, B)
        emo_feat = feat[:, :, :CONV_OUT].reshape(B, GRID, GRID, CONV_OUT).transpose(0, 3, 1, 2)
        emo_feat_2 = feat2.reshape(B, FEAT2)
        preds = preds.reshape(B, HEAD_PAD)[:, :HEAD_OUT]
        return {
            'emo_feat': emo_feat,                       # (B, 64, 16, 16) NCHW feature map
            'emo_feat_2': emo_feat_2,                   # (B, 128)
            'expression': preds[:, :N_EXPRESSION],      # (B, 8)
            'valence': preds[:, N_EXPRESSION],          # (B,)
            'arousal': preds[:, N_EXPRESSION + 1],      # (B,)
        }

    # ---- losses (tiny scalar reductions kept as JAX glue) ----
    def emo_feat_loss(self, x, y):
        if self.feat_metric == 'l1':
            return jnp.mean(jnp.abs(x - y))
        elif self.feat_metric == 'l2':
            return jnp.mean((x - y) ** 2)
        elif self.feat_metric == 'cos':
            xn = x / (jnp.linalg.norm(x, axis=1, keepdims=True) + 1e-8)
            yn = y / (jnp.linalg.norm(y, axis=1, keepdims=True) + 1e-8)
            return jnp.mean(1.0 - jnp.sum(xn * yn, axis=1))
        raise ValueError(f"Invalid feat_metric: '{self.feat_metric}'")

    def compute_loss(self, input_images, output_images):
        B = input_images.shape[0]
        # Run both batches through the network in a single pass (doubles M,
        # halves kernel-launch / grid-step overhead).
        both = jnp.concatenate([input_images, output_images], axis=0)
        e = self.emonet_out(both)
        a = {k: v[:B] for k, v in e.items()}
        b = {k: v[B:] for k, v in e.items()}
        self.input_emotion = a
        self.output_emotion = b
        return (self.emo_feat_loss(a['emo_feat'], b['emo_feat']),
                self.emo_feat_loss(a['emo_feat_2'], b['emo_feat_2']),
                jnp.mean(jnp.abs(a['valence'] - b['valence'])),
                jnp.mean(jnp.abs(a['arousal'] - b['arousal'])),
                jnp.mean(jnp.abs(a['expression'] - b['expression'])))

    @property
    def input_emo(self):
        return self.input_emotion

    @property
    def output_emo(self):
        return self.output_emotion


if __name__ == "__main__":
    key = jax.random.PRNGKey(0)
    k_img, k_params = jax.random.split(key)
    # small input consistent with the module: NCHW RGB images in [-1, 1]
    images = jax.random.uniform(k_img, (2, 3, 16, 16), jnp.float32,
                                minval=-1.0, maxval=1.0)

    loss_mod = EmoNetLossPallas(k_params)
    out = loss_mod.forward(images)
    jax.block_until_ready(out)

    assert out['emo_feat'].shape == (2, CONV_OUT, GRID, GRID)
    assert out['emo_feat_2'].shape == (2, FEAT2)
    assert out['expression'].shape == (2, N_EXPRESSION)
    assert out['valence'].shape == (2,)
    assert out['arousal'].shape == (2,)

    losses = loss_mod.compute_loss(images, images * 0.5)
    jax.block_until_ready(losses)
    assert len(losses) == 5

    print("KERNEL_OK")
</pallas_src>

<mosaic_0001>
module attributes {stable_mosaic.version = 11 : i64} {
  func.func private @main(%arg0: i32) attributes {dimension_semantics = [#tpu.dimension_semantics<core_parallel>], iteration_bounds = array<i64: 2>, tpu.core_type = #tpu.core_type<sc_scalar_subcore>, window_params = []} {
    return
  }
}

module attributes {stable_mosaic.version = 11 : i64} {
  func.func private @main(%arg0: i32) attributes {dimension_semantics = [#tpu.dimension_semantics<core_parallel>], iteration_bounds = array<i64: 2>, tpu.core_type = #tpu.core_type<sc_scalar_subcore>, window_params = []} {
    return
  }
}

module attributes {stable_mosaic.version = 11 : i64} {
  func.func @_resize_kernel(%arg0: i32, %arg1: memref<1x3x16x16xf32, #tpu.memory_space<vmem>>, %arg2: memref<256x16xf32, #tpu.memory_space<vmem>>, %arg3: memref<16x256xf32, #tpu.memory_space<vmem>>, %arg4: memref<1x3x256x256xbf16, #tpu.memory_space<vmem>>) attributes {dimension_semantics = [#tpu.dimension_semantics<parallel>], iteration_bounds = array<i64: 2>, scalar_prefetch = 0 : i64, scratch_operands = 0 : i64, tpu.core_type = #tpu.core_type<tc>, window_params = [{transform_indices = @transform_0, window_bounds = array<i64: 1, 3, 16, 16>}, {pipeline_mode = #tpu.pipeline_mode<synchronous>, transform_indices = @transform_1, window_bounds = array<i64: 256, 16>}, {pipeline_mode = #tpu.pipeline_mode<synchronous>, transform_indices = @transform_2, window_bounds = array<i64: 16, 256>}, {transform_indices = @transform_3, window_bounds = array<i64: 1, 3, 256, 256>}]} {
    %c0 = arith.constant 0 : index
    %c0_0 = arith.constant 0 : index
    %c0_1 = arith.constant 0 : index
    %c0_2 = arith.constant 0 : index
    %0 = vector.load %arg1[%c0, %c0_0, %c0_1, %c0_2] : memref<1x3x16x16xf32, #tpu.memory_space<vmem>>, vector<1x3x16x16xf32>
    %1 = vector.shape_cast %0 : vector<1x3x16x16xf32> to vector<3x16x16xf32>
    %2 = vector.shape_cast %1 : vector<3x16x16xf32> to vector<48x16xf32>
    %c0_3 = arith.constant 0 : index
    %c0_4 = arith.constant 0 : index
    %3 = vector.load %arg3[%c0_3, %c0_4] : memref<16x256xf32, #tpu.memory_space<vmem>>, vector<16x256xf32>
    %cst = arith.constant dense<0.000000e+00> : vector<48x256xf32>
    %4 = tpu.matmul %2, %3, %cst {dimension_numbers = #tpu.dot_dimension_numbers<[1], [0], [0], [1], [0, 0, 1, 1], [], []>} : vector<48x16xf32>, vector<16x256xf32>, vector<48x256xf32> -> vector<48x256xf32>
    %5 = vector.shape_cast %4 : vector<48x256xf32> to vector<3x16x256xf32>
    %c0_5 = arith.constant 0 : index
    %c0_6 = arith.constant 0 : index
    %6 = vector.load %arg2[%c0_5, %c0_6] : memref<256x16xf32, #tpu.memory_space<vmem>>, vector<256x16xf32>
    %7 = vector.extract_strided_slice %5 {offsets = [0, 0, 0], sizes = [1, 16, 256], strides = [1, 1, 1]} : vector<3x16x256xf32> to vector<1x16x256xf32>
    %8 = vector.shape_cast %7 : vector<1x16x256xf32> to vector<16x256xf32>
    %cst_7 = arith.constant dense<0.000000e+00> : vector<256x256xf32>
    %9 = tpu.matmul %6, %8, %cst_7 {dimension_numbers = #tpu.dot_dimension_numbers<[1], [0], [0], [1], [0, 0, 1, 1], [], []>} : vector<256x16xf32>, vector<16x256xf32>, vector<256x256xf32> -> vector<256x256xf32>
    %10 = arith.truncf %9 : vector<256x256xf32> to vector<256x256xbf16>
    %c0_8 = arith.constant 0 : index
    %c0_9 = arith.constant 0 : index
    %c0_10 = arith.constant 0 : index
    %c0_11 = arith.constant 0 : index
    %11 = vector.load %arg4[%c0_8, %c0_9, %c0_10, %c0_11] : memref<1x3x256x256xbf16, #tpu.memory_space<vmem>>, vector<1x1x256x256xbf16>
    %12 = vector.shape_cast %11 : vector<1x1x256x256xbf16> to vector<256x256xbf16>
    %13 = vector.shape_cast %10 : vector<256x256xbf16> to vector<1x1x256x256xbf16>
    tpu.vector_store %arg4[%c0_8, %c0_9, %c0_10, %c0_11], %13 {strides = array<i32>} : memref<1x3x256x256xbf16, #tpu.memory_space<vmem>>, vector<1x1x256x256xbf16>,
    %c0_12 = arith.constant 0 : index
    %c0_13 = arith.constant 0 : index
    %14 = vector.load %arg2[%c0_12, %c0_13] : memref<256x16xf32, #tpu.memory_space<vmem>>, vector<256x16xf32>
    %15 = vector.extract_strided_slice %5 {offsets = [1, 0, 0], sizes = [1, 16, 256], strides = [1, 1, 1]} : vector<3x16x256xf32> to vector<1x16x256xf32>
    %16 = vector.shape_cast %15 : vector<1x16x256xf32> to vector<16x256xf32>
    %cst_14 = arith.constant dense<0.000000e+00> : vector<256x256xf32>
    %17 = tpu.matmul %14, %16, %cst_14 {dimension_numbers = #tpu.dot_dimension_numbers<[1], [0], [0], [1], [0, 0, 1, 1], [], []>} : vector<256x16xf32>, vector<16x256xf32>, vector<256x256xf32> -> vector<256x256xf32>
    %18 = arith.truncf %17 : vector<256x256xf32> to vector<256x256xbf16>
    %c0_15 = arith.constant 0 : index
    %c1 = arith.constant 1 : index
    %c0_16 = arith.constant 0 : index
    %c0_17 = arith.constant 0 : index
    %19 = vector.load %arg4[%c0_15, %c1, %c0_16, %c0_17] : memref<1x3x256x256xbf16, #tpu.memory_space<vmem>>, vector<1x1x256x256xbf16>
    %20 = vector.shape_cast %19 : vector<1x1x256x256xbf16> to vector<256x256xbf16>
    %21 = vector.shape_cast %18 : vector<256x256xbf16> to vector<1x1x256x256xbf16>
    tpu.vector_store %arg4[%c0_15, %c1, %c0_16, %c0_17], %21 {strides = array<i32>} : memref<1x3x256x256xbf16, #tpu.memory_space<vmem>>, vector<1x1x256x256xbf16>,
    %c0_18 = arith.constant 0 : index
    %c0_19 = arith.constant 0 : index
    %22 = vector.load %arg2[%c0_18, %c0_19] : memref<256x16xf32, #tpu.memory_space<vmem>>, vector<256x16xf32>
    %23 = vector.extract_strided_slice %5 {offsets = [2, 0, 0], sizes = [1, 16, 256], strides = [1, 1, 1]} : vector<3x16x256xf32> to vector<1x16x256xf32>
    %24 = vector.shape_cast %23 : vector<1x16x256xf32> to vector<16x256xf32>
    %cst_20 = arith.constant dense<0.000000e+00> : vector<256x256xf32>
    %25 = tpu.matmul %22, %24, %cst_20 {dimension_numbers = #tpu.dot_dimension_numbers<[1], [0], [0], [1], [0, 0, 1, 1], [], []>} : vector<256x16xf32>, vector<16x256xf32>, vector<256x256xf32> -> vector<256x256xf32>
    %26 = arith.truncf %25 : vector<256x256xf32> to vector<256x256xbf16>
    %c0_21 = arith.constant 0 : index
    %c2 = arith.constant 2 : index
    %c0_22 = arith.constant 0 : index
    %c0_23 = arith.constant 0 : index
    %27 = vector.load %arg4[%c0_21, %c2, %c0_22, %c0_23] : memref<1x3x256x256xbf16, #tpu.memory_space<vmem>>, vector<1x1x256x256xbf16>
    %28 = vector.shape_cast %27 : vector<1x1x256x256xbf16> to vector<256x256xbf16>
    %29 = vector.shape_cast %26 : vector<256x256xbf16> to vector<1x1x256x256xbf16>
    tpu.vector_store %arg4[%c0_21, %c2, %c0_22, %c0_23], %29 {strides = array<i32>} : memref<1x3x256x256xbf16, #tpu.memory_space<vmem>>, vector<1x1x256x256xbf16>,
    return
  }
  func.func @transform_0(%arg0: i32) -> (i32, i32, i32, i32) {
    %c0_i32 = arith.constant 0 : i32
    %c0_i32_0 = arith.constant 0 : i32
    %c0_i32_1 = arith.constant 0 : i32
    %c0_i32_2 = arith.constant 0 : i32
    return %arg0, %c0_i32, %c0_i32_0, %c0_i32_1 : i32, i32, i32, i32
  }
  func.func @transform_1(%arg0: i32) -> (i32, i32) {
    %c0_i32 = arith.constant 0 : i32
    %c0_i32_0 = arith.constant 0 : i32
    %c0_i32_1 = arith.constant 0 : i32
    return %c0_i32, %c0_i32_0 : i32, i32
  }
  func.func @transform_2(%arg0: i32) -> (i32, i32) {
    %c0_i32 = arith.constant 0 : i32
    %c0_i32_0 = arith.constant 0 : i32
    %c0_i32_1 = arith.constant 0 : i32
    return %c0_i32, %c0_i32_0 : i32, i32
  }
  func.func @transform_3(%arg0: i32) -> (i32, i32, i32, i32) {
    %c0_i32 = arith.constant 0 : i32
    %c0_i32_0 = arith.constant 0 : i32
    %c0_i32_1 = arith.constant 0 : i32
    %c0_i32_2 = arith.constant 0 : i32
    return %arg0, %c0_i32, %c0_i32_0, %c0_i32_1 : i32, i32, i32, i32
  }
}

module attributes {stable_mosaic.version = 11 : i64} {
  func.func @_conv_pool_head_kernel(%arg0: i32, %arg1: memref<256x768xbf16, #tpu.memory_space<vmem>>, %arg2: memref<768x128xbf16, #tpu.memory_space<vmem>>, %arg3: memref<1x128xf32, #tpu.memory_space<vmem>>, %arg4: memref<128x128xbf16, #tpu.memory_space<vmem>>, %arg5: memref<1x128xf32, #tpu.memory_space<vmem>>, %arg6: memref<128x128xbf16, #tpu.memory_space<vmem>>, %arg7: memref<1x128xf32, #tpu.memory_space<vmem>>, %arg8: memref<1x256x128xf32, #tpu.memory_space<vmem>>, %arg9: memref<1x1x128xf32, #tpu.memory_space<vmem>>, %arg10: memref<1x1x128xf32, #tpu.memory_space<vmem>>) attributes {dimension_semantics = [#tpu.dimension_semantics<parallel>], iteration_bounds = array<i64: 2>, scalar_prefetch = 0 : i64, scratch_operands = 0 : i64, tpu.core_type = #tpu.core_type<tc>, window_params = [{transform_indices = @transform_0, window_bounds = array<i64: 256, 768>}, {pipeline_mode = #tpu.pipeline_mode<synchronous>, transform_indices = @transform_1, window_bounds = array<i64: 768, 128>}, {pipeline_mode = #tpu.pipeline_mode<synchronous>, transform_indices = @transform_2, window_bounds = array<i64: 1, 128>}, {pipeline_mode = #tpu.pipeline_mode<synchronous>, transform_indices = @transform_3, window_bounds = array<i64: 128, 128>}, {pipeline_mode = #tpu.pipeline_mode<synchronous>, transform_indices = @transform_4, window_bounds = array<i64: 1, 128>}, {pipeline_mode = #tpu.pipeline_mode<synchronous>, transform_indices = @transform_5, window_bounds = array<i64: 128, 128>}, {pipeline_mode = #tpu.pipeline_mode<synchronous>, transform_indices = @transform_6, window_bounds = array<i64: 1, 128>}, {transform_indices = @transform_7, window_bounds = array<i64: 1, 256, 128>}, {transform_indices = @transform_8, window_bounds = array<i64: 1, 1, 128>}, {transform_indices = @transform_9, window_bounds = array<i64: 1, 1, 128>}]} {
    %c0 = arith.constant 0 : index
    %c0_0 = arith.constant 0 : index
    %0 = vector.load %arg1[%c0, %c0_0] : memref<256x768xbf16, #tpu.memory_space<vmem>>, vector<256x768xbf16>
    %c0_1 = arith.constant 0 : index
    %c0_2 = arith.constant 0 : index
    %1 = vector.load %arg2[%c0_1, %c0_2] : memref<768x128xbf16, #tpu.memory_space<vmem>>, vector<768x128xbf16>
    %cst = arith.constant dense<0.000000e+00> : vector<256x128xf32>
    %2 = tpu.matmul %0, %1, %cst {dimension_numbers = #tpu.dot_dimension_numbers<[1], [0], [0], [1], [0, 0, 1, 1], [], []>} : vector<256x768xbf16>, vector<768x128xbf16>, vector<256x128xf32> -> vector<256x128xf32>
    %c0_3 = arith.constant 0 : index
    %c0_4 = arith.constant 0 : index
    %3 = vector.load %arg3[%c0_3, %c0_4] : memref<1x128xf32, #tpu.memory_space<vmem>>, vector<1x128xf32>
    %4 = vector.broadcast %3 : vector<1x128xf32> to vector<256x128xf32>
    %5 = arith.addf %2, %4 : vector<256x128xf32>
    %cst_5 = arith.constant 0.000000e+00 : f32
    %6 = vector.broadcast %cst_5 : f32 to vector<256x128xf32>
    %7 = arith.maximumf %5, %6 : vector<256x128xf32>
    %c0_6 = arith.constant 0 : index
    %c0_7 = arith.constant 0 : index
    %c0_8 = arith.constant 0 : index
    %8 = vector.load %arg8[%c0_6, %c0_7, %c0_8] : memref<1x256x128xf32, #tpu.memory_space<vmem>>, vector<1x256x128xf32>
    %9 = vector.shape_cast %8 : vector<1x256x128xf32> to vector<256x128xf32>
    %10 = vector.shape_cast %7 : vector<256x128xf32> to vector<1x256x128xf32>
    tpu.vector_store %arg8[%c0_6, %c0_7, %c0_8], %10 {strides = array<i32>} : memref<1x256x128xf32, #tpu.memory_space<vmem>>, vector<1x256x128xf32>,
    %cst_9 = arith.constant dense<0.000000e+00> : vector<128xf32>
    %11 = vector.multi_reduction <add>, %7, %cst_9 [0] : vector<256x128xf32> to vector<128xf32>
    %12 = vector.shape_cast %11 : vector<128xf32> to vector<1x128xf32>
    %cst_10 = arith.constant 3.906250e-03 : f32
    %13 = vector.broadcast %cst_10 : f32 to vector<1x128xf32>
    %14 = arith.mulf %12, %13 : vector<1x128xf32>
    %15 = arith.truncf %14 : vector<1x128xf32> to vector<1x128xbf16>
    %c0_11 = arith.constant 0 : index
    %c0_12 = arith.constant 0 : index
    %16 = vector.load %arg4[%c0_11, %c0_12] : memref<128x128xbf16, #tpu.memory_space<vmem>>, vector<128x128xbf16>
    %cst_13 = arith.constant dense<0.000000e+00> : vector<1x128xf32>
    %17 = tpu.matmul %15, %16, %cst_13 {dimension_numbers = #tpu.dot_dimension_numbers<[1], [0], [0], [1], [0, 0, 1, 1], [], []>} : vector<1x128xbf16>, vector<128x128xbf16>, vector<1x128xf32> -> vector<1x128xf32>
    %c0_14 = arith.constant 0 : index
    %c0_15 = arith.constant 0 : index
    %18 = vector.load %arg5[%c0_14, %c0_15] : memref<1x128xf32, #tpu.memory_space<vmem>>, vector<1x128xf32>
    %19 = arith.addf %17, %18 : vector<1x128xf32>
    %cst_16 = arith.constant 0.000000e+00 : f32
    %20 = vector.broadcast %cst_16 : f32 to vector<1x128xf32>
    %21 = arith.maximumf %19, %20 : vector<1x128xf32>
    %c0_17 = arith.constant 0 : index
    %c0_18 = arith.constant 0 : index
    %c0_19 = arith.constant 0 : index
    %22 = vector.load %arg9[%c0_17, %c0_18, %c0_19] : memref<1x1x128xf32, #tpu.memory_space<vmem>>, vector<1x1x128xf32>
    %23 = vector.shape_cast %22 : vector<1x1x128xf32> to vector<1x128xf32>
    %24 = vector.shape_cast %21 : vector<1x128xf32> to vector<1x1x128xf32>
    tpu.vector_store %arg9[%c0_17, %c0_18, %c0_19], %24 {strides = array<i32>} : memref<1x1x128xf32, #tpu.memory_space<vmem>>, vector<1x1x128xf32>,
    %25 = arith.truncf %21 : vector<1x128xf32> to vector<1x128xbf16>
    %c0_20 = arith.constant 0 : index
    %c0_21 = arith.constant 0 : index
    %26 = vector.load %arg6[%c0_20, %c0_21] : memref<128x128xbf16, #tpu.memory_space<vmem>>, vector<128x128xbf16>
    %cst_22 = arith.constant dense<0.000000e+00> : vector<1x128xf32>
    %27 = tpu.matmul %25, %26, %cst_22 {dimension_numbers = #tpu.dot_dimension_numbers<[1], [0], [0], [1], [0, 0, 1, 1], [], []>} : vector<1x128xbf16>, vector<128x128xbf16>, vector<1x128xf32> -> vector<1x128xf32>
    %c0_23 = arith.constant 0 : index
    %c0_24 = arith.constant 0 : index
    %28 = vector.load %arg7[%c0_23, %c0_24] : memref<1x128xf32, #tpu.memory_space<vmem>>, vector<1x128xf32>
    %29 = arith.addf %27, %28 : vector<1x128xf32>
    %c0_25 = arith.constant 0 : index
    %c0_26 = arith.constant 0 : index
    %c0_27 = arith.constant 0 : index
    %30 = vector.load %arg10[%c0_25, %c0_26, %c0_27] : memref<1x1x128xf32, #tpu.memory_space<vmem>>, vector<1x1x128xf32>
    %31 = vector.shape_cast %30 : vector<1x1x128xf32> to vector<1x128xf32>
    %32 = vector.shape_cast %29 : vector<1x128xf32> to vector<1x1x128xf32>
    tpu.vector_store %arg10[%c0_25, %c0_26, %c0_27], %32 {strides = array<i32>} : memref<1x1x128xf32, #tpu.memory_space<vmem>>, vector<1x1x128xf32>,
    return
  }
  func.func @transform_0(%arg0: i32) -> (i32, i32) {
    %c0_i32 = arith.constant 0 : i32
    %c0_i32_0 = arith.constant 0 : i32
    return %arg0, %c0_i32 : i32, i32
  }
  func.func @transform_1(%arg0: i32) -> (i32, i32) {
    %c0_i32 = arith.constant 0 : i32
    %c0_i32_0 = arith.constant 0 : i32
    %c0_i32_1 = arith.constant 0 : i32
    return %c0_i32, %c0_i32_0 : i32, i32
  }
  func.func @transform_2(%arg0: i32) -> (i32, i32) {
    %c0_i32 = arith.constant 0 : i32
    %c0_i32_0 = arith.constant 0 : i32
    %c0_i32_1 = arith.constant 0 : i32
    return %c0_i32, %c0_i32_0 : i32, i32
  }
  func.func @transform_3(%arg0: i32) -> (i32, i32) {
    %c0_i32 = arith.constant 0 : i32
    %c0_i32_0 = arith.constant 0 : i32
    %c0_i32_1 = arith.constant 0 : i32
    return %c0_i32, %c0_i32_0 : i32, i32
  }
  func.func @transform_4(%arg0: i32) -> (i32, i32) {
    %c0_i32 = arith.constant 0 : i32
    %c0_i32_0 = arith.constant 0 : i32
    %c0_i32_1 = arith.constant 0 : i32
    return %c0_i32, %c0_i32_0 : i32, i32
  }
  func.func @transform_5(%arg0: i32) -> (i32, i32) {
    %c0_i32 = arith.constant 0 : i32
    %c0_i32_0 = arith.constant 0 : i32
    %c0_i32_1 = arith.constant 0 : i32
    return %c0_i32, %c0_i32_0 : i32, i32
  }
  func.func @transform_6(%arg0: i32) -> (i32, i32) {
    %c0_i32 = arith.constant 0 : i32
    %c0_i32_0 = arith.constant 0 : i32
    %c0_i32_1 = arith.constant 0 : i32
    return %c0_i32, %c0_i32_0 : i32, i32
  }
  func.func @transform_7(%arg0: i32) -> (i32, i32, i32) {
    %c0_i32 = arith.constant 0 : i32
    %c0_i32_0 = arith.constant 0 : i32
    %c0_i32_1 = arith.constant 0 : i32
    return %arg0, %c0_i32, %c0_i32_0 : i32, i32, i32
  }
  func.func @transform_8(%arg0: i32) -> (i32, i32, i32) {
    %c0_i32 = arith.constant 0 : i32
    %c0_i32_0 = arith.constant 0 : i32
    %c0_i32_1 = arith.constant 0 : i32
    return %arg0, %c0_i32, %c0_i32_0 : i32, i32, i32
  }
  func.func @transform_9(%arg0: i32) -> (i32, i32, i32) {
    %c0_i32 = arith.constant 0 : i32
    %c0_i32_0 = arith.constant 0 : i32
    %c0_i32_1 = arith.constant 0 : i32
    return %arg0, %c0_i32, %c0_i32_0 : i32, i32, i32
  }
}

</mosaic_0001>

<bundles_post_ra>
// kernel: _emonet_out.2
= control target key start
LH: loop header
LB: loop body
LE: loop exit
PB: predicated region body
PF: predicated region fallthrough
CT: control target
= control target key end

     0   :  { %8 = vsyncpa [#allocation3], 0  ;;  %s2687_s12 = smov 0   ;;  %s3305_s0 = inlined_call_operand.vmem [shape: f32[2,3,16,16], index: 0, kind: input, shape index: {}]   ;;  %s3306_s1 = inlined_call_operand.vmem [shape: f32[256,16], index: 1, kind: input, shape index: {}]   ;;  %s3307_s2 = inlined_call_operand.hbm [shape: f32[16,256], index: 2, kind: input, shape index: {}]   ;;  %s3308_s3 = inlined_call_operand.vmem [shape: bf16[2,3,256,256], index: 3, kind: output, shape index: {}]  }
   0x1 LB: > { %s2693_s13 = sadd.s32 4294967295, %s2661_s12   ;;  %p2214_p0 = scmp.ge.s32.totalorder %s2661_s12, 1  ;;  %s2661_s12 = sphi %s2687_s12, %s14_s12  }
   0x2   : > { %p113_p1 = scmp.lt.s32.totalorder %s2661_s12, 3  ;;  %s2663_s14 = smov [#allocation2]  }
   0x3   : > { %s128_s15 = sshll.u32 %s2663_s14, 4  ;;  %p3309_p3 = scmp.eq.s32.totalorder %s2693_s13, 0  ;;  %s129_s15 = int_to_ptr.vmem [resolvable:$true] %s128_s15 }
   0x4   : > { %p2697_p2 = pnand %p2214_p0, %p113_p1  ;;  %s2623_s20 = scalar_lea.hbm %s3307_s2, 512 }
   0x5   : > { %p2624_p6 = scmp.ne.s32.totalorder %s3307_s2, %s2623_s20  ;;  %p2630_p10 = scmp.lt.u32.totalorder %s2623_s20, %s3307_s2 }
   0x6   : > { %s3311_s16 = scalar_select %p2697_p2, 1, 0 }
   0x7   : > { %p2605_p4 = pneg %p2697_p2 }
   0x9   : > { %p2706_p5 = pnand %p3309_p3, %p2605_p4 }
   0xb   : > { %p2625_p7 = pneg %p2706_p5 }
   0xd   : > { %p2626_p8 = pnand %p2625_p7, %p2624_p6 }
   0xf   : > { %p2627_p9 = pneg %p2626_p8 }
  0x11   : > { %p2632_p11 = pnand %p2630_p10, %p2627_p9 }
  0x13   : > { %2635 = shalt.err (!%p2632_p11)
}
  0x14   : > { %s2636_s25 = scalar_lea.vmem %s129_s15, 512  ;;  %p2644_p1 = scmp.lt.s32.totalorder %s129_s15, %s129_s15 }
  0x15   : > { %p2637_p12 = scmp.ne.s32.totalorder %s129_s15, %s2636_s25  ;;  %p2645_p4 = scmp.lt.s32.totalorder %s2636_s25, %s2636_s25 }
  0x17   : > { %p2639_p13 = pnand %p2637_p12, %p2625_p7  ;;  %p2646_p3 = por %p2645_p4, %p2644_p1 }
  0x19   : > { %p2640_p0 = pneg %p2639_p13 }
  0x1b   : > { %p2647_p2 = pnand %p2646_p3, %p2640_p0 }
  0x1d   : > { %2650 = shalt.err (!%p2647_p2)
}
  0x1e   : > { %s2664_s26 = smov 256   ;;  %s2665_s27 = smov 16  }
  0x1f   : > { %2608 = dma.hbm_to_vmem [thread:$0]  (!%p2706_p5), %s3307_s2, 512, %s129_s15, [#allocation3], %s2664_s26, %s2664_s26, %s2665_s27  }
  0x20   : > { %p3313_p6 = scmp.ne.s32.totalorder %s3311_s16, 0 }
  0x21   : > { %p3314_p8 = scmp.eq.s32.totalorder (!%p3313_p6), %s2693_s13, 0 }
  0x22   : > { %152 = sbr.rel (%p3313_p6) target bundleno = 688 (0x2b0), region = 32 }
  0x29   : > { %2656 = dma.done.wait (%p3314_p8), [#allocation3], 512   ;;  %p3315_p7 = pmov %p3314_p8 }
  0x2a   : > { %p176_p2 = scmp.lt.s32.totalorder %s2693_s13, 1  ;;  %v2666_v0 = vmov 0.0   ;;  %v193_v1 = vld [vmem:[#allocation2 + $0x8] sm:$0xff]  ;;  %v195_v2 = vld [vmem:[#allocation2 + $0x18] sm:$0xff]  ;;  %v192_v3 = vld [vmem:[#allocation2] sm:$0xff]  ;;  %vm196_vm0 = vcmask 130048  }
  0x2b   : > { %2658 = vsyncadd (%p3315_p7), [#allocation3], 4294966784  ;;  %279 = vmatprep.mubr.f32.mxu0 %v2666_v0  ;;  %586 = vmatprep.mubr.f32.mxu1 %v2666_v0  ;;  %v2581_v4 = vpack.c.bf16 %v195_v2, %v193_v1  ;;  %v194_v5 = vld [vmem:[#allocation2 + $0x10] sm:$0xff]  ;;  %v2757_v21 = vld [vmem:[%s3306_s1] sm:$0xff] }
  0x2c   : > { %s3317_s13 = smov (!%p176_p2, %s2693_s13), 1  ;;  %v2583_v6 = vpack.c.bf16 %v194_v5, %v192_v3  ;;  %v2762_v22 = vld [vmem:[%s3306_s1 + $0x68] sm:$0xff]  ;;  %v2772_v26 = vld [vmem:[%s3306_s1 + $0x70] sm:$0xff]  ;;  %v2786_v31 = vld [vmem:[%s3306_s1 + $0x78] sm:$0xff] }
  0x2d   : > { %s2599_s30 = smul.u32 48, %s3317_s13  ;;  %2582 = vmatprep.subr.bf16.mxu0 %v2581_v4  ;;  %v2778_v28 = vld [vmem:[%s3306_s1 + $0x8] sm:$0xff]  ;;  %v2794_v32 = vld [vmem:[%s3306_s1 + $0x10] sm:$0xff]  ;;  %v2802_v36 = vld [vmem:[%s3306_s1 + $0x80] sm:$0xff] }
  0x2e   : > { %2584 = vmatpush1.bf16.msra.mxu0 %v2583_v6  ;;  %v2810_v38 = vld [vmem:[%s3306_s1 + $0x18] sm:$0xff]  ;;  %v2818_v39 = vld [vmem:[%s3306_s1 + $0x88] sm:$0xff]  ;;  %v2826_v40 = vld [vmem:[%s3306_s1 + $0x20] sm:$0xff]  ;;  %s2600_s23 = smul.u32 768, %s3317_s13 }
  0x2f   : > { %s180_s6 = scalar_lea.vmem %s3305_s0, %s2599_s30  ;;  %v2834_v41 = vld [vmem:[%s3306_s1 + $0x90] sm:$0xff]  ;;  %v2842_v42 = vld [vmem:[%s3306_s1 + $0x28] sm:$0xff]  ;;  %v2850_v43 = vld [vmem:[%s3306_s1 + $0x98] sm:$0xff] }
  0x30   : > { %v186_v7 = vld [vmem:[%s180_s6] sm:$0xff]  ;;  %v187_v8 = vld [vmem:[%s180_s6 + $0x8] sm:$0xff]  ;;  %v188_v9 = vld [vmem:[%s180_s6 + $0x10] sm:$0xff]  ;;  %s3204_s26 = scalar_lea.vmem %s3308_s3, %s2600_s23 }
  0x31   : > { %2221 = vmatmul.mubr.msk.f32.vlgmr.msra.gmra.mrb[0].mxu0 %vm196_vm0, %v186_v7  ;;  %v189_v10 = vld [vmem:[%s180_s6 + $0x18] sm:$0xff]  ;;  %v190_v11 = vld [vmem:[%s180_s6 + $0x20] sm:$0xff]  ;;  %v191_v12 = vld [vmem:[%s180_s6 + $0x28] sm:$0xff] }
  0x32   : > { %285 = vmatprep.mubr.f32.mxu0 %v2666_v0  ;;  %v2858_v44 = vld [vmem:[%s3306_s1 + $0x30] sm:$0xff]  ;;  %v2866_v45 = vld [vmem:[%s3306_s1 + $0xa0] sm:$0xff]  ;;  %v2874_v46 = vld [vmem:[%s3306_s1 + $0x38] sm:$0xff] }
  0x33   : > { %v2882_v47 = vld [vmem:[%s3306_s1 + $0xa8] sm:$0xff]  ;;  %v2890_v48 = vld [vmem:[%s3306_s1 + $0x40] sm:$0xff]  ;;  %v2898_v49 = vld [vmem:[%s3306_s1 + $0xb0] sm:$0xff] }
  0x34   : > { %v2906_v50 = vld [vmem:[%s3306_s1 + $0x48] sm:$0xff]  ;;  %v2914_v51 = vld [vmem:[%s3306_s1 + $0xb8] sm:$0xff]  ;;  %v2922_v52 = vld [vmem:[%s3306_s1 + $0x50] sm:$0xff] }
  0x35   : > { %2222 = vmatmul.mubr.msk.f32.gmra.mrb[2].mxu0 %vm196_vm0, %v187_v8  ;;  %v2930_v53 = vld [vmem:[%s3306_s1 + $0xc0] sm:$0xff]  ;;  %v2938_v54 = vld [vmem:[%s3306_s1 + $0x58] sm:$0xff]  ;;  %v2946_v55 = vld [vmem:[%s3306_s1 + $0xc8] sm:$0xff] }
  0x36   : > { %291 = vmatprep.mubr.f32.mxu0 %v2666_v0  ;;  %v2954_v56 = vld [vmem:[%s3306_s1 + $0x60] sm:$0xff]  ;;  %v2962_v57 = vld [vmem:[%s3306_s1 + $0xd0] sm:$0xff]  ;;  %v2973_v58 = vld [vmem:[%s3306_s1 + $0xd8] sm:$0xff] }
  0x37   : > { %v2984_v59 = vld [vmem:[%s3306_s1 + $0xe0] sm:$0xff]  ;;  %v2995_v60 = vld [vmem:[%s3306_s1 + $0xe8] sm:$0xff]  ;;  %v3006_v61 = vld [vmem:[%s3306_s1 + $0xf0] sm:$0xff] }
  0x38   : > { %v3017_v62 = vld [vmem:[%s3306_s1 + $0xf8] sm:$0xff] }
  0x39   : > { %2223 = vmatmul.mubr.msk.f32.gmra.mrb[4].mxu0 %vm196_vm0, %v188_v9 }
  0x3a   : > { %297 = vmatprep.mubr.f32.mxu0 %v2666_v0 }
  0x3d   : > { %2224 = vmatmul.mubr.msk.f32.gmra.mrb[6].mxu0 %vm196_vm0, %v189_v10 }
  0x3e   : > { %303 = vmatprep.mubr.f32.mxu0 %v2666_v0 }
  0x41   : > { %2225 = vmatmul.mubr.msk.f32.gmra.mrb[8].mxu0 %vm196_vm0, %v190_v11 }
  0x42   : > { %309 = vmatprep.mubr.f32.mxu0 %v2666_v0 }
  0x45   : > { %2226 = vmatmul.mubr.msk.f32.gmra.mrb[10].mxu0 %vm196_vm0, %v191_v12 }
  0x46   : > { %508 = vmatprep.mubr.f32.mxu0 %v2666_v0 }
 0x104   : > { %v281_v13 = vpop.f32.mrb[0].mxu0 }
 0x105   : > { %v283_v14 = vpop.f32.mrb[1].mxu0 }
 0x108   : > { %v287_v15 = vpop.f32.mrb[2].mxu0 }
 0x109   : > { %v2587_v16 = vpack.c.bf16 %v287_v15, %v281_v13  ;;  %v289_v17 = vpop.f32.mrb[3].mxu0 }
 0x10a   : > { %v2585_v18 = vpack.c.bf16 %v289_v17, %v283_v14 }
 0x10c   : > { %v293_v19 = vpop.f32.mrb[4].mxu0  ;;  %2586 = vmatprep.subr.bf16.mxu0 %v2585_v18  ;;  %2597 = vmatprep.subr.bf16.mxu1 %v2585_v18 }
 0x10d   : > { %v295_v20 = vpop.f32.mrb[5].mxu0  ;;  %2588 = vmatpush1.bf16.msra.mxu0 %v2587_v16  ;;  %2598 = vmatpush1.bf16.msra.mxu1 %v2587_v16 }
 0x110   : > { %v299_v23 = vpop.f32.mrb[6].mxu0  ;;  %2227 = vmatmul.mubr.msk.f32.vlgmr.msra.gmra.mrb[12].mxu0 %vm196_vm0, %v2757_v21  ;;  %2240 = vmatmul.mubr.msk.f32.vlgmr.msra.gmra.mrb[0].mxu1 %vm196_vm0, %v2762_v22 }
 0x111   : > { %v2591_v24 = vpack.c.bf16 %v299_v23, %v293_v19  ;;  %v301_v25 = vpop.f32.mrb[7].mxu0  ;;  %592 = vmatprep.mubr.f32.mxu1 %v2666_v0  ;;  %514 = vmatprep.mubr.f32.mxu0 %v2666_v0 }
 0x112   : > { %v2589_v27 = vpack.c.bf16 %v301_v25, %v295_v20 }
 0x114   : > { %v305_v29 = vpop.f32.mrb[8].mxu0  ;;  %2590 = vmatprep.subr.bf16.mxu0 %v2589_v27  ;;  %2241 = vmatmul.mubr.msk.f32.gmra.mrb[2].mxu1 %vm196_vm0, %v2772_v26 }
 0x115   : > { %v307_v30 = vpop.f32.mrb[9].mxu0  ;;  %2592 = vmatpush1.bf16.msra.mxu0 %v2591_v24  ;;  %598 = vmatprep.mubr.f32.mxu1 %v2666_v0 }
 0x116   : > { %2228 = vmatmul.mubr.msk.f32.gmra.mrb[14].mxu0 %vm196_vm0, %v2778_v28 }
 0x117   : > { %520 = vmatprep.mubr.f32.mxu0 %v2666_v0 }
 0x118   : > { %v311_v33 = vpop.f32.mrb[10].mxu0  ;;  %2242 = vmatmul.mubr.msk.f32.gmra.mrb[4].mxu1 %vm196_vm0, %v2786_v31 }
 0x119   : > { %v2595_v34 = vpack.c.bf16 %v311_v33, %v305_v29  ;;  %v313_v35 = vpop.f32.mrb[11].mxu0  ;;  %604 = vmatprep.mubr.f32.mxu1 %v2666_v0 }
 0x11a   : > { %v2593_v37 = vpack.c.bf16 %v313_v35, %v307_v30  ;;  %2229 = vmatmul.mubr.msk.f32.gmra.mrb[16].mxu0 %vm196_vm0, %v2794_v32 }
 0x11b   : > { %526 = vmatprep.mubr.f32.mxu0 %v2666_v0 }
 0x11c   : > { %2594 = vmatprep.subr.bf16.mxu1 %v2593_v37  ;;  %2243 = vmatmul.mubr.msk.f32.gmra.mrb[6].mxu1 %vm196_vm0, %v2802_v36 }
 0x11d   : > { %2596 = vmatpush1.bf16.msra.mxu1 %v2595_v34  ;;  %610 = vmatprep.mubr.f32.mxu1 %v2666_v0 }
 0x11e   : > { %2230 = vmatmul.mubr.msk.f32.gmra.mrb[18].mxu0 %vm196_vm0, %v2810_v38 }
 0x11f   : > { %532 = vmatprep.mubr.f32.mxu0 %v2666_v0 }
 0x120   : > { %2244 = vmatmul.mubr.msk.f32.gmra.mrb[8].mxu1 %vm196_vm0, %v2818_v39 }
 0x121   : > { %616 = vmatprep.mubr.f32.mxu1 %v2666_v0 }
 0x122   : > { %2231 = vmatmul.mubr.msk.f32.gmra.mrb[20].mxu0 %vm196_vm0, %v2826_v40 }
 0x123   : > { %538 = vmatprep.mubr.f32.mxu0 %v2666_v0 }
 0x124   : > { %2245 = vmatmul.mubr.msk.f32.gmra.mrb[10].mxu1 %vm196_vm0, %v2834_v41 }
 0x125   : > { %622 = vmatprep.mubr.f32.mxu1 %v2666_v0 }
 0x126   : > { %2232 = vmatmul.mubr.msk.f32.gmra.mrb[22].mxu0 %vm196_vm0, %v2842_v42 }
 0x127   : > { %544 = vmatprep.mubr.f32.mxu0 %v2666_v0 }
 0x128   : > { %2246 = vmatmul.mubr.msk.f32.gmra.mrb[12].mxu1 %vm196_vm0, %v2850_v43 }
 0x129   : > { %628 = vmatprep.mubr.f32.mxu1 %v2666_v0 }
 0x12a   : > { %2233 = vmatmul.mubr.msk.f32.gmra.mrb[24].mxu0 %vm196_vm0, %v2858_v44 }
 0x12b   : > { %550 = vmatprep.mubr.f32.mxu0 %v2666_v0 }
 0x12c   : > { %2247 = vmatmul.mubr.msk.f32.gmra.mrb[14].mxu1 %vm196_vm0, %v2866_v45 }
 0x12d   : > { %634 = vmatprep.mubr.f32.mxu1 %v2666_v0 }
 0x12e   : > { %2234 = vmatmul.mubr.msk.f32.gmra.mrb[26].mxu0 %vm196_vm0, %v2874_v46 }
 0x12f   : > { %556 = vmatprep.mubr.f32.mxu0 %v2666_v0 }
 0x130   : > { %2248 = vmatmul.mubr.msk.f32.gmra.mrb[16].mxu1 %vm196_vm0, %v2882_v47 }
 0x131   : > { %640 = vmatprep.mubr.f32.mxu1 %v2666_v0 }
 0x132   : > { %2235 = vmatmul.mubr.msk.f32.gmra.mrb[28].mxu0 %vm196_vm0, %v2890_v48 }
 0x133   : > { %562 = vmatprep.mubr.f32.mxu0 %v2666_v0 }
 0x134   : > { %2249 = vmatmul.mubr.msk.f32.gmra.mrb[18].mxu1 %vm196_vm0, %v2898_v49 }
 0x135   : > { %646 = vmatprep.mubr.f32.mxu1 %v2666_v0 }
 0x136   : > { %2236 = vmatmul.mubr.msk.f32.gmra.mrb[30].mxu0 %vm196_vm0, %v2906_v50 }
 0x137   : > { %568 = vmatprep.mubr.f32.mxu0 %v2666_v0 }
 0x138   : > { %2250 = vmatmul.mubr.msk.f32.gmra.mrb[20].mxu1 %vm196_vm0, %v2914_v51 }
 0x139   : > { %652 = vmatprep.mubr.f32.mxu1 %v2666_v0 }
 0x13a   : > { %2237 = vmatmul.mubr.msk.f32.gmra.mrb[32].mxu0 %vm196_vm0, %v2922_v52 }
 0x13b   : > { %574 = vmatprep.mubr.f32.mxu0 %v2666_v0 }
 0x13c   : > { %2251 = vmatmul.mubr.msk.f32.gmra.mrb[22].mxu1 %vm196_vm0, %v2930_v53 }
 0x13d   : > { %658 = vmatprep.mubr.f32.mxu1 %v2666_v0 }
 0x13e   : > { %2238 = vmatmul.mubr.msk.f32.gmra.mrb[34].mxu0 %vm196_vm0, %v2938_v54 }
 0x13f   : > { %580 = vmatprep.mubr.f32.mxu0 %v2666_v0 }
 0x140   : > { %2252 = vmatmul.mubr.msk.f32.gmra.mrb[24].mxu1 %vm196_vm0, %v2946_v55 }
 0x141   : > { %664 = vmatprep.mubr.f32.mxu1 %v2666_v0 }
 0x142   : > { %2239 = vmatmul.mubr.msk.f32.gmra.mrb[36].mxu0 %vm196_vm0, %v2954_v56 }
 0x143   : > { %1117 = vmatprep.mubr.f32.mxu0 %v2666_v0 }
 0x144   : > { %2253 = vmatmul.mubr.msk.f32.gmra.mrb[26].mxu1 %vm196_vm0, %v2962_v57 }
 0x145   : > { %670 = vmatprep.mubr.f32.mxu1 %v2666_v0 }
 0x146   : > { %2291 = vmatmul.mubr.msk.f32.vlgmr.msra.gmra.mrb[38].mxu0 %vm196_vm0, %v2757_v21 }
 0x147   : > { %1123 = vmatprep.mubr.f32.mxu0 %v2666_v0 }
 0x148   : > { %2254 = vmatmul.mubr.msk.f32.gmra.mrb[28].mxu1 %vm196_vm0, %v2973_v58 }
 0x149   : > { %676 = vmatprep.mubr.f32.mxu1 %v2666_v0 }
 0x14a   : > { %2292 = vmatmul.mubr.msk.f32.gmra.mrb[40].mxu0 %vm196_vm0, %v2778_v28 }
 0x14b   : > { %1129 = vmatprep.mubr.f32.mxu0 %v2666_v0 }
 0x14c   : > { %2255 = vmatmul.mubr.msk.f32.gmra.mrb[30].mxu1 %vm196_vm0, %v2984_v59 }
 0x14d   : > { %682 = vmatprep.mubr.f32.mxu1 %v2666_v0 }
 0x14e   : > { %2293 = vmatmul.mubr.msk.f32.gmra.mrb[42].mxu0 %vm196_vm0, %v2794_v32 }
 0x14f   : > { %1135 = vmatprep.mubr.f32.mxu0 %v2666_v0 }
 0x150   : > { %2256 = vmatmul.mubr.msk.f32.gmra.mrb[32].mxu1 %vm196_vm0, %v2995_v60 }
 0x151   : > { %688 = vmatprep.mubr.f32.mxu1 %v2666_v0 }
 0x152   : > { %2294 = vmatmul.mubr.msk.f32.gmra.mrb[44].mxu0 %vm196_vm0, %v2810_v38 }
 0x153   : > { %1141 = vmatprep.mubr.f32.mxu0 %v2666_v0 }
 0x154   : > { %2257 = vmatmul.mubr.msk.f32.gmra.mrb[34].mxu1 %vm196_vm0, %v3006_v61 }
 0x155   : > { %694 = vmatprep.mubr.f32.mxu1 %v2666_v0 }
 0x156   : > { %2295 = vmatmul.mubr.msk.f32.gmra.mrb[46].mxu0 %vm196_vm0, %v2826_v40 }
 0x157   : > { %1147 = vmatprep.mubr.f32.mxu0 %v2666_v0 }
 0x158   : > { %2258 = vmatmul.mubr.msk.f32.gmra.mrb[36].mxu1 %vm196_vm0, %v3017_v62 }
 0x159   : > { %1727 = vmatprep.mubr.f32.mxu1 %v2666_v0 }
 0x15a   : > { %2296 = vmatmul.mubr.msk.f32.gmra.mrb[48].mxu0 %vm196_vm0, %v2842_v42 }
 0x15b   : > { %1153 = vmatprep.mubr.f32.mxu0 %v2666_v0 }
 0x15c   : > { %2387 = vmatmul.mubr.msk.f32.vlgmr.msra.gmra.mrb[38].mxu1 %vm196_vm0, %v2757_v21 }
 0x15d   : > { %1733 = vmatprep.mubr.f32.mxu1 %v2666_v0 }
 0x15e   : > { %2297 = vmatmul.mubr.msk.f32.gmra.mrb[50].mxu0 %vm196_vm0, %v2858_v44 }
 0x15f   : > { %1159 = vmatprep.mubr.f32.mxu0 %v2666_v0 }
 0x160   : > { %2388 = vmatmul.mubr.msk.f32.gmra.mrb[40].mxu1 %vm196_vm0, %v2778_v28 }
 0x161   : > { %1739 = vmatprep.mubr.f32.mxu1 %v2666_v0 }
 0x162   : > { %2298 = vmatmul.mubr.msk.f32.gmra.mrb[52].mxu0 %vm196_vm0, %v2874_v46 }
 0x163   : > { %1165 = vmatprep.mubr.f32.mxu0 %v2666_v0 }
 0x164   : > { %2389 = vmatmul.mubr.msk.f32.gmra.mrb[42].mxu1 %vm196_vm0, %v2794_v32 }
 0x165   : > { %1745 = vmatprep.mubr.f32.mxu1 %v2666_v0 }
 0x166   : > { %2299 = vmatmul.mubr.msk.f32.gmra.mrb[54].mxu0 %vm196_vm0, %v2890_v48 }
 0x167   : > { %1171 = vmatprep.mubr.f32.mxu0 %v2666_v0 }
 0x168   : > { %2390 = vmatmul.mubr.msk.f32.gmra.mrb[44].mxu1 %vm196_vm0, %v2810_v38 }
 0x169   : > { %1751 = vmatprep.mubr.f32.mxu1 %v2666_v0 }
 0x16a   : > { %2300 = vmatmul.mubr.msk.f32.gmra.mrb[56].mxu0 %vm196_vm0, %v2906_v50 }
 0x16b   : > { %1177 = vmatprep.mubr.f32.mxu0 %v2666_v0 }
 0x16c   : > { %2391 = vmatmul.mubr.msk.f32.gmra.mrb[46].mxu1 %vm196_vm0, %v2826_v40 }
 0x16d   : > { %1757 = vmatprep.mubr.f32.mxu1 %v2666_v0 }
 0x16e   : > { %2301 = vmatmul.mubr.msk.f32.gmra.mrb[58].mxu0 %vm196_vm0, %v2922_v52 }
 0x16f   : > { %1183 = vmatprep.mubr.f32.mxu0 %v2666_v0 }
 0x170   : > { %2392 = vmatmul.mubr.msk.f32.gmra.mrb[48].mxu1 %vm196_vm0, %v2842_v42 }
 0x171   : > { %1763 = vmatprep.mubr.f32.mxu1 %v2666_v0 }
 0x172   : > { %2302 = vmatmul.mubr.msk.f32.gmra.mrb[60].mxu0 %vm196_vm0, %v2938_v54 }
 0x173   : > { %1189 = vmatprep.mubr.f32.mxu0 %v2666_v0 }
 0x174   : > { %2393 = vmatmul.mubr.msk.f32.gmra.mrb[50].mxu1 %vm196_vm0, %v2858_v44 }
 0x175   : > { %1769 = vmatprep.mubr.f32.mxu1 %v2666_v0 }
 0x176   : > { %2303 = vmatmul.mubr.msk.f32.gmra.mrb[62].mxu0 %vm196_vm0, %v2954_v56 }
 0x177   : > { %1195 = vmatprep.mubr.f32.mxu0 %v2666_v0 }
 0x178   : > { %2394 = vmatmul.mubr.msk.f32.gmra.mrb[52].mxu1 %vm196_vm0, %v2874_v46 }
 0x179   : > { %1775 = vmatprep.mubr.f32.mxu1 %v2666_v0 }
 0x17a   : > { %2304 = vmatmul.mubr.msk.f32.gmra.mrb[64].mxu0 %vm196_vm0, %v2762_v22 }
 0x17b   : > { %1201 = vmatprep.mubr.f32.mxu0 %v2666_v0 }
 0x17c   : > { %2395 = vmatmul.mubr.msk.f32.gmra.mrb[54].mxu1 %vm196_vm0, %v2890_v48 }
 0x17d   : > { %1781 = vmatprep.mubr.f32.mxu1 %v2666_v0 }
 0x17e   : > { %2305 = vmatmul.mubr.msk.f32.gmra.mrb[66].mxu0 %vm196_vm0, %v2772_v26 }
 0x17f   : > { %1207 = vmatprep.mubr.f32.mxu0 %v2666_v0 }
 0x180   : > { %2396 = vmatmul.mubr.msk.f32.gmra.mrb[56].mxu1 %vm196_vm0, %v2906_v50 }
 0x181   : > { %1787 = vmatprep.mubr.f32.mxu1 %v2666_v0 }
 0x182   : > { %2306 = vmatmul.mubr.msk.f32.gmra.mrb[68].mxu0 %vm196_vm0, %v2786_v31 }
 0x183   : > { %1213 = vmatprep.mubr.f32.mxu0 %v2666_v0 }
 0x184   : > { %2397 = vmatmul.mubr.msk.f32.gmra.mrb[58].mxu1 %vm196_vm0, %v2922_v52 }
 0x185   : > { %1793 = vmatprep.mubr.f32.mxu1 %v2666_v0 }
 0x186   : > { %2307 = vmatmul.mubr.msk.f32.gmra.mrb[70].mxu0 %vm196_vm0, %v2802_v36 }
 0x187   : > { %1219 = vmatprep.mubr.f32.mxu0 %v2666_v0 }
 0x188   : > { %2398 = vmatmul.mubr.msk.f32.gmra.mrb[60].mxu1 %vm196_vm0, %v2938_v54 }
 0x189   : > { %1799 = vmatprep.mubr.f32.mxu1 %v2666_v0 }
 0x18a   : > { %2308 = vmatmul.mubr.msk.f32.gmra.mrb[72].mxu0 %vm196_vm0, %v2818_v39 }
 0x18b   : > { %1225 = vmatprep.mubr.f32.mxu0 %v2666_v0 }
 0x18c   : > { %2399 = vmatmul.mubr.msk.f32.gmra.mrb[62].mxu1 %vm196_vm0, %v2954_v56 }
 0x18d   : > { %1805 = vmatprep.mubr.f32.mxu1 %v2666_v0 }
 0x18e   : > { %2309 = vmatmul.mubr.msk.f32.gmra.mrb[74].mxu0 %vm196_vm0, %v2834_v41 }
 0x18f   : > { %1231 = vmatprep.mubr.f32.mxu0 %v2666_v0 }
 0x190   : > { %2400 = vmatmul.mubr.msk.f32.gmra.mrb[64].mxu1 %vm196_vm0, %v2762_v22 }
 0x191   : > { %1811 = vmatprep.mubr.f32.mxu1 %v2666_v0 }
 0x192   : > { %2310 = vmatmul.mubr.msk.f32.gmra.mrb[76].mxu0 %vm196_vm0, %v2850_v43 }
 0x193   : > { %1237 = vmatprep.mubr.f32.mxu0 %v2666_v0 }
 0x194   : > { %2401 = vmatmul.mubr.msk.f32.gmra.mrb[66].mxu1 %vm196_vm0, %v2772_v26 }
 0x195   : > { %1817 = vmatprep.mubr.f32.mxu1 %v2666_v0 }
 0x196   : > { %2311 = vmatmul.mubr.msk.f32.gmra.mrb[78].mxu0 %vm196_vm0, %v2866_v45 }
 0x197   : > { %1243 = vmatprep.mubr.f32.mxu0 %v2666_v0 }
 0x198   : > { %2402 = vmatmul.mubr.msk.f32.gmra.mrb[68].mxu1 %vm196_vm0, %v2786_v31 }
 0x199   : > { %1823 = vmatprep.mubr.f32.mxu1 %v2666_v0 }
 0x19a   : > { %2312 = vmatmul.mubr.msk.f32.gmra.mrb[80].mxu0 %vm196_vm0, %v2882_v47 }
 0x19b   : > { %1249 = vmatprep.mubr.f32.mxu0 %v2666_v0 }
 0x19c   : > { %2403 = vmatmul.mubr.msk.f32.gmra.mrb[70].mxu1 %vm196_vm0, %v2802_v36 }
 0x19d   : > { %1829 = vmatprep.mubr.f32.mxu1 %v2666_v0 }
 0x19e   : > { %2313 = vmatmul.mubr.msk.f32.gmra.mrb[82].mxu0 %vm196_vm0, %v2898_v49 }
 0x19f   : > { %1255 = vmatprep.mubr.f32.mxu0 %v2666_v0 }
 0x1a0   : > { %2404 = vmatmul.mubr.msk.f32.gmra.mrb[72].mxu1 %vm196_vm0, %v2818_v39 }
 0x1a1   : > { %1835 = vmatprep.mubr.f32.mxu1 %v2666_v0 }
 0x1a2   : > { %2314 = vmatmul.mubr.msk.f32.gmra.mrb[84].mxu0 %vm196_vm0, %v2914_v51 }
 0x1a3   : > { %1261 = vmatprep.mubr.f32.mxu0 %v2666_v0 }
 0x1a4   : > { %2405 = vmatmul.mubr.msk.f32.gmra.mrb[74].mxu1 %vm196_vm0, %v2834_v41 }
 0x1a5   : > { %1841 = vmatprep.mubr.f32.mxu1 %v2666_v0 }
 0x1a6   : > { %2315 = vmatmul.mubr.msk.f32.gmra.mrb[86].mxu0 %vm196_vm0, %v2930_v53 }
 0x1a7   : > { %1267 = vmatprep.mubr.f32.mxu0 %v2666_v0 }
 0x1a8   : > { %2406 = vmatmul.mubr.msk.f32.gmra.mrb[76].mxu1 %vm196_vm0, %v2850_v43 }
 0x1a9   : > { %1847 = vmatprep.mubr.f32.mxu1 %v2666_v0 }
 0x1aa   : > { %2316 = vmatmul.mubr.msk.f32.gmra.mrb[88].mxu0 %vm196_vm0, %v2946_v55 }
 0x1ab   : > { %1273 = vmatprep.mubr.f32.mxu0 %v2666_v0 }
 0x1ac   : > { %2407 = vmatmul.mubr.msk.f32.gmra.mrb[78].mxu1 %vm196_vm0, %v2866_v45 }
 0x1ad   : > { %1853 = vmatprep.mubr.f32.mxu1 %v2666_v0 }
 0x1ae   : > { %2317 = vmatmul.mubr.msk.f32.gmra.mrb[90].mxu0 %vm196_vm0, %v2962_v57 }
 0x1af   : > { %1279 = vmatprep.mubr.f32.mxu0 %v2666_v0 }
 0x1b0   : > { %2408 = vmatmul.mubr.msk.f32.gmra.mrb[80].mxu1 %vm196_vm0, %v2882_v47 }
 0x1b1   : > { %1859 = vmatprep.mubr.f32.mxu1 %v2666_v0 }
 0x1b2   : > { %2318 = vmatmul.mubr.msk.f32.gmra.mrb[92].mxu0 %vm196_vm0, %v2973_v58 }
 0x1b3   : > { %1285 = vmatprep.mubr.f32.mxu0 %v2666_v0 }
 0x1b4   : > { %2409 = vmatmul.mubr.msk.f32.gmra.mrb[82].mxu1 %vm196_vm0, %v2898_v49 }
 0x1b5   : > { %1865 = vmatprep.mubr.f32.mxu1 %v2666_v0 }
 0x1b6   : > { %2319 = vmatmul.mubr.msk.f32.gmra.mrb[94].mxu0 %vm196_vm0, %v2984_v59 }
 0x1b7   : > { %1291 = vmatprep.mubr.f32.mxu0 %v2666_v0 }
 0x1b8   : > { %2410 = vmatmul.mubr.msk.f32.gmra.mrb[84].mxu1 %vm196_vm0, %v2914_v51 }
 0x1b9   : > { %1871 = vmatprep.mubr.f32.mxu1 %v2666_v0 }
 0x1ba   : > { %2320 = vmatmul.mubr.msk.f32.gmra.mrb[96].mxu0 %vm196_vm0, %v2995_v60 }
 0x1bb   : > { %1297 = vmatprep.mubr.f32.mxu0 %v2666_v0 }
 0x1bc   : > { %2411 = vmatmul.mubr.msk.f32.gmra.mrb[86].mxu1 %vm196_vm0, %v2930_v53 }
 0x1bd   : > { %1877 = vmatprep.mubr.f32.mxu1 %v2666_v0 }
 0x1be   : > { %2321 = vmatmul.mubr.msk.f32.gmra.mrb[98].mxu0 %vm196_vm0, %v3006_v61 }
 0x1bf   : > { %1303 = vmatprep.mubr.f32.mxu0 %v2666_v0 }
 0x1c0   : > { %2412 = vmatmul.mubr.msk.f32.gmra.mrb[88].mxu1 %vm196_vm0, %v2946_v55 }
 0x1c1   : > { %1883 = vmatprep.mubr.f32.mxu1 %v2666_v0 }
 0x1c2   : > { %2322 = vmatmul.mubr.msk.f32.gmra.mrb[100].mxu0 %vm196_vm0, %v3017_v62 }
 0x1c4   : > { %2413 = vmatmul.mubr.msk.f32.gmra.mrb[90].mxu1 %vm196_vm0, %v2962_v57 }
 0x1c5   : > { %1889 = vmatprep.mubr.f32.mxu1 %v2666_v0 }
 0x1c8   : > { %2414 = vmatmul.mubr.msk.f32.gmra.mrb[92].mxu1 %vm196_vm0, %v2973_v58 }
 0x1c9   : > { %1895 = vmatprep.mubr.f32.mxu1 %v2666_v0 }
 0x1cc   : > { %2415 = vmatmul.mubr.msk.f32.gmra.mrb[94].mxu1 %vm196_vm0, %v2984_v59 }
 0x1cd   : > { %1901 = vmatprep.mubr.f32.mxu1 %v2666_v0 }
 0x1d0   : > { %2416 = vmatmul.mubr.msk.f32.gmra.mrb[96].mxu1 %vm196_vm0, %v2995_v60 }
 0x1d1   : > { %1907 = vmatprep.mubr.f32.mxu1 %v2666_v0 }
 0x1d4   : > { %2417 = vmatmul.mubr.msk.f32.gmra.mrb[98].mxu1 %vm196_vm0, %v3006_v61 }
 0x1d5   : > { %1913 = vmatprep.mubr.f32.mxu1 %v2666_v0 }
 0x1d8   : > { %2418 = vmatmul.mubr.msk.f32.gmra.mrb[100].mxu1 %vm196_vm0, %v3017_v62 }
 0x1e3   : > { %v588_v63 = vpop.f32.mrb[0].mxu1  ;;  %v510_v1 = vpop.f32.mrb[12].mxu0 }
 0x1e4   : > { %v590_v2 = vpop.f32.mrb[1].mxu1  ;;  %v512_v3 = vpop.f32.mrb[13].mxu0 }
 0x1e5   : > { %v2498_v4 = vpack.c.bf16 %v590_v2, %v588_v63  ;;  %v2485_v5 = vpack.c.bf16 %v512_v3, %v510_v1 }
 0x1e7   : > { %906 = vst [vmem:[%s3204_s26 + $0x68] sm:$0xff] %v2498_v4  ;;  %v594_v0 = vpop.f32.mrb[2].mxu1  ;;  %893 = vst [vmem:[%s3204_s26] sm:$0xff] %v2485_v5 }
 0x1e8   : > { %v596_v6 = vpop.f32.mrb[3].mxu1 }
 0x1e9   : > { %v2499_v7 = vpack.c.bf16 %v596_v6, %v594_v0  ;;  %v516_v8 = vpop.f32.mrb[14].mxu0 }
 0x1ea   : > { %v518_v9 = vpop.f32.mrb[15].mxu0 }
 0x1eb   : > { %907 = vst [vmem:[%s3204_s26 + $0x70] sm:$0xff] %v2499_v7  ;;  %v600_v10 = vpop.f32.mrb[4].mxu1  ;;  %v2486_v11 = vpack.c.bf16 %v518_v9, %v516_v8 }
 0x1ec   : > { %v602_v12 = vpop.f32.mrb[5].mxu1 }
 0x1ed   : > { %v2500_v13 = vpack.c.bf16 %v602_v12, %v600_v10  ;;  %894 = vst [vmem:[%s3204_s26 + $0x8] sm:$0xff] %v2486_v11  ;;  %v522_v14 = vpop.f32.mrb[16].mxu0 }
 0x1ee   : > { %v524_v15 = vpop.f32.mrb[17].mxu0 }
 0x1ef   : > { %908 = vst [vmem:[%s3204_s26 + $0x78] sm:$0xff] %v2500_v13  ;;  %v606_v16 = vpop.f32.mrb[6].mxu1  ;;  %v2487_v17 = vpack.c.bf16 %v524_v15, %v522_v14 }
 0x1f0   : > { %v608_v18 = vpop.f32.mrb[7].mxu1 }
 0x1f1   : > { %v2501_v19 = vpack.c.bf16 %v608_v18, %v606_v16  ;;  %895 = vst [vmem:[%s3204_s26 + $0x10] sm:$0xff] %v2487_v17  ;;  %v528_v20 = vpop.f32.mrb[18].mxu0 }
 0x1f2   : > { %v530_v21 = vpop.f32.mrb[19].mxu0 }
 0x1f3   : > { %909 = vst [vmem:[%s3204_s26 + $0x80] sm:$0xff] %v2501_v19  ;;  %v612_v22 = vpop.f32.mrb[8].mxu1  ;;  %v2488_v23 = vpack.c.bf16 %v530_v21, %v528_v20 }
 0x1f4   : > { %v614_v24 = vpop.f32.mrb[9].mxu1 }
 0x1f5   : > { %v2502_v25 = vpack.c.bf16 %v614_v24, %v612_v22  ;;  %896 = vst [vmem:[%s3204_s26 + $0x18] sm:$0xff] %v2488_v23  ;;  %v534_v26 = vpop.f32.mrb[20].mxu0 }
 0x1f6   : > { %v536_v27 = vpop.f32.mrb[21].mxu0 }
 0x1f7   : > { %910 = vst [vmem:[%s3204_s26 + $0x88] sm:$0xff] %v2502_v25  ;;  %v618_v28 = vpop.f32.mrb[10].mxu1  ;;  %v2489_v29 = vpack.c.bf16 %v536_v27, %v534_v26 }
 0x1f8   : > { %v620_v30 = vpop.f32.mrb[11].mxu1 }
 0x1f9   : > { %v2503_v31 = vpack.c.bf16 %v620_v30, %v618_v28  ;;  %897 = vst [vmem:[%s3204_s26 + $0x20] sm:$0xff] %v2489_v29  ;;  %v540_v32 = vpop.f32.mrb[22].mxu0 }
 0x1fa   : > { %v542_v33 = vpop.f32.mrb[23].mxu0 }
 0x1fb   : > { %911 = vst [vmem:[%s3204_s26 + $0x90] sm:$0xff] %v2503_v31  ;;  %v624_v34 = vpop.f32.mrb[12].mxu1  ;;  %v2490_v35 = vpack.c.bf16 %v542_v33, %v540_v32 }
 0x1fc   : > { %v626_v36 = vpop.f32.mrb[13].mxu1 }
 0x1fd   : > { %v2504_v37 = vpack.c.bf16 %v626_v36, %v624_v34  ;;  %898 = vst [vmem:[%s3204_s26 + $0x28] sm:$0xff] %v2490_v35  ;;  %v546_v38 = vpop.f32.mrb[24].mxu0 }
 0x1fe   : > { %v548_v39 = vpop.f32.mrb[25].mxu0 }
 0x1ff   : > { %912 = vst [vmem:[%s3204_s26 + $0x98] sm:$0xff] %v2504_v37  ;;  %v630_v40 = vpop.f32.mrb[14].mxu1  ;;  %v2491_v41 = vpack.c.bf16 %v548_v39, %v546_v38 }
 0x200   : > { %v632_v42 = vpop.f32.mrb[15].mxu1 }
 0x201   : > { %v2505_v43 = vpack.c.bf16 %v632_v42, %v630_v40  ;;  %899 = vst [vmem:[%s3204_s26 + $0x30] sm:$0xff] %v2491_v41  ;;  %v552_v44 = vpop.f32.mrb[26].mxu0 }
 0x202   : > { %v554_v45 = vpop.f32.mrb[27].mxu0 }
 0x203   : > { %913 = vst [vmem:[%s3204_s26 + $0xa0] sm:$0xff] %v2505_v43  ;;  %v636_v46 = vpop.f32.mrb[16].mxu1  ;;  %v2492_v47 = vpack.c.bf16 %v554_v45, %v552_v44 }
 0x204   : > { %v638_v48 = vpop.f32.mrb[17].mxu1 }
 0x205   : > { %v2506_v49 = vpack.c.bf16 %v638_v48, %v636_v46  ;;  %900 = vst [vmem:[%s3204_s26 + $0x38] sm:$0xff] %v2492_v47  ;;  %v558_v50 = vpop.f32.mrb[28].mxu0 }
 0x206   : > { %v560_v51 = vpop.f32.mrb[29].mxu0 }
 0x207   : > { %914 = vst [vmem:[%s3204_s26 + $0xa8] sm:$0xff] %v2506_v49  ;;  %v642_v52 = vpop.f32.mrb[18].mxu1  ;;  %v2493_v53 = vpack.c.bf16 %v560_v51, %v558_v50 }
 0x208   : > { %v644_v54 = vpop.f32.mrb[19].mxu1 }
 0x209   : > { %v2507_v55 = vpack.c.bf16 %v644_v54, %v642_v52  ;;  %901 = vst [vmem:[%s3204_s26 + $0x40] sm:$0xff] %v2493_v53  ;;  %v564_v56 = vpop.f32.mrb[30].mxu0 }
 0x20a   : > { %v566_v57 = vpop.f32.mrb[31].mxu0 }
 0x20b   : > { %915 = vst [vmem:[%s3204_s26 + $0xb0] sm:$0xff] %v2507_v55  ;;  %v648_v58 = vpop.f32.mrb[20].mxu1  ;;  %v2494_v59 = vpack.c.bf16 %v566_v57, %v564_v56 }
 0x20c   : > { %v650_v60 = vpop.f32.mrb[21].mxu1 }
 0x20d   : > { %v2508_v61 = vpack.c.bf16 %v650_v60, %v648_v58  ;;  %902 = vst [vmem:[%s3204_s26 + $0x48] sm:$0xff] %v2494_v59  ;;  %v570_v62 = vpop.f32.mrb[32].mxu0 }
 0x20e   : > { %v572_v63 = vpop.f32.mrb[33].mxu0 }
 0x20f   : > { %916 = vst [vmem:[%s3204_s26 + $0xb8] sm:$0xff] %v2508_v61  ;;  %v654_v1 = vpop.f32.mrb[22].mxu1  ;;  %v2495_v2 = vpack.c.bf16 %v572_v63, %v570_v62 }
 0x210   : > { %v656_v3 = vpop.f32.mrb[23].mxu1 }
 0x211   : > { %v2509_v4 = vpack.c.bf16 %v656_v3, %v654_v1  ;;  %903 = vst [vmem:[%s3204_s26 + $0x50] sm:$0xff] %v2495_v2  ;;  %v576_v5 = vpop.f32.mrb[34].mxu0 }
 0x212   : > { %v578_v0 = vpop.f32.mrb[35].mxu0 }
 0x213   : > { %917 = vst [vmem:[%s3204_s26 + $0xc0] sm:$0xff] %v2509_v4  ;;  %v660_v6 = vpop.f32.mrb[24].mxu1  ;;  %v2496_v7 = vpack.c.bf16 %v578_v0, %v576_v5 }
 0x214   : > { %v662_v8 = vpop.f32.mrb[25].mxu1 }
 0x215   : > { %v2510_v9 = vpack.c.bf16 %v662_v8, %v660_v6  ;;  %904 = vst [vmem:[%s3204_s26 + $0x58] sm:$0xff] %v2496_v7  ;;  %v582_v10 = vpop.f32.mrb[36].mxu0 }
 0x216   : > { %v584_v11 = vpop.f32.mrb[37].mxu0 }
 0x217   : > { %918 = vst [vmem:[%s3204_s26 + $0xc8] sm:$0xff] %v2510_v9  ;;  %v666_v12 = vpop.f32.mrb[26].mxu1  ;;  %v2497_v13 = vpack.c.bf16 %v584_v11, %v582_v10 }
 0x218   : > { %v668_v14 = vpop.f32.mrb[27].mxu1 }
 0x219   : > { %v2511_v15 = vpack.c.bf16 %v668_v14, %v666_v12  ;;  %905 = vst [vmem:[%s3204_s26 + $0x60] sm:$0xff] %v2497_v13  ;;  %v1119_v16 = vpop.f32.mrb[38].mxu0 }
 0x21a   : > { %v1121_v17 = vpop.f32.mrb[39].mxu0 }
 0x21b   : > { %919 = vst [vmem:[%s3204_s26 + $0xd0] sm:$0xff] %v2511_v15  ;;  %v672_v18 = vpop.f32.mrb[28].mxu1  ;;  %v2517_v19 = vpack.c.bf16 %v1121_v17, %v1119_v16 }
 0x21c   : > { %v674_v20 = vpop.f32.mrb[29].mxu1 }
 0x21d   : > { %v2512_v21 = vpack.c.bf16 %v674_v20, %v672_v18  ;;  %2355 = vst [vmem:[%s3204_s26 + $0x100] sm:$0xff] %v2517_v19  ;;  %v1125_v22 = vpop.f32.mrb[40].mxu0 }
 0x21e   : > { %v1127_v23 = vpop.f32.mrb[41].mxu0 }
 0x21f   : > { %920 = vst [vmem:[%s3204_s26 + $0xd8] sm:$0xff] %v2512_v21  ;;  %v678_v24 = vpop.f32.mrb[30].mxu1  ;;  %v2518_v25 = vpack.c.bf16 %v1127_v23, %v1125_v22 }
 0x220   : > { %v680_v26 = vpop.f32.mrb[31].mxu1 }
 0x221   : > { %v2513_v27 = vpack.c.bf16 %v680_v26, %v678_v24  ;;  %2356 = vst [vmem:[%s3204_s26 + $0x108] sm:$0xff] %v2518_v25  ;;  %v1131_v28 = vpop.f32.mrb[42].mxu0 }
 0x222   : > { %v1133_v29 = vpop.f32.mrb[43].mxu0 }
 0x223   : > { %921 = vst [vmem:[%s3204_s26 + $0xe0] sm:$0xff] %v2513_v27  ;;  %v684_v30 = vpop.f32.mrb[32].mxu1  ;;  %v2519_v31 = vpack.c.bf16 %v1133_v29, %v1131_v28 }
 0x224   : > { %v686_v32 = vpop.f32.mrb[33].mxu1 }
 0x225   : > { %v2514_v33 = vpack.c.bf16 %v686_v32, %v684_v30  ;;  %2357 = vst [vmem:[%s3204_s26 + $0x110] sm:$0xff] %v2519_v31  ;;  %v1137_v34 = vpop.f32.mrb[44].mxu0 }
 0x226   : > { %v1139_v35 = vpop.f32.mrb[45].mxu0 }
 0x227   : > { %922 = vst [vmem:[%s3204_s26 + $0xe8] sm:$0xff] %v2514_v33  ;;  %v690_v36 = vpop.f32.mrb[34].mxu1  ;;  %v2520_v37 = vpack.c.bf16 %v1139_v35, %v1137_v34 }
 0x228   : > { %v692_v38 = vpop.f32.mrb[35].mxu1 }
 0x229   : > { %v2515_v39 = vpack.c.bf16 %v692_v38, %v690_v36  ;;  %2358 = vst [vmem:[%s3204_s26 + $0x118] sm:$0xff] %v2520_v37  ;;  %v1143_v40 = vpop.f32.mrb[46].mxu0 }
 0x22a   : > { %v1145_v41 = vpop.f32.mrb[47].mxu0 }
 0x22b   : > { %923 = vst [vmem:[%s3204_s26 + $0xf0] sm:$0xff] %v2515_v39  ;;  %v696_v42 = vpop.f32.mrb[36].mxu1  ;;  %v2521_v43 = vpack.c.bf16 %v1145_v41, %v1143_v40 }
 0x22c   : > { %v698_v44 = vpop.f32.mrb[37].mxu1 }
 0x22d   : > { %v2516_v45 = vpack.c.bf16 %v698_v44, %v696_v42  ;;  %2359 = vst [vmem:[%s3204_s26 + $0x120] sm:$0xff] %v2521_v43  ;;  %v1149_v46 = vpop.f32.mrb[48].mxu0 }
 0x22e   : > { %v1151_v47 = vpop.f32.mrb[49].mxu0 }
 0x22f   : > { %924 = vst [vmem:[%s3204_s26 + $0xf8] sm:$0xff] %v2516_v45  ;;  %v1729_v48 = vpop.f32.mrb[38].mxu1  ;;  %v2522_v49 = vpack.c.bf16 %v1151_v47, %v1149_v46 }
 0x230   : > { %v1731_v50 = vpop.f32.mrb[39].mxu1 }
 0x231   : > { %v2549_v51 = vpack.c.bf16 %v1731_v50, %v1729_v48  ;;  %2360 = vst [vmem:[%s3204_s26 + $0x128] sm:$0xff] %v2522_v49  ;;  %v1155_v52 = vpop.f32.mrb[50].mxu0 }
 0x232   : > { %v1157_v53 = vpop.f32.mrb[51].mxu0 }
 0x233   : > { %2451 = vst [vmem:[%s3204_s26 + $0x200] sm:$0xff] %v2549_v51  ;;  %v1735_v54 = vpop.f32.mrb[40].mxu1  ;;  %v2523_v55 = vpack.c.bf16 %v1157_v53, %v1155_v52 }
 0x234   : > { %v1737_v56 = vpop.f32.mrb[41].mxu1 }
 0x235   : > { %v2550_v57 = vpack.c.bf16 %v1737_v56, %v1735_v54  ;;  %2361 = vst [vmem:[%s3204_s26 + $0x130] sm:$0xff] %v2523_v55  ;;  %v1161_v58 = vpop.f32.mrb[52].mxu0 }
 0x236   : > { %v1163_v59 = vpop.f32.mrb[53].mxu0 }
 0x237   : > { %2452 = vst [vmem:[%s3204_s26 + $0x208] sm:$0xff] %v2550_v57  ;;  %v1741_v60 = vpop.f32.mrb[42].mxu1  ;;  %v2524_v61 = vpack.c.bf16 %v1163_v59, %v1161_v58 }
 0x238   : > { %v1743_v62 = vpop.f32.mrb[43].mxu1 }
 0x239   : > { %v2551_v63 = vpack.c.bf16 %v1743_v62, %v1741_v60  ;;  %2362 = vst [vmem:[%s3204_s26 + $0x138] sm:$0xff] %v2524_v61  ;;  %v1167_v1 = vpop.f32.mrb[54].mxu0 }
 0x23a   : > { %v1169_v2 = vpop.f32.mrb[55].mxu0 }
 0x23b   : > { %2453 = vst [vmem:[%s3204_s26 + $0x210] sm:$0xff] %v2551_v63  ;;  %v1747_v3 = vpop.f32.mrb[44].mxu1  ;;  %v2525_v4 = vpack.c.bf16 %v1169_v2, %v1167_v1 }
 0x23c   : > { %v1749_v5 = vpop.f32.mrb[45].mxu1 }
 0x23d   : > { %v2552_v0 = vpack.c.bf16 %v1749_v5, %v1747_v3  ;;  %2363 = vst [vmem:[%s3204_s26 + $0x140] sm:$0xff] %v2525_v4  ;;  %v1173_v6 = vpop.f32.mrb[56].mxu0 }
 0x23e   : > { %v1175_v7 = vpop.f32.mrb[57].mxu0 }
 0x23f   : > { %2454 = vst [vmem:[%s3204_s26 + $0x218] sm:$0xff] %v2552_v0  ;;  %v1753_v8 = vpop.f32.mrb[46].mxu1  ;;  %v2526_v9 = vpack.c.bf16 %v1175_v7, %v1173_v6 }
 0x240   : > { %v1755_v10 = vpop.f32.mrb[47].mxu1 }
 0x241   : > { %v2553_v11 = vpack.c.bf16 %v1755_v10, %v1753_v8  ;;  %2364 = vst [vmem:[%s3204_s26 + $0x148] sm:$0xff] %v2526_v9  ;;  %v1179_v12 = vpop.f32.mrb[58].mxu0 }
 0x242   : > { %v1181_v13 = vpop.f32.mrb[59].mxu0 }
 0x243   : > { %2455 = vst [vmem:[%s3204_s26 + $0x220] sm:$0xff] %v2553_v11  ;;  %v1759_v14 = vpop.f32.mrb[48].mxu1  ;;  %v2527_v15 = vpack.c.bf16 %v1181_v13, %v1179_v12 }
 0x244   : > { %v1761_v16 = vpop.f32.mrb[49].mxu1 }
 0x245   : > { %v2554_v17 = vpack.c.bf16 %v1761_v16, %v1759_v14  ;;  %2365 = vst [vmem:[%s3204_s26 + $0x150] sm:$0xff] %v2527_v15  ;;  %v1185_v18 = vpop.f32.mrb[60].mxu0 }
 0x246   : > { %v1187_v19 = vpop.f32.mrb[61].mxu0 }
 0x247   : > { %2456 = vst [vmem:[%s3204_s26 + $0x228] sm:$0xff] %v2554_v17  ;;  %v1765_v20 = vpop.f32.mrb[50].mxu1  ;;  %v2528_v21 = vpack.c.bf16 %v1187_v19, %v1185_v18 }
 0x248   : > { %v1767_v22 = vpop.f32.mrb[51].mxu1 }
 0x249   : > { %v2555_v23 = vpack.c.bf16 %v1767_v22, %v1765_v20  ;;  %2366 = vst [vmem:[%s3204_s26 + $0x158] sm:$0xff] %v2528_v21  ;;  %v1191_v24 = vpop.f32.mrb[62].mxu0 }
 0x24a   : > { %v1193_v25 = vpop.f32.mrb[63].mxu0 }
 0x24b   : > { %2457 = vst [vmem:[%s3204_s26 + $0x230] sm:$0xff] %v2555_v23  ;;  %v1771_v26 = vpop.f32.mrb[52].mxu1  ;;  %v2529_v27 = vpack.c.bf16 %v1193_v25, %v1191_v24 }
 0x24c   : > { %v1773_v28 = vpop.f32.mrb[53].mxu1 }
 0x24d   : > { %v2556_v29 = vpack.c.bf16 %v1773_v28, %v1771_v26  ;;  %2367 = vst [vmem:[%s3204_s26 + $0x160] sm:$0xff] %v2529_v27  ;;  %v1197_v30 = vpop.f32.mrb[64].mxu0 }
 0x24e   : > { %v1199_v31 = vpop.f32.mrb[65].mxu0 }
 0x24f   : > { %2458 = vst [vmem:[%s3204_s26 + $0x238] sm:$0xff] %v2556_v29  ;;  %v1777_v32 = vpop.f32.mrb[54].mxu1  ;;  %v2530_v33 = vpack.c.bf16 %v1199_v31, %v1197_v30 }
 0x250   : > { %v1779_v34 = vpop.f32.mrb[55].mxu1 }
 0x251   : > { %v2557_v35 = vpack.c.bf16 %v1779_v34, %v1777_v32  ;;  %2368 = vst [vmem:[%s3204_s26 + $0x168] sm:$0xff] %v2530_v33  ;;  %v1203_v36 = vpop.f32.mrb[66].mxu0 }
 0x252   : > { %v1205_v37 = vpop.f32.mrb[67].mxu0 }
 0x253   : > { %2459 = vst [vmem:[%s3204_s26 + $0x240] sm:$0xff] %v2557_v35  ;;  %v1783_v38 = vpop.f32.mrb[56].mxu1  ;;  %v2531_v39 = vpack.c.bf16 %v1205_v37, %v1203_v36 }
 0x254   : > { %v1785_v40 = vpop.f32.mrb[57].mxu1 }
 0x255   : > { %v2558_v41 = vpack.c.bf16 %v1785_v40, %v1783_v38  ;;  %2369 = vst [vmem:[%s3204_s26 + $0x170] sm:$0xff] %v2531_v39  ;;  %v1209_v42 = vpop.f32.mrb[68].mxu0 }
 0x256   : > { %v1211_v43 = vpop.f32.mrb[69].mxu0 }
 0x257   : > { %2460 = vst [vmem:[%s3204_s26 + $0x248] sm:$0xff] %v2558_v41  ;;  %v1789_v44 = vpop.f32.mrb[58].mxu1  ;;  %v2532_v45 = vpack.c.bf16 %v1211_v43, %v1209_v42 }
 0x258   : > { %v1791_v46 = vpop.f32.mrb[59].mxu1 }
 0x259   : > { %v2559_v47 = vpack.c.bf16 %v1791_v46, %v1789_v44  ;;  %2370 = vst [vmem:[%s3204_s26 + $0x178] sm:$0xff] %v2532_v45  ;;  %v1215_v48 = vpop.f32.mrb[70].mxu0 }
 0x25a   : > { %v1217_v49 = vpop.f32.mrb[71].mxu0 }
 0x25b   : > { %2461 = vst [vmem:[%s3204_s26 + $0x250] sm:$0xff] %v2559_v47  ;;  %v1795_v50 = vpop.f32.mrb[60].mxu1  ;;  %v2533_v51 = vpack.c.bf16 %v1217_v49, %v1215_v48 }
 0x25c   : > { %v1797_v52 = vpop.f32.mrb[61].mxu1 }
 0x25d   : > { %v2560_v53 = vpack.c.bf16 %v1797_v52, %v1795_v50  ;;  %2371 = vst [vmem:[%s3204_s26 + $0x180] sm:$0xff] %v2533_v51  ;;  %v1221_v54 = vpop.f32.mrb[72].mxu0 }
 0x25e   : > { %v1223_v55 = vpop.f32.mrb[73].mxu0 }
 0x25f   : > { %2462 = vst [vmem:[%s3204_s26 + $0x258] sm:$0xff] %v2560_v53  ;;  %v1801_v56 = vpop.f32.mrb[62].mxu1  ;;  %v2534_v57 = vpack.c.bf16 %v1223_v55, %v1221_v54 }
 0x260   : > { %v1803_v58 = vpop.f32.mrb[63].mxu1 }
 0x261   : > { %v2561_v59 = vpack.c.bf16 %v1803_v58, %v1801_v56  ;;  %2372 = vst [vmem:[%s3204_s26 + $0x188] sm:$0xff] %v2534_v57  ;;  %v1227_v60 = vpop.f32.mrb[74].mxu0 }
 0x262   : > { %v1229_v61 = vpop.f32.mrb[75].mxu0 }
 0x263   : > { %2463 = vst [vmem:[%s3204_s26 + $0x260] sm:$0xff] %v2561_v59  ;;  %v1807_v62 = vpop.f32.mrb[64].mxu1  ;;  %v2535_v63 = vpack.c.bf16 %v1229_v61, %v1227_v60 }
 0x264   : > { %v1809_v1 = vpop.f32.mrb[65].mxu1 }
 0x265   : > { %v2562_v2 = vpack.c.bf16 %v1809_v1, %v1807_v62  ;;  %2373 = vst [vmem:[%s3204_s26 + $0x190] sm:$0xff] %v2535_v63  ;;  %v1233_v3 = vpop.f32.mrb[76].mxu0 }
 0x266   : > { %v1235_v4 = vpop.f32.mrb[77].mxu0 }
 0x267   : > { %2464 = vst [vmem:[%s3204_s26 + $0x268] sm:$0xff] %v2562_v2  ;;  %v1813_v5 = vpop.f32.mrb[66].mxu1  ;;  %v2536_v0 = vpack.c.bf16 %v1235_v4, %v1233_v3 }
 0x268   : > { %v1815_v6 = vpop.f32.mrb[67].mxu1 }
 0x269   : > { %v2563_v7 = vpack.c.bf16 %v1815_v6, %v1813_v5  ;;  %2374 = vst [vmem:[%s3204_s26 + $0x198] sm:$0xff] %v2536_v0  ;;  %v1239_v8 = vpop.f32.mrb[78].mxu0 }
 0x26a   : > { %v1241_v9 = vpop.f32.mrb[79].mxu0 }
 0x26b   : > { %2465 = vst [vmem:[%s3204_s26 + $0x270] sm:$0xff] %v2563_v7  ;;  %v1819_v10 = vpop.f32.mrb[68].mxu1  ;;  %v2537_v11 = vpack.c.bf16 %v1241_v9, %v1239_v8 }
 0x26c   : > { %v1821_v12 = vpop.f32.mrb[69].mxu1 }
 0x26d   : > { %v2564_v13 = vpack.c.bf16 %v1821_v12, %v1819_v10  ;;  %2375 = vst [vmem:[%s3204_s26 + $0x1a0] sm:$0xff] %v2537_v11  ;;  %v1245_v14 = vpop.f32.mrb[80].mxu0 }
 0x26e   : > { %v1247_v15 = vpop.f32.mrb[81].mxu0 }
 0x26f   : > { %2466 = vst [vmem:[%s3204_s26 + $0x278] sm:$0xff] %v2564_v13  ;;  %v1825_v16 = vpop.f32.mrb[70].mxu1  ;;  %v2538_v17 = vpack.c.bf16 %v1247_v15, %v1245_v14 }
 0x270   : > { %v1827_v18 = vpop.f32.mrb[71].mxu1 }
 0x271   : > { %v2565_v19 = vpack.c.bf16 %v1827_v18, %v1825_v16  ;;  %2376 = vst [vmem:[%s3204_s26 + $0x1a8] sm:$0xff] %v2538_v17  ;;  %v1251_v20 = vpop.f32.mrb[82].mxu0 }
 0x272   : > { %v1253_v21 = vpop.f32.mrb[83].mxu0 }
 0x273   : > { %2467 = vst [vmem:[%s3204_s26 + $0x280] sm:$0xff] %v2565_v19  ;;  %v1831_v22 = vpop.f32.mrb[72].mxu1  ;;  %v2539_v23 = vpack.c.bf16 %v1253_v21, %v1251_v20 }
 0x274   : > { %v1833_v24 = vpop.f32.mrb[73].mxu1 }
 0x275   : > { %v2566_v25 = vpack.c.bf16 %v1833_v24, %v1831_v22  ;;  %2377 = vst [vmem:[%s3204_s26 + $0x1b0] sm:$0xff] %v2539_v23  ;;  %v1257_v26 = vpop.f32.mrb[84].mxu0 }
 0x276   : > { %v1259_v27 = vpop.f32.mrb[85].mxu0 }
 0x277   : > { %2468 = vst [vmem:[%s3204_s26 + $0x288] sm:$0xff] %v2566_v25  ;;  %v1837_v28 = vpop.f32.mrb[74].mxu1  ;;  %v2540_v29 = vpack.c.bf16 %v1259_v27, %v1257_v26 }
 0x278   : > { %v1839_v30 = vpop.f32.mrb[75].mxu1 }
 0x279   : > { %v2567_v31 = vpack.c.bf16 %v1839_v30, %v1837_v28  ;;  %2378 = vst [vmem:[%s3204_s26 + $0x1b8] sm:$0xff] %v2540_v29  ;;  %v1263_v32 = vpop.f32.mrb[86].mxu0 }
 0x27a   : > { %v1265_v33 = vpop.f32.mrb[87].mxu0 }
 0x27b   : > { %2469 = vst [vmem:[%s3204_s26 + $0x290] sm:$0xff] %v2567_v31  ;;  %v1843_v34 = vpop.f32.mrb[76].mxu1  ;;  %v2541_v35 = vpack.c.bf16 %v1265_v33, %v1263_v32 }
 0x27c   : > { %v1845_v36 = vpop.f32.mrb[77].mxu1 }
 0x27d   : > { %v2568_v37 = vpack.c.bf16 %v1845_v36, %v1843_v34  ;;  %2379 = vst [vmem:[%s3204_s26 + $0x1c0] sm:$0xff] %v2541_v35  ;;  %v1269_v38 = vpop.f32.mrb[88].mxu0 }
 0x27e   : > { %v1271_v39 = vpop.f32.mrb[89].mxu0 }
 0x27f   : > { %2470 = vst [vmem:[%s3204_s26 + $0x298] sm:$0xff] %v2568_v37  ;;  %v1849_v40 = vpop.f32.mrb[78].mxu1  ;;  %v2542_v41 = vpack.c.bf16 %v1271_v39, %v1269_v38 }
 0x280   : > { %v1851_v42 = vpop.f32.mrb[79].mxu1 }
 0x281   : > { %v2569_v43 = vpack.c.bf16 %v1851_v42, %v1849_v40  ;;  %2380 = vst [vmem:[%s3204_s26 + $0x1c8] sm:$0xff] %v2542_v41  ;;  %v1275_v44 = vpop.f32.mrb[90].mxu0 }
 0x282   : > { %v1277_v45 = vpop.f32.mrb[91].mxu0 }
 0x283   : > { %2471 = vst [vmem:[%s3204_s26 + $0x2a0] sm:$0xff] %v2569_v43  ;;  %v1855_v46 = vpop.f32.mrb[80].mxu1  ;;  %v2543_v47 = vpack.c.bf16 %v1277_v45, %v1275_v44 }
 0x284   : > { %v1857_v48 = vpop.f32.mrb[81].mxu1 }
 0x285   : > { %v2570_v49 = vpack.c.bf16 %v1857_v48, %v1855_v46  ;;  %2381 = vst [vmem:[%s3204_s26 + $0x1d0] sm:$0xff] %v2543_v47  ;;  %v1281_v50 = vpop.f32.mrb[92].mxu0 }
 0x286   : > { %v1283_v51 = vpop.f32.mrb[93].mxu0 }
 0x287   : > { %2472 = vst [vmem:[%s3204_s26 + $0x2a8] sm:$0xff] %v2570_v49  ;;  %v1861_v52 = vpop.f32.mrb[82].mxu1  ;;  %v2544_v53 = vpack.c.bf16 %v1283_v51, %v1281_v50 }
 0x288   : > { %v1863_v54 = vpop.f32.mrb[83].mxu1 }
 0x289   : > { %v2571_v55 = vpack.c.bf16 %v1863_v54, %v1861_v52  ;;  %2382 = vst [vmem:[%s3204_s26 + $0x1d8] sm:$0xff] %v2544_v53  ;;  %v1287_v56 = vpop.f32.mrb[94].mxu0 }
 0x28a   : > { %v1289_v57 = vpop.f32.mrb[95].mxu0 }
 0x28b   : > { %2473 = vst [vmem:[%s3204_s26 + $0x2b0] sm:$0xff] %v2571_v55  ;;  %v1867_v58 = vpop.f32.mrb[84].mxu1  ;;  %v2545_v59 = vpack.c.bf16 %v1289_v57, %v1287_v56 }
 0x28c   : > { %v1869_v60 = vpop.f32.mrb[85].mxu1 }
 0x28d   : > { %v2572_v61 = vpack.c.bf16 %v1869_v60, %v1867_v58  ;;  %2383 = vst [vmem:[%s3204_s26 + $0x1e0] sm:$0xff] %v2545_v59  ;;  %v1293_v62 = vpop.f32.mrb[96].mxu0 }
 0x28e   : > { %v1295_v63 = vpop.f32.mrb[97].mxu0 }
 0x28f   : > { %2474 = vst [vmem:[%s3204_s26 + $0x2b8] sm:$0xff] %v2572_v61  ;;  %v1873_v1 = vpop.f32.mrb[86].mxu1  ;;  %v2546_v2 = vpack.c.bf16 %v1295_v63, %v1293_v62 }
 0x290   : > { %v1875_v3 = vpop.f32.mrb[87].mxu1 }
 0x291   : > { %v2573_v4 = vpack.c.bf16 %v1875_v3, %v1873_v1  ;;  %2384 = vst [vmem:[%s3204_s26 + $0x1e8] sm:$0xff] %v2546_v2  ;;  %v1299_v5 = vpop.f32.mrb[98].mxu0 }
 0x292   : > { %v1301_v0 = vpop.f32.mrb[99].mxu0 }
 0x293   : > { %2475 = vst [vmem:[%s3204_s26 + $0x2c0] sm:$0xff] %v2573_v4  ;;  %v1879_v6 = vpop.f32.mrb[88].mxu1  ;;  %v2547_v7 = vpack.c.bf16 %v1301_v0, %v1299_v5 }
 0x294   : > { %v1881_v8 = vpop.f32.mrb[89].mxu1 }
 0x295   : > { %v2574_v9 = vpack.c.bf16 %v1881_v8, %v1879_v6  ;;  %2385 = vst [vmem:[%s3204_s26 + $0x1f0] sm:$0xff] %v2547_v7  ;;  %v1305_v10 = vpop.f32.mrb[100].mxu0 }
 0x296   : > { %v1307_v11 = vpop.f32.mrb[101].mxu0 }
 0x297   : > { %2476 = vst [vmem:[%s3204_s26 + $0x2c8] sm:$0xff] %v2574_v9  ;;  %v1885_v12 = vpop.f32.mrb[90].mxu1  ;;  %v2548_v13 = vpack.c.bf16 %v1307_v11, %v1305_v10 }
 0x298   : > { %v1887_v14 = vpop.f32.mrb[91].mxu1 }
 0x299   : > { %v2575_v15 = vpack.c.bf16 %v1887_v14, %v1885_v12  ;;  %2386 = vst [vmem:[%s3204_s26 + $0x1f8] sm:$0xff] %v2548_v13 }
 0x29b   : > { %2477 = vst [vmem:[%s3204_s26 + $0x2d0] sm:$0xff] %v2575_v15  ;;  %v1891_v16 = vpop.f32.mrb[92].mxu1 }
 0x29c   : > { %v1893_v17 = vpop.f32.mrb[93].mxu1 }
 0x29d   : > { %v2576_v18 = vpack.c.bf16 %v1893_v17, %v1891_v16 }
 0x29f   : > { %2478 = vst [vmem:[%s3204_s26 + $0x2d8] sm:$0xff] %v2576_v18  ;;  %v1897_v19 = vpop.f32.mrb[94].mxu1 }
 0x2a0   : > { %v1899_v20 = vpop.f32.mrb[95].mxu1 }
 0x2a1   : > { %v2577_v21 = vpack.c.bf16 %v1899_v20, %v1897_v19 }
 0x2a3   : > { %2479 = vst [vmem:[%s3204_s26 + $0x2e0] sm:$0xff] %v2577_v21  ;;  %v1903_v22 = vpop.f32.mrb[96].mxu1 }
 0x2a4   : > { %v1905_v23 = vpop.f32.mrb[97].mxu1 }
 0x2a5   : > { %v2578_v24 = vpack.c.bf16 %v1905_v23, %v1903_v22 }
 0x2a7   : > { %2480 = vst [vmem:[%s3204_s26 + $0x2e8] sm:$0xff] %v2578_v24  ;;  %v1909_v25 = vpop.f32.mrb[98].mxu1 }
 0x2a8   : > { %v1911_v26 = vpop.f32.mrb[99].mxu1 }
 0x2a9   : > { %v2579_v27 = vpack.c.bf16 %v1911_v26, %v1909_v25 }
 0x2ab   : > { %2481 = vst [vmem:[%s3204_s26 + $0x2f0] sm:$0xff] %v2579_v27  ;;  %v1915_v28 = vpop.f32.mrb[100].mxu1 }
 0x2ac   : > { %v1917_v29 = vpop.f32.mrb[101].mxu1 }
 0x2ad   : > { %v2580_v30 = vpack.c.bf16 %v1917_v29, %v1915_v28 }
 0x2af   : > { %2482 = vst [vmem:[%s3204_s26 + $0x2f8] sm:$0xff] %v2580_v30 }
 0x2b0 PF: > { %s14_s12 = sadd.s32 1, %s2661_s12  }
 0x2b1   : > { %p11_p3 = scmp.ge.s32.totalorder %s14_s12, 4  }
 0x2b3   :  { %13 = sbr.rel (!%p11_p3) target bundleno = 1 (0x1), region = 69 }
 0x2ba   :  { %2166 = vsyncpa [#allocation3], 1 }
 0x2bb   :  { %2168 = vsyncpa [#allocation3 + $0x1], 1 }

// kernel: _emonet_out.3
= control target key start
LH: loop header
LB: loop body
LE: loop exit
PB: predicated region body
PF: predicated region fallthrough
CT: control target
= control target key end

     0   :  { %s3981_s0 = inlined_call_operand.vmem [shape: bf16[512,768], index: 0, kind: input, shape index: {}]   ;;  %s3982_s1 = inlined_call_operand.vmem [shape: bf16[768,128], index: 1, kind: input, shape index: {}]   ;;  %s3983_s2 = inlined_call_operand.vmem [shape: f32[1,128], index: 2, kind: input, shape index: {}, may-alias: {2,4,6}]   ;;  %s3984_s3 = inlined_call_operand.vmem [shape: bf16[128,128], index: 3, kind: input, shape index: {}]   ;;  %s3985_s4 = inlined_call_operand.vmem [shape: f32[1,128], index: 4, kind: input, shape index: {}, may-alias: {2,4,6}]   ;;  %s3986_s5 = inlined_call_operand.vmem [shape: bf16[128,128], index: 5, kind: input, shape index: {}]   ;;  %s3987_s6 = inlined_call_operand.vmem [shape: f32[1,128], index: 6, kind: input, shape index: {}, may-alias: {2,4,6}]   ;;  %s3988_s7 = inlined_call_operand.hbm [shape: f32[2,256,128], index: 7, kind: output, shape index: {0}]   ;;  %s3989_s8 = inlined_call_operand.hbm [shape: f32[2,1,128], index: 8, kind: output, shape index: {1}]   ;;  %s3990_s9 = inlined_call_operand.vmem [shape: f32[2,1,128], index: 9, kind: output, shape index: {2}]  }
   0x1   :  { %3992 = sst [smem:[#allocation8_spill]] %s3981_s0 }
   0x2   :  { %3993 = sst [smem:[#allocation9_spill]] %s3982_s1 }
   0x3   :  { %3994 = sst [smem:[#allocation10_spill]] %s3983_s2 }
   0x4   :  { %3995 = sst [smem:[#allocation11_spill]] %s3984_s3 }
   0x5   :  { %3996 = sst [smem:[#allocation12_spill]] %s3985_s4 }
   0x6   :  { %15 = vsyncpa [#allocation3], 0 }
   0x7   :  { %17 = vsyncpa [#allocation3 + $0x1], 0 }
   0x8   :  { %18 = vsyncpa [#allocation5], 0 }
   0x9   :  { %20 = vsyncpa [#allocation5 + $0x1], 0  ;;  %s3262_s30 = smov 0   ;;  %s3264_s10 = smov 0  }
   0xa   :  { %s3266_s11 = smov 0   ;;  %s3268_s12 = smov 0  }
   0xb LB: > { %s3283_s13 = sadd.s32 4294967295, %s3204_s12   ;;  %s2268_s14 = sadd.s32 4294967294, %s3204_s12   ;;  %s3204_s12 = sphi %s3268_s12, %s4008_s12   ;;  %s3200_s11 = sphi %s3266_s11, %s4007_s11   ;;  %s3196_s10 = sphi %s3264_s10, %s4006_s10   ;;  %s3192_s30 = sphi %s3262_s30, %s4005_s30  }
   0xc   : > { %s3287_s15 = sadd.s32 1, %s3204_s12   ;;  %s185_s16 = sadd.s32 1, %s3200_s11 }
   0xd   : > { %s182_s17 = ssub.s32 %s3204_s12, %s3287_s15  ;;  %p195_p0 = scmp.ne.s32.totalorder %s3200_s11, %s3196_s10 }
   0xe   : > { %p183_p1 = scmp.eq.s32.totalorder %s182_s17, 0  ;;  %p196_p2 = scmp.eq.s32.totalorder %s3283_s13, 1 }
   0xf   : > { %p201_p3 = scmp.ne.s32.totalorder %s3196_s10, %s3192_s30  ;;  %p202_p4 = scmp.eq.s32.totalorder %s2268_s14, 1 }
  0x10   : > { %s3298_s18 = scalar_select %p183_p1, %s3200_s11, %s185_s16  }
  0x11   : > { %p3300_p5 = por %p196_p2, %p195_p0  ;;  %p3304_p6 = por %p202_p4, %p201_p3 }
  0x12   : > { %p2271_p7 = scmp.ge.s32.totalorder %s3204_s12, 1  ;;  %p300_p8 = scmp.lt.s32.totalorder %s3204_s12, 3 }
  0x14   : > { %p301_p9 = pnand %p2271_p7, %p300_p8 }
  0x15   : > { %s3999_s1 = sld [smem:[#allocation9_spill]] (!%p301_p9)  ;;  %s2273_s23 = sshll.u32 (!%p301_p9), %s3283_s13, 5  ;;  %vm3207_vm0 = vmmov (!%p301_p9), 0  }
  0x16   : > { %304 = sbr.rel (%p301_p9) target bundleno = 940 (0x3ac), region = 48  ;;  %p345_p10 = scmp.lt.s32.totalorder (!%p301_p9), %s2273_s23, 63 }
  0x17   : > { %s4000_s0 = sld [smem:[#allocation8_spill]] (!%p301_p9)  ;;  %s4001_s3 = sld [smem:[#allocation11_spill]] (!%p301_p9) }
  0x18   : > { %s4002_s2 = sld [smem:[#allocation10_spill]] (!%p301_p9)  ;;  %s4003_s4 = sld [smem:[#allocation12_spill]] (!%p301_p9) }
  0x19   : > { %s2442_s29 = sshll.u32 (!%p301_p9), %s3283_s13, 12 }
  0x1a   : > { %s3902_s21 = scalar_lea.hbm (!%p301_p9), %s3988_s7, %s2442_s29 }
  0x1b   : > { %v2902_v0 = vld [vmem:[%s3999_s1 + $0x40] sm:$0xff] (!%p301_p9)   ;;  %v2904_v2 = vld [vmem:[%s3999_s1 + $0x48] sm:$0xff] (!%p301_p9)   ;;  %v2906_v4 = vld [vmem:[%s3999_s1 + $0x50] sm:$0xff] (!%p301_p9)  }
  0x1c   : > { %v2903_v1 = vld [vmem:[%s3999_s1] sm:$0xff] (!%p301_p9)   ;;  %2443 = vmatprep.subr.bf16.mxu0 (!%p301_p9), %v2902_v0  ;;  %2837 = vmatprep.subr.bf16.mxu1 (!%p301_p9), %v2902_v0  ;;  %v2905_v3 = vld [vmem:[%s3999_s1 + $0x8] sm:$0xff] (!%p301_p9)   ;;  %v2907_v5 = vld [vmem:[%s3999_s1 + $0x10] sm:$0xff] (!%p301_p9)  }
  0x1d   : > { %2444 = vmatpush3.bf16.msra.mxu0 %v2903_v1  ;;  %2845 = vmatpush3.bf16.msra.mxu1 %v2903_v1  ;;  %s4010_s23 = smov (!%p345_p10, %s2273_s23), 63  ;;  %v2908_v6 = vld [vmem:[%s3999_s1 + $0x58] sm:$0xff]   ;;  %v2910_v8 = vld [vmem:[%s3999_s1 + $0x60] sm:$0xff]   ;;  %v2912_v10 = vld [vmem:[%s3999_s1 + $0x68] sm:$0xff]  }
  0x1e   : > { %2445 = vmatprep.subr.bf16.mxu0 %v2904_v2  ;;  %2838 = vmatprep.subr.bf16.mxu1 %v2904_v2  ;;  %s2853_s25 = smul.u32 24, %s4010_s23  ;;  %v2909_v7 = vld [vmem:[%s3999_s1 + $0x18] sm:$0xff]   ;;  %v2911_v9 = vld [vmem:[%s3999_s1 + $0x20] sm:$0xff]   ;;  %v2913_v13 = vld [vmem:[%s3999_s1 + $0x28] sm:$0xff]  }
  0x1f   : > { %v2914_v14 = vld [vmem:[%s3999_s1 + $0x70] sm:$0xff]   ;;  %v2916_v16 = vld [vmem:[%s3999_s1 + $0x78] sm:$0xff]   ;;  %v2924_v18 = vld [vmem:[%s3999_s1 + $0x140] sm:$0xff]  }
  0x20   : > { %s3341_s17 = scalar_lea.vmem %s4000_s0, %s2853_s25  ;;  %v2915_v15 = vld [vmem:[%s3999_s1 + $0x30] sm:$0xff]   ;;  %v2917_v17 = vld [vmem:[%s3999_s1 + $0x38] sm:$0xff]   ;;  %v2932_v20 = vld [vmem:[%s3999_s1 + $0xc0] sm:$0xff]   ;;  %s3208_s25 = smov [#allocation2]  }
  0x21   : > { %2446 = vmatpush3.bf16.msra.mxu0 %v2905_v3  ;;  %2846 = vmatpush3.bf16.msra.mxu1 %v2905_v3  ;;  %v2920_v11 = vld [vmem:[%s3341_s17 + $0x4] ss:$24 sps:$4 sm:$0xff]   ;;  %v2923_v12 = vld [vmem:[%s3341_s17 + $0x214] ss:$24 sps:$4 sm:$0xff]   ;;  %v2918_v19 = vld [vmem:[%s3341_s17] ss:$24 sps:$4 sm:$0xff]  }
  0x22   : > { %2447 = vmatprep.subr.bf16.mxu0 %v2906_v4  ;;  %2839 = vmatprep.subr.bf16.mxu1 %v2906_v4  ;;  %v2921_v21 = vld [vmem:[%s3341_s17 + $0x210] ss:$24 sps:$4 sm:$0xff]   ;;  %v2925_v22 = vld [vmem:[%s3999_s1 + $0x100] sm:$0xff]   ;;  %v2926_v23 = vld [vmem:[%s3341_s17 + $0x34] ss:$24 sps:$4 sm:$0xff]  }
  0x23   : > { %1354 = vmatprep.mubr.bf16.mxu0 %v2920_v11  ;;  %1442 = vmatprep.mubr.bf16.mxu1 %v2923_v12  ;;  %v2928_v24 = vld [vmem:[%s3341_s17 + $0x244] ss:$24 sps:$4 sm:$0xff]   ;;  %v2934_v26 = vld [vmem:[%s3999_s1 + $0x148] sm:$0xff]   ;;  %v2931_v31 = vld [vmem:[%s3341_s17 + $0x240] ss:$24 sps:$4 sm:$0xff]  }
  0x24   : > { %v2933_v25 = vld [vmem:[%s3999_s1 + $0x80] sm:$0xff]   ;;  %v2935_v27 = vld [vmem:[%s3999_s1 + $0xc8] sm:$0xff]   ;;  %v2948_v32 = vld [vmem:[%s3999_s1 + $0x150] sm:$0xff]  }
  0x25   : > { %2448 = vmatpush3.bf16.msra.mxu0 %v2907_v5  ;;  %2847 = vmatpush3.bf16.msra.mxu1 %v2907_v5  ;;  %v2936_v28 = vld [vmem:[%s3999_s1 + $0x108] sm:$0xff]   ;;  %v2944_v33 = vld [vmem:[%s3999_s1 + $0xd0] sm:$0xff]   ;;  %v2938_v34 = vld [vmem:[%s3341_s17 + $0x64] ss:$24 sps:$4 sm:$0xff]  }
  0x26   : > { %2449 = vmatprep.subr.bf16.mxu0 %v2908_v6  ;;  %2840 = vmatprep.subr.bf16.mxu1 %v2908_v6  ;;  %v2937_v29 = vld [vmem:[%s3999_s1 + $0x88] sm:$0xff]   ;;  %v2945_v36 = vld [vmem:[%s3999_s1 + $0x90] sm:$0xff]   ;;  %v2946_v38 = vld [vmem:[%s3999_s1 + $0xd8] sm:$0xff]  }
  0x27   : > { %v2930_v30 = vld [vmem:[%s3341_s17 + $0x30] ss:$24 sps:$4 sm:$0xff]   ;;  %v2940_v35 = vld [vmem:[%s3341_s17 + $0x274] ss:$24 sps:$4 sm:$0xff]   ;;  %v2942_v39 = vld [vmem:[%s3341_s17 + $0x60] ss:$24 sps:$4 sm:$0xff]  }
  0x28   : > { %v2953_v37 = vld [vmem:[%s3999_s1 + $0x110] sm:$0xff]   ;;  %v2947_v40 = vld [vmem:[%s3999_s1 + $0x98] sm:$0xff]   ;;  %v2956_v41 = vld [vmem:[%s3999_s1 + $0xe0] sm:$0xff]  }
  0x29   : > { %2450 = vmatpush3.bf16.msra.mxu0 %v2909_v7  ;;  %2848 = vmatpush3.bf16.msra.mxu1 %v2909_v7  ;;  %v2943_v42 = vld [vmem:[%s3341_s17 + $0x270] ss:$24 sps:$4 sm:$0xff]   ;;  %v2949_v43 = vld [vmem:[%s3341_s17 + $0x94] ss:$24 sps:$4 sm:$0xff]   ;;  %v2951_v44 = vld [vmem:[%s3341_s17 + $0x2a4] ss:$24 sps:$4 sm:$0xff]  }
  0x2a   : > { %2451 = vmatprep.subr.bf16.mxu0 %v2910_v8  ;;  %2841 = vmatprep.subr.bf16.mxu1 %v2910_v8  ;;  %v2957_v45 = vld [vmem:[%s3999_s1 + $0xa0] sm:$0xff]   ;;  %v2958_v46 = vld [vmem:[%s3999_s1 + $0xe8] sm:$0xff]   ;;  %v2968_v47 = vld [vmem:[%s3999_s1 + $0x158] sm:$0xff]  }
  0x2b   : > { %v2969_v48 = vld [vmem:[%s3999_s1 + $0x118] sm:$0xff]   ;;  %v2954_v49 = vld [vmem:[%s3341_s17 + $0x90] ss:$24 sps:$4 sm:$0xff]   ;;  %v2962_v54 = vld [vmem:[%s3341_s17 + $0x2d4] ss:$24 sps:$4 sm:$0xff]  }
  0x2c   : > { %v2955_v50 = vld [vmem:[%s3341_s17 + $0x2a0] ss:$24 sps:$4 sm:$0xff]   ;;  %v2959_v51 = vld [vmem:[%s3999_s1 + $0xa8] sm:$0xff]   ;;  %v2966_v52 = vld [vmem:[%s3999_s1 + $0xf0] sm:$0xff]  }
  0x2d   : > { %2452 = vmatpush3.bf16.msra.mxu0 %v2911_v9  ;;  %2849 = vmatpush3.bf16.msra.mxu1 %v2911_v9  ;;  %v2960_v53 = vld [vmem:[%s3341_s17 + $0xc4] ss:$24 sps:$4 sm:$0xff]   ;;  %v2967_v55 = vld [vmem:[%s3999_s1 + $0xb0] sm:$0xff]   ;;  %v2964_v59 = vld [vmem:[%s3341_s17 + $0xc0] ss:$24 sps:$4 sm:$0xff]  }
  0x2e   : > { %2453 = vmatprep.subr.bf16.mxu0 %v2912_v10  ;;  %2842 = vmatprep.subr.bf16.mxu1 %v2912_v10  ;;  %v2970_v56 = vld [vmem:[%s3999_s1 + $0xf8] sm:$0xff]   ;;  %v2978_v57 = vld [vmem:[%s3999_s1 + $0x160] sm:$0xff]   ;;  %v2965_v61 = vld [vmem:[%s3341_s17 + $0x2d0] ss:$24 sps:$4 sm:$0xff]  }
  0x2f   : > { %v2979_v58 = vld [vmem:[%s3999_s1 + $0x120] sm:$0xff]   ;;  %v2971_v60 = vld [vmem:[%s3999_s1 + $0xb8] sm:$0xff]   ;;  %v2972_v62 = vld [vmem:[%s3341_s17 + $0xf4] ss:$24 sps:$4 sm:$0xff]  }
  0x30   : > { %v2976_v63 = vld [vmem:[%s3341_s17 + $0xc] ss:$24 sps:$4 sm:$0xff]   ;;  %v2974_v2 = vld [vmem:[%s3341_s17 + $0x8] ss:$24 sps:$4 sm:$0xff]   ;;  %v3000_v4 = vld [vmem:[%s3999_s1 + $0x170] sm:$0xff]  }
  0x31   : > { %2454 = vmatpush3.bf16.msra.mxu0 %v2913_v13  ;;  %2850 = vmatpush3.bf16.msra.mxu1 %v2913_v13  ;;  %v2990_v0 = vld [vmem:[%s3999_s1 + $0x168] sm:$0xff]   ;;  %v3001_v5 = vld [vmem:[%s3999_s1 + $0x130] sm:$0xff]   ;;  %v2980_v6 = vld [vmem:[%s3341_s17 + $0x124] ss:$24 sps:$4 sm:$0xff]  }
  0x32   : > { %2455 = vmatprep.subr.bf16.mxu0 %v2914_v14  ;;  %2843 = vmatprep.subr.bf16.mxu1 %v2914_v14  ;;  %v2993_v1 = vld [vmem:[%s3999_s1 + $0x128] sm:$0xff]   ;;  %v2982_v7 = vld [vmem:[%s3341_s17 + $0x3c] ss:$24 sps:$4 sm:$0xff]   ;;  %v2984_v10 = vld [vmem:[%s3341_s17 + $0x120] ss:$24 sps:$4 sm:$0xff]  }
  0x33   : > { %v2977_v3 = vld [vmem:[%s3341_s17 + $0xf0] ss:$24 sps:$4 sm:$0xff]   ;;  %v3008_v8 = vld [vmem:[%s3999_s1 + $0x178] sm:$0xff]   ;;  %v2986_v12 = vld [vmem:[%s3341_s17 + $0x154] ss:$24 sps:$4 sm:$0xff]  }
  0x34   : > { %v3009_v9 = vld [vmem:[%s3999_s1 + $0x138] sm:$0xff]   ;;  %v2988_v13 = vld [vmem:[%s3341_s17 + $0x6c] ss:$24 sps:$4 sm:$0xff]   ;;  %v2991_v14 = vld [vmem:[%s3341_s17 + $0x150] ss:$24 sps:$4 sm:$0xff]  }
  0x35   : > { %2456 = vmatpush3.bf16.msra.mxu0 %v2915_v15  ;;  %2851 = vmatpush3.bf16.msra.mxu1 %v2915_v15  ;;  %v2985_v11 = vld [vmem:[%s3341_s17 + $0x38] ss:$24 sps:$4 sm:$0xff]   ;;  %v2992_v15 = vld [vmem:[%s3341_s17 + $0x68] ss:$24 sps:$4 sm:$0xff]  }
  0x36   : > { %2457 = vmatprep.subr.bf16.mxu0 %v2916_v16  ;;  %2844 = vmatprep.subr.bf16.mxu1 %v2916_v16  ;;  %v2994_v16 = vld [vmem:[%s3341_s17 + $0x184] ss:$24 sps:$4 sm:$0xff]  }
  0x39   : > { %2458 = vmatpush3.bf16.msra.mxu0 %v2917_v17  ;;  %2852 = vmatpush3.bf16.msra.mxu1 %v2917_v17  ;;  %v2996_v17 = vld [vmem:[%s3341_s17 + $0x9c] ss:$24 sps:$4 sm:$0xff]  }
  0x3a   : > { %2667 = vmatprep.subr.bf16.mxu0 %v2924_v18  ;;  %2555 = vmatprep.subr.bf16.mxu1 %v2932_v20  ;;  %v2998_v18 = vld [vmem:[%s3341_s17 + $0x180] ss:$24 sps:$4 sm:$0xff]   ;;  %v3002_v20 = vld [vmem:[%s3341_s17 + $0x1b4] ss:$24 sps:$4 sm:$0xff]  }
  0x3c   : > { %1355 = vmatmul.mubr.bf16.vlgmr.msra.gmra.mrb[0].mxu0 %v2918_v19  ;;  %1443 = vmatmul.mubr.bf16.vlgmr.msra.gmra.mrb[0].mxu1 %v2921_v21  ;;  %v2999_v19 = vld [vmem:[%s3341_s17 + $0x98] ss:$24 sps:$4 sm:$0xff]   ;;  %v3004_v21 = vld [vmem:[%s3341_s17 + $0xcc] ss:$24 sps:$4 sm:$0xff]  }
  0x3d   : > { %2668 = vmatpush3.bf16.msra.mxu0 %v2925_v22  ;;  %1362 = vmatprep.mubr.bf16.mxu0 %v2926_v23  ;;  %v3006_v22 = vld [vmem:[%s3341_s17 + $0x1b0] ss:$24 sps:$4 sm:$0xff]  }
  0x3e   : > { %1450 = vmatprep.mubr.bf16.mxu1 %v2928_v24  ;;  %2556 = vmatpush3.bf16.msra.mxu1 %v2933_v25  ;;  %v3007_v23 = vld [vmem:[%s3341_s17 + $0xc8] ss:$24 sps:$4 sm:$0xff]   ;;  %v3010_v24 = vld [vmem:[%s3341_s17 + $0x1e4] ss:$24 sps:$4 sm:$0xff]  }
  0x3f   : > { %2669 = vmatprep.subr.bf16.mxu0 %v2934_v26  ;;  %2557 = vmatprep.subr.bf16.mxu1 %v2935_v27  ;;  %v3012_v25 = vld [vmem:[%s3341_s17 + $0xfc] ss:$24 sps:$4 sm:$0xff]   ;;  %v3014_v26 = vld [vmem:[%s3341_s17 + $0x1e0] ss:$24 sps:$4 sm:$0xff]  }
  0x40   : > { %v3015_v27 = vld [vmem:[%s3341_s17 + $0xf8] ss:$24 sps:$4 sm:$0xff]  }
  0x41   : > { %2670 = vmatpush3.bf16.msra.mxu0 %v2936_v28  ;;  %v3016_v28 = vld [vmem:[%s3341_s17 + $0x12c] ss:$24 sps:$4 sm:$0xff]  }
  0x42   : > { %2558 = vmatpush3.bf16.msra.mxu1 %v2937_v29  ;;  %2671 = vmatprep.subr.bf16.mxu0 %v2948_v32  ;;  %v3020_v29 = vld [vmem:[%s3341_s17 + $0x14] ss:$24 sps:$4 sm:$0xff]  }
  0x43   : > { %2559 = vmatprep.subr.bf16.mxu1 %v2944_v33  ;;  %v3022_v32 = vld [vmem:[%s3341_s17 + $0x15c] ss:$24 sps:$4 sm:$0xff]  }
  0x44   : > { %1363 = vmatmul.mubr.bf16.gmra.mrb[4].mxu0 %v2930_v30  ;;  %1451 = vmatmul.mubr.bf16.gmra.mrb[4].mxu1 %v2931_v31  ;;  %v3018_v30 = vld [vmem:[%s3341_s17 + $0x10] ss:$24 sps:$4 sm:$0xff]   ;;  %v3024_v33 = vld [vmem:[%s3341_s17 + $0x44] ss:$24 sps:$4 sm:$0xff]  }
  0x45   : > { %1370 = vmatprep.mubr.bf16.mxu0 %v2938_v34  ;;  %1458 = vmatprep.mubr.bf16.mxu1 %v2940_v35  ;;  %v3021_v31 = vld [vmem:[%s3341_s17 + $0x128] ss:$24 sps:$4 sm:$0xff]   ;;  %v3026_v34 = vld [vmem:[%s3341_s17 + $0x158] ss:$24 sps:$4 sm:$0xff]  }
  0x46   : > { %2560 = vmatpush3.bf16.msra.mxu1 %v2945_v36  ;;  %2672 = vmatpush3.bf16.msra.mxu0 %v2953_v37  ;;  %v3027_v35 = vld [vmem:[%s3341_s17 + $0x40] ss:$24 sps:$4 sm:$0xff]   ;;  %v3028_v36 = vld [vmem:[%s3341_s17 + $0x18c] ss:$24 sps:$4 sm:$0xff]  }
  0x47   : > { %2561 = vmatprep.subr.bf16.mxu1 %v2946_v38  ;;  %2673 = vmatprep.subr.bf16.mxu0 %v2968_v47  ;;  %v3030_v37 = vld [vmem:[%s3341_s17 + $0x74] ss:$24 sps:$4 sm:$0xff]   ;;  %v3032_v38 = vld [vmem:[%s3341_s17 + $0x188] ss:$24 sps:$4 sm:$0xff]  }
  0x48   : > { %v3045_v47 = vld [vmem:[%s3341_s17 + $0xd0] ss:$24 sps:$4 sm:$0xff]  }
  0x4a   : > { %2562 = vmatpush3.bf16.msra.mxu1 %v2947_v40  ;;  %2674 = vmatpush3.bf16.msra.mxu0 %v2969_v48  ;;  %v3034_v40 = vld [vmem:[%s3341_s17 + $0x1bc] ss:$24 sps:$4 sm:$0xff]  }
  0x4b   : > { %2563 = vmatprep.subr.bf16.mxu1 %v2956_v41  ;;  %2675 = vmatprep.subr.bf16.mxu0 %v2978_v57  ;;  %v3036_v41 = vld [vmem:[%s3341_s17 + $0xa4] ss:$24 sps:$4 sm:$0xff]  }
  0x4c   : > { %1371 = vmatmul.mubr.bf16.gmra.mrb[8].mxu0 %v2942_v39  ;;  %1459 = vmatmul.mubr.bf16.gmra.mrb[8].mxu1 %v2943_v42  ;;  %v3033_v39 = vld [vmem:[%s3341_s17 + $0x70] ss:$24 sps:$4 sm:$0xff]   ;;  %v3046_v48 = vld [vmem:[%s3341_s17 + $0x21c] ss:$24 sps:$4 sm:$0xff]  }
  0x4d   : > { %1378 = vmatprep.mubr.bf16.mxu0 %v2949_v43  ;;  %1466 = vmatprep.mubr.bf16.mxu1 %v2951_v44  ;;  %v3038_v42 = vld [vmem:[%s3341_s17 + $0x1b8] ss:$24 sps:$4 sm:$0xff]   ;;  %v3040_v44 = vld [vmem:[%s3341_s17 + $0x1ec] ss:$24 sps:$4 sm:$0xff]  }
  0x4e   : > { %2564 = vmatpush3.bf16.msra.mxu1 %v2957_v45  ;;  %2676 = vmatpush3.bf16.msra.mxu0 %v2979_v58  ;;  %v3039_v43 = vld [vmem:[%s3341_s17 + $0xa0] ss:$24 sps:$4 sm:$0xff]   ;;  %v3042_v45 = vld [vmem:[%s3341_s17 + $0xd4] ss:$24 sps:$4 sm:$0xff]   ;;  %v3060_v57 = vld [vmem:[%s3341_s17 + $0x164] ss:$24 sps:$4 sm:$0xff]  }
  0x4f   : > { %2565 = vmatprep.subr.bf16.mxu1 %v2958_v46  ;;  %2677 = vmatprep.subr.bf16.mxu0 %v2990_v0  ;;  %v3044_v46 = vld [vmem:[%s3341_s17 + $0x1e8] ss:$24 sps:$4 sm:$0xff]   ;;  %v3062_v58 = vld [vmem:[%s3341_s17 + $0x278] ss:$24 sps:$4 sm:$0xff]   ;;  %v3070_v0 = vld [vmem:[%s3341_s17 + $0x2dc] ss:$24 sps:$4 sm:$0xff]  }
  0x52   : > { %2566 = vmatpush3.bf16.msra.mxu1 %v2959_v51  ;;  %2678 = vmatpush3.bf16.msra.mxu0 %v2993_v1  ;;  %v3051_v51 = vld [vmem:[%s3341_s17 + $0x100] ss:$24 sps:$4 sm:$0xff]   ;;  %v3072_v1 = vld [vmem:[%s3341_s17 + $0x1c4] ss:$24 sps:$4 sm:$0xff]  }
  0x53   : > { %2567 = vmatprep.subr.bf16.mxu1 %v2966_v52  ;;  %2679 = vmatprep.subr.bf16.mxu0 %v3000_v4  ;;  %v3052_v52 = vld [vmem:[%s3341_s17 + $0x24c] ss:$24 sps:$4 sm:$0xff]  }
  0x54   : > { %1379 = vmatmul.mubr.bf16.gmra.mrb[12].mxu0 %v2954_v49  ;;  %1467 = vmatmul.mubr.bf16.gmra.mrb[12].mxu1 %v2955_v50  ;;  %v3048_v49 = vld [vmem:[%s3341_s17 + $0x104] ss:$24 sps:$4 sm:$0xff]   ;;  %v3050_v50 = vld [vmem:[%s3341_s17 + $0x218] ss:$24 sps:$4 sm:$0xff]   ;;  %v3076_v4 = vld [vmem:[%s3341_s17 + $0x1f4] ss:$24 sps:$4 sm:$0xff]  }
  0x55   : > { %1386 = vmatprep.mubr.bf16.mxu0 %v2960_v53  ;;  %1474 = vmatprep.mubr.bf16.mxu1 %v2962_v54  ;;  %v3054_v53 = vld [vmem:[%s3341_s17 + $0x134] ss:$24 sps:$4 sm:$0xff]   ;;  %v3056_v54 = vld [vmem:[%s3341_s17 + $0x248] ss:$24 sps:$4 sm:$0xff]  }
  0x56   : > { %2568 = vmatpush3.bf16.msra.mxu1 %v2967_v55  ;;  %2680 = vmatpush3.bf16.msra.mxu0 %v3001_v5  ;;  %v3057_v55 = vld [vmem:[%s3341_s17 + $0x130] ss:$24 sps:$4 sm:$0xff]  }
  0x57   : > { %2569 = vmatprep.subr.bf16.mxu1 %v2970_v56  ;;  %2681 = vmatprep.subr.bf16.mxu0 %v3008_v8  ;;  %v3058_v56 = vld [vmem:[%s3341_s17 + $0x27c] ss:$24 sps:$4 sm:$0xff]   ;;  %v3078_v5 = vld [vmem:[%s3341_s17 + $0x1f0] ss:$24 sps:$4 sm:$0xff]  }
  0x58   : > { %v3082_v8 = vld [vmem:[%s3341_s17 + $0x254] ss:$24 sps:$4 sm:$0xff]  }
  0x5a   : > { %2570 = vmatpush3.bf16.msra.mxu1 %v2971_v60  ;;  %2682 = vmatpush3.bf16.msra.mxu0 %v3009_v9  ;;  %v3064_v60 = vld [vmem:[%s3341_s17 + $0x2ac] ss:$24 sps:$4 sm:$0xff]   ;;  %v3084_v9 = vld [vmem:[%s3341_s17 + $0x250] ss:$24 sps:$4 sm:$0xff]  }
  0x5c   : > { %1387 = vmatmul.mubr.bf16.gmra.mrb[16].mxu0 %v2964_v59  ;;  %1475 = vmatmul.mubr.bf16.gmra.mrb[16].mxu1 %v2965_v61  ;;  %v3063_v59 = vld [vmem:[%s3341_s17 + $0x160] ss:$24 sps:$4 sm:$0xff]   ;;  %v3066_v61 = vld [vmem:[%s3341_s17 + $0x194] ss:$24 sps:$4 sm:$0xff]  }
  0x5d   : > { %1394 = vmatprep.mubr.bf16.mxu0 %v2972_v62  ;;  %1515 = vmatprep.mubr.bf16.mxu1 %v2976_v63  ;;  %v3068_v62 = vld [vmem:[%s3341_s17 + $0x2a8] ss:$24 sps:$4 sm:$0xff]  }
  0x5e   : > { %v3069_v63 = vld [vmem:[%s3341_s17 + $0x190] ss:$24 sps:$4 sm:$0xff]  }
  0x64   : > { %1395 = vmatmul.mubr.bf16.gmra.mrb[20].mxu0 %v2977_v3  ;;  %1516 = vmatmul.mubr.bf16.vlgmr.msra.gmra.mrb[20].mxu1 %v2974_v2  ;;  %v3074_v2 = vld [vmem:[%s3341_s17 + $0x2d8] ss:$24 sps:$4 sm:$0xff]  }
  0x65   : > { %1402 = vmatprep.mubr.bf16.mxu0 %v2980_v6  ;;  %1523 = vmatprep.mubr.bf16.mxu1 %v2982_v7  ;;  %v3075_v3 = vld [vmem:[%s3341_s17 + $0x1c0] ss:$24 sps:$4 sm:$0xff]   ;;  %v3079_v6 = vld [vmem:[%s3341_s17 + $0x224] ss:$24 sps:$4 sm:$0xff]  }
  0x66   : > { %v3081_v7 = vld [vmem:[%s3341_s17 + $0x220] ss:$24 sps:$4 sm:$0xff]  }
  0x6c   : > { %1403 = vmatmul.mubr.bf16.gmra.mrb[24].mxu0 %v2984_v10  ;;  %1524 = vmatmul.mubr.bf16.gmra.mrb[24].mxu1 %v2985_v11  ;;  %v3085_v10 = vld [vmem:[%s3341_s17 + $0x284] ss:$24 sps:$4 sm:$0xff]   ;;  %v3087_v11 = vld [vmem:[%s3341_s17 + $0x280] ss:$24 sps:$4 sm:$0xff]  }
  0x6d   : > { %1410 = vmatprep.mubr.bf16.mxu0 %v2986_v12  ;;  %1531 = vmatprep.mubr.bf16.mxu1 %v2988_v13  ;;  %v3088_v12 = vld [vmem:[%s3341_s17 + $0x2b4] ss:$24 sps:$4 sm:$0xff]   ;;  %v3090_v13 = vld [vmem:[%s3341_s17 + $0x2b0] ss:$24 sps:$4 sm:$0xff]  }
  0x74   : > { %1411 = vmatmul.mubr.bf16.gmra.mrb[28].mxu0 %v2991_v14  ;;  %1532 = vmatmul.mubr.bf16.gmra.mrb[28].mxu1 %v2992_v15  ;;  %v3091_v14 = vld [vmem:[%s3341_s17 + $0x2e4] ss:$24 sps:$4 sm:$0xff]  }
  0x75   : > { %1418 = vmatprep.mubr.bf16.mxu0 %v2994_v16  ;;  %1539 = vmatprep.mubr.bf16.mxu1 %v2996_v17  ;;  %v3094_v15 = vld [vmem:[%s4001_s3] sm:$0xff]   ;;  %v3206_v16 = vmov 0.0  }
  0x76   : > { %2797 = vmatprep.subr.bf16.mxu1 %v3206_v16  ;;  %v3093_v17 = vld [vmem:[%s3341_s17 + $0x2e0] ss:$24 sps:$4 sm:$0xff]   ;;  %s3703_s17 = sand.u32 1, %s3196_s10  }
  0x77   : > { %2798 = vmatpush3.bf16.msra.mxu1 %v3094_v15  ;;  %s2272_s26 = sshll.u32 %s3703_s17, 8  ;;  %s3991_s28 = scalar_lea.vmem [#allocation4], %s3703_s17 }
  0x78   : > { %2799 = vmatprep.subr.bf16.mxu1 %v3206_v16  ;;  %s3716_s27 = scalar_lea.vmem [#allocation2], %s2272_s26  ;;  %s2123_s22 = scalar_lea.sflag [#allocation3], %s3703_s17 }
  0x79   : > { %s2143_s14 = sshll.u32 %s3716_s27, 4  ;;  %s3114_s26 = sshll.u32 %s3208_s25, 4  ;;  %s3904_s14 = int_to_ptr.vmem [resolvable:$true] %s2143_s14  ;;  %s3115_s26 = int_to_ptr.vmem [resolvable:$false] %s3114_s26 }
  0x7a   : > { %s3110_s24 = scalar_lea.vmem %s3904_s14, 4096  ;;  %p3117_p0 = scmp.lt.s32.totalorder %s3904_s14, %s3115_s26 }
  0x7b   : > { %p3111_p11 = scmp.ne.s32.totalorder %s3904_s14, %s3110_s24 }
  0x7c   : > { %1419 = vmatmul.mubr.bf16.gmra.mrb[32].mxu0 %v2998_v18  ;;  %1540 = vmatmul.mubr.bf16.gmra.mrb[32].mxu1 %v2999_v19 }
  0x7d   : > { %1426 = vmatprep.mubr.bf16.mxu0 %v3002_v20  ;;  %1547 = vmatprep.mubr.bf16.mxu1 %v3004_v21  ;;  %p3112_p12 = pnand %p3111_p11, %p3300_p5 }
  0x7f   : > { %p3113_p13 = pneg %p3112_p12 }
  0x84   : > { %1427 = vmatmul.mubr.bf16.gmra.mrb[36].mxu0 %v3006_v22  ;;  %1548 = vmatmul.mubr.bf16.gmra.mrb[36].mxu1 %v3007_v23 }
  0x85   : > { %1434 = vmatprep.mubr.bf16.mxu0 %v3010_v24  ;;  %1555 = vmatprep.mubr.bf16.mxu1 %v3012_v25 }
  0x8c   : > { %1435 = vmatmul.mubr.bf16.gmra.mrb[40].mxu0 %v3014_v26  ;;  %1556 = vmatmul.mubr.bf16.gmra.mrb[40].mxu1 %v3015_v27  ;;  %v3095_v26 = vld [vmem:[%s4001_s3 + $0x8] sm:$0xff]  }
  0x8d   : > { %1563 = vmatprep.mubr.bf16.mxu1 %v3016_v28  ;;  %1676 = vmatprep.mubr.bf16.mxu0 %v3020_v29 }
  0x8e   : > { %2800 = vmatpush3.bf16.msra.mxu1 %v3095_v26 }
  0x8f   : > { %2801 = vmatprep.subr.bf16.mxu1 %v3206_v16 }
  0x94   : > { %1564 = vmatmul.mubr.bf16.gmra.mrb[44].mxu1 %v3021_v31  ;;  %1677 = vmatmul.mubr.bf16.vlgmr.msra.gmra.mrb[44].mxu0 %v3018_v30 }
  0x95   : > { %1571 = vmatprep.mubr.bf16.mxu1 %v3022_v32  ;;  %1684 = vmatprep.mubr.bf16.mxu0 %v3024_v33 }
  0x9c   : > { %1572 = vmatmul.mubr.bf16.gmra.mrb[48].mxu1 %v3026_v34  ;;  %1685 = vmatmul.mubr.bf16.gmra.mrb[48].mxu0 %v3027_v35 }
  0x9d   : > { %1579 = vmatprep.mubr.bf16.mxu1 %v3028_v36  ;;  %1692 = vmatprep.mubr.bf16.mxu0 %v3030_v37 }
  0xa4   : > { %1580 = vmatmul.mubr.bf16.gmra.mrb[52].mxu1 %v3032_v38  ;;  %1693 = vmatmul.mubr.bf16.gmra.mrb[52].mxu0 %v3033_v39 }
  0xa5   : > { %1587 = vmatprep.mubr.bf16.mxu1 %v3034_v40  ;;  %1700 = vmatprep.mubr.bf16.mxu0 %v3036_v41 }
  0xac   : > { %1588 = vmatmul.mubr.bf16.gmra.mrb[56].mxu1 %v3038_v42  ;;  %1701 = vmatmul.mubr.bf16.gmra.mrb[56].mxu0 %v3039_v43 }
  0xad   : > { %1595 = vmatprep.mubr.bf16.mxu1 %v3040_v44  ;;  %1708 = vmatprep.mubr.bf16.mxu0 %v3042_v45 }
  0xb4   : > { %1596 = vmatmul.mubr.bf16.gmra.mrb[60].mxu1 %v3044_v46  ;;  %1709 = vmatmul.mubr.bf16.gmra.mrb[60].mxu0 %v3045_v47 }
  0xb5   : > { %1603 = vmatprep.mubr.bf16.mxu1 %v3046_v48  ;;  %1716 = vmatprep.mubr.bf16.mxu0 %v3048_v49 }
  0xbc   : > { %1604 = vmatmul.mubr.bf16.gmra.mrb[64].mxu1 %v3050_v50  ;;  %1717 = vmatmul.mubr.bf16.gmra.mrb[64].mxu0 %v3051_v51  ;;  %v3096_v51 = vld [vmem:[%s4001_s3 + $0x10] sm:$0xff]  }
  0xbd   : > { %1611 = vmatprep.mubr.bf16.mxu1 %v3052_v52  ;;  %1724 = vmatprep.mubr.bf16.mxu0 %v3054_v53 }
  0xbe   : > { %2802 = vmatpush3.bf16.msra.mxu1 %v3096_v51 }
  0xbf   : > { %2803 = vmatprep.subr.bf16.mxu1 %v3206_v16 }
  0xc4   : > { %1612 = vmatmul.mubr.bf16.gmra.mrb[68].mxu1 %v3056_v54  ;;  %1725 = vmatmul.mubr.bf16.gmra.mrb[68].mxu0 %v3057_v55 }
  0xc5   : > { %1619 = vmatprep.mubr.bf16.mxu1 %v3058_v56  ;;  %1732 = vmatprep.mubr.bf16.mxu0 %v3060_v57 }
  0xcc   : > { %1620 = vmatmul.mubr.bf16.gmra.mrb[72].mxu1 %v3062_v58  ;;  %1733 = vmatmul.mubr.bf16.gmra.mrb[72].mxu0 %v3063_v59 }
  0xcd   : > { %1627 = vmatprep.mubr.bf16.mxu1 %v3064_v60  ;;  %1740 = vmatprep.mubr.bf16.mxu0 %v3066_v61 }
  0xd4   : > { %1628 = vmatmul.mubr.bf16.gmra.mrb[76].mxu1 %v3068_v62  ;;  %1741 = vmatmul.mubr.bf16.gmra.mrb[76].mxu0 %v3069_v63 }
  0xd5   : > { %1635 = vmatprep.mubr.bf16.mxu1 %v3070_v0  ;;  %1748 = vmatprep.mubr.bf16.mxu0 %v3072_v1 }
  0xdc   : > { %1636 = vmatmul.mubr.bf16.gmra.mrb[80].mxu1 %v3074_v2  ;;  %1749 = vmatmul.mubr.bf16.gmra.mrb[80].mxu0 %v3075_v3 }
  0xdd   : > { %1756 = vmatprep.mubr.bf16.mxu0 %v3076_v4  ;;  %2813 = vmatprep.mubr.msk.bf16.mxu1 %vm3207_vm0, %v3206_v16 }
  0xe4   : > { %1757 = vmatmul.mubr.bf16.gmra.mrb[84].mxu0 %v3078_v5 }
  0xe5   : > { %1764 = vmatprep.mubr.bf16.mxu0 %v3079_v6 }
  0xec   : > { %1765 = vmatmul.mubr.bf16.gmra.mrb[88].mxu0 %v3081_v7 }
  0xed   : > { %1772 = vmatprep.mubr.bf16.mxu0 %v3082_v8 }
  0xf4   : > { %1773 = vmatmul.mubr.bf16.gmra.mrb[92].mxu0 %v3084_v9 }
  0xf5   : > { %1780 = vmatprep.mubr.bf16.mxu0 %v3085_v10 }
  0xfc   : > { %1781 = vmatmul.mubr.bf16.gmra.mrb[96].mxu0 %v3087_v11 }
  0xfd   : > { %1788 = vmatprep.mubr.bf16.mxu0 %v3088_v12  ;;  %v3097_v12 = vld [vmem:[%s4001_s3 + $0x18] sm:$0xff]  }
  0xfe   : > { %2804 = vmatpush3.bf16.msra.mxu1 %v3097_v12 }
  0xff   : > { %2805 = vmatprep.subr.bf16.mxu1 %v3206_v16 }
 0x104   : > { %1789 = vmatmul.mubr.bf16.gmra.mrb[100].mxu0 %v3090_v13 }
 0x105   : > { %1796 = vmatprep.mubr.bf16.mxu0 %v3091_v14 }
 0x10c   : > { %1797 = vmatmul.mubr.bf16.gmra.mrb[104].mxu0 %v3093_v17 }
 0x10f   : > { %v2459_v18 = vpop.f32.mrb[0].mxu0  ;;  %v2525_v19 = vpop.f32.mrb[0].mxu1 }
 0x110   : > { %v2460_v20 = vpop.f32.mrb[1].mxu0  ;;  %v2526_v21 = vpop.f32.mrb[1].mxu1 }
 0x111   : > { %v3561_v22 = vadd.f32 %v2460_v20, %v2459_v18  ;;  %v2462_v23 = vpop.f32.mrb[2].mxu0  ;;  %v3563_v24 = vadd.f32 %v2526_v21, %v2525_v19  ;;  %v2528_v25 = vpop.f32.mrb[2].mxu1  ;;  %v3616_v18 = vld [vmem:[%s4002_s2] ss:$0 sm:$0xff] }
 0x112   : > { %v2463_v27 = vpop.f32.mrb[3].mxu0  ;;  %v2529_v28 = vpop.f32.mrb[3].mxu1 }
 0x113   : > { %v3568_v29 = vadd.f32 %v2463_v27, %v2462_v23  ;;  %v3570_v30 = vadd.f32 %v2529_v28, %v2528_v25  ;;  %v1357_v25 = vadd.f32 %v3561_v22, %v3616_v18 }
 0x117   : > { %v2465_v31 = vpop.f32.mrb[4].mxu0  ;;  %v2531_v32 = vpop.f32.mrb[4].mxu1 }
 0x118   : > { %v2466_v33 = vpop.f32.mrb[5].mxu0  ;;  %v2532_v34 = vpop.f32.mrb[5].mxu1 }
 0x119   : > { %v3573_v35 = vadd.f32 %v2466_v33, %v2465_v31  ;;  %v2468_v36 = vpop.f32.mrb[6].mxu0  ;;  %v3575_v37 = vadd.f32 %v2532_v34, %v2531_v32  ;;  %v2534_v38 = vpop.f32.mrb[6].mxu1  ;;  %v1360_v34 = vadd.f32 %v3568_v29, %v3616_v18  ;;  %v3098_v29 = vld [vmem:[%s4001_s3 + $0x20] sm:$0xff]  }
 0x11a   : > { %v2469_v39 = vpop.f32.mrb[7].mxu0  ;;  %v2535_v40 = vpop.f32.mrb[7].mxu1  ;;  %2806 = vmatpush3.bf16.msra.mxu1 %v3098_v29 }
 0x11b   : > { %v3577_v41 = vadd.f32 %v2469_v39, %v2468_v36  ;;  %v3579_v42 = vadd.f32 %v2535_v40, %v2534_v38  ;;  %2807 = vmatprep.subr.bf16.mxu1 %v3206_v16 }
 0x11f   : > { %v2471_v43 = vpop.f32.mrb[8].mxu0  ;;  %v2537_v44 = vpop.f32.mrb[8].mxu1 }
 0x120   : > { %v2472_v45 = vpop.f32.mrb[9].mxu0  ;;  %v2538_v46 = vpop.f32.mrb[9].mxu1 }
 0x121   : > { %v3581_v47 = vadd.f32 %v2472_v45, %v2471_v43  ;;  %v2474_v48 = vpop.f32.mrb[10].mxu0  ;;  %v3583_v49 = vadd.f32 %v2538_v46, %v2537_v44  ;;  %v2540_v50 = vpop.f32.mrb[10].mxu1  ;;  %v1365_v46 = vadd.f32 %v3573_v35, %v3616_v18 }
 0x122   : > { %v2475_v52 = vpop.f32.mrb[11].mxu0  ;;  %v2541_v53 = vpop.f32.mrb[11].mxu1 }
 0x123   : > { %v3588_v54 = vadd.f32 %v2475_v52, %v2474_v48  ;;  %v3590_v55 = vadd.f32 %v2541_v53, %v2540_v50 }
 0x127   : > { %v2477_v56 = vpop.f32.mrb[12].mxu0  ;;  %v2543_v57 = vpop.f32.mrb[12].mxu1 }
 0x128   : > { %v2478_v58 = vpop.f32.mrb[13].mxu0  ;;  %v2544_v59 = vpop.f32.mrb[13].mxu1 }
 0x129   : > { %v3593_v60 = vadd.f32 %v2478_v58, %v2477_v56  ;;  %v2480_v61 = vpop.f32.mrb[14].mxu0  ;;  %v3595_v62 = vadd.f32 %v2544_v59, %v2543_v57  ;;  %v2546_v63 = vpop.f32.mrb[14].mxu1  ;;  %v1368_v57 = vadd.f32 %v3577_v41, %v3616_v18 }
 0x12a   : > { %v2481_v0 = vpop.f32.mrb[15].mxu0  ;;  %v2547_v1 = vpop.f32.mrb[15].mxu1 }
 0x12b   : > { %v3597_v2 = vadd.f32 %v2481_v0, %v2480_v61  ;;  %v3599_v3 = vadd.f32 %v2547_v1, %v2546_v63 }
 0x12f   : > { %v2483_v4 = vpop.f32.mrb[16].mxu0  ;;  %v2549_v5 = vpop.f32.mrb[16].mxu1 }
 0x130   : > { %v2484_v6 = vpop.f32.mrb[17].mxu0  ;;  %v2550_v7 = vpop.f32.mrb[17].mxu1 }
 0x131   : > { %v3601_v8 = vadd.f32 %v2484_v6, %v2483_v4  ;;  %v2486_v9 = vpop.f32.mrb[18].mxu0  ;;  %v3603_v10 = vadd.f32 %v2550_v7, %v2549_v5  ;;  %v2552_v11 = vpop.f32.mrb[18].mxu1  ;;  %v1373_v5 = vadd.f32 %v3581_v47, %v3616_v18 }
 0x132   : > { %v2487_v13 = vpop.f32.mrb[19].mxu0  ;;  %v2553_v14 = vpop.f32.mrb[19].mxu1 }
 0x133   : > { %v3608_v15 = vadd.f32 %v2487_v13, %v2486_v9  ;;  %v3610_v17 = vadd.f32 %v2553_v14, %v2552_v11  ;;  %v1376_v13 = vadd.f32 %v3588_v54, %v3616_v18  ;;  %v3099_v54 = vld [vmem:[%s4001_s3 + $0x28] sm:$0xff]  }
 0x134   : > { %2808 = vmatpush3.bf16.msra.mxu1 %v3099_v54 }
 0x135   : > { %2809 = vmatprep.subr.bf16.mxu1 %v3206_v16 }
 0x137   : > { %v2489_v19 = vpop.f32.mrb[20].mxu0  ;;  %v2571_v20 = vpop.f32.mrb[20].mxu1 }
 0x138   : > { %v2490_v21 = vpop.f32.mrb[21].mxu0  ;;  %v2572_v23 = vpop.f32.mrb[21].mxu1 }
 0x139   : > { %v3620_v26 = vadd.f32 %v2490_v21, %v2489_v19  ;;  %v2573_v27 = vadd.f32 %v2572_v23, %v2571_v20  ;;  %v2492_v28 = vpop.f32.mrb[22].mxu0  ;;  %v2574_v31 = vpop.f32.mrb[22].mxu1 }
 0x13a   : > { %v2493_v32 = vpop.f32.mrb[23].mxu0  ;;  %v2575_v33 = vpop.f32.mrb[23].mxu1 }
 0x13b   : > { %v3624_v36 = vadd.f32 %v2573_v27, %v1357_v25  ;;  %v3626_v38 = vadd.f32 %v2493_v32, %v2492_v28  ;;  %v2576_v39 = vadd.f32 %v2575_v33, %v2574_v31  ;;  %v1381_v28 = vadd.f32 %v3593_v60, %v3616_v18 }
 0x13d   : > { %v3628_v40 = vadd.f32 %v2576_v39, %v1360_v34 }
 0x13f   : > { %v2495_v43 = vpop.f32.mrb[24].mxu0  ;;  %v2577_v44 = vpop.f32.mrb[24].mxu1 }
 0x140   : > { %v2496_v22 = vpop.f32.mrb[25].mxu0  ;;  %v2578_v45 = vpop.f32.mrb[25].mxu1 }
 0x141   : > { %v3632_v48 = vadd.f32 %v2496_v22, %v2495_v43  ;;  %v2579_v50 = vadd.f32 %v2578_v45, %v2577_v44  ;;  %v2498_v51 = vpop.f32.mrb[26].mxu0  ;;  %v2580_v52 = vpop.f32.mrb[26].mxu1  ;;  %v1384_v44 = vadd.f32 %v3597_v2, %v3616_v18 }
 0x142   : > { %v2499_v53 = vpop.f32.mrb[27].mxu0  ;;  %v2581_v56 = vpop.f32.mrb[27].mxu1 }
 0x143   : > { %v3639_v58 = vadd.f32 %v2579_v50, %v1365_v46  ;;  %v3641_v59 = vadd.f32 %v2499_v53, %v2498_v51  ;;  %v2582_v61 = vadd.f32 %v2581_v56, %v2580_v52  ;;  %v1389_v53 = vadd.f32 %v3601_v8, %v3616_v18 }
 0x145   : > { %v3644_v35 = vadd.f32 %v2582_v61, %v1368_v57 }
 0x147   : > { %v2501_v63 = vpop.f32.mrb[28].mxu0  ;;  %v2583_v0 = vpop.f32.mrb[28].mxu1 }
 0x148   : > { %v2502_v1 = vpop.f32.mrb[29].mxu0  ;;  %v2584_v4 = vpop.f32.mrb[29].mxu1 }
 0x149   : > { %v3648_v6 = vadd.f32 %v2502_v1, %v2501_v63  ;;  %v2585_v41 = vadd.f32 %v2584_v4, %v2583_v0  ;;  %v2504_v7 = vpop.f32.mrb[30].mxu0  ;;  %v2586_v9 = vpop.f32.mrb[30].mxu1  ;;  %v1392_v1 = vadd.f32 %v3608_v15, %v3616_v18 }
 0x14a   : > { %v2505_v11 = vpop.f32.mrb[31].mxu0  ;;  %v2587_v12 = vpop.f32.mrb[31].mxu1 }
 0x14b   : > { %v3652_v14 = vadd.f32 %v2585_v41, %v1373_v5  ;;  %v3654_v19 = vadd.f32 %v2505_v11, %v2504_v7  ;;  %v2588_v20 = vadd.f32 %v2587_v12, %v2586_v9 }
 0x14d   : > { %v3656_v21 = vadd.f32 %v2588_v20, %v1376_v13  ;;  %v1397_v13 = vadd.f32 %v3620_v26, %v3616_v18 }
 0x14f   : > { %v2507_v23 = vpop.f32.mrb[32].mxu0  ;;  %v2589_v25 = vpop.f32.mrb[32].mxu1 }
 0x150   : > { %v2508_v47 = vpop.f32.mrb[33].mxu0  ;;  %v2590_v27 = vpop.f32.mrb[33].mxu1 }
 0x151   : > { %v3660_v31 = vadd.f32 %v2508_v47, %v2507_v23  ;;  %v2591_v32 = vadd.f32 %v2590_v27, %v2589_v25  ;;  %v2510_v33 = vpop.f32.mrb[34].mxu0  ;;  %v2592_v34 = vpop.f32.mrb[34].mxu1  ;;  %v3100_v47 = vld [vmem:[%s4001_s3 + $0x30] sm:$0xff]  }
 0x152   : > { %v2511_v39 = vpop.f32.mrb[35].mxu0  ;;  %v2593_v43 = vpop.f32.mrb[35].mxu1  ;;  %2810 = vmatpush3.bf16.msra.mxu1 %v3100_v47 }
 0x153   : > { %v3667_v22 = vadd.f32 %v2591_v32, %v1381_v28  ;;  %v3669_v45 = vadd.f32 %v2511_v39, %v2510_v33  ;;  %v2594_v46 = vadd.f32 %v2593_v43, %v2592_v34  ;;  %v1400_v32 = vadd.f32 %v3626_v38, %v3616_v18  ;;  %2811 = vmatprep.subr.bf16.mxu1 %v3206_v16 }
 0x154   : > { %v1405_v38 = vadd.f32 %v3632_v48, %v3616_v18 }
 0x155   : > { %v3672_v60 = vadd.f32 %v2594_v46, %v1384_v44 }
 0x157   : > { %v2513_v50 = vpop.f32.mrb[36].mxu0  ;;  %v2595_v51 = vpop.f32.mrb[36].mxu1 }
 0x158   : > { %v2514_v52 = vpop.f32.mrb[37].mxu0  ;;  %v2596_v29 = vpop.f32.mrb[37].mxu1 }
 0x159   : > { %v3676_v56 = vadd.f32 %v2514_v52, %v2513_v50  ;;  %v2597_v2 = vadd.f32 %v2596_v29, %v2595_v51  ;;  %v2516_v57 = vpop.f32.mrb[38].mxu0  ;;  %v2598_v61 = vpop.f32.mrb[38].mxu1 }
 0x15a   : > { %v2517_v63 = vpop.f32.mrb[39].mxu0  ;;  %v2599_v0 = vpop.f32.mrb[39].mxu1 }
 0x15b   : > { %v3680_v4 = vadd.f32 %v2597_v2, %v1389_v53  ;;  %v3682_v5 = vadd.f32 %v2517_v63, %v2516_v57  ;;  %v2600_v41 = vadd.f32 %v2599_v0, %v2598_v61  ;;  %v1408_v53 = vadd.f32 %v3641_v59, %v3616_v18 }
 0x15d   : > { %v3684_v7 = vadd.f32 %v2600_v41, %v1392_v1 }
 0x15f   : > { %v2519_v9 = vpop.f32.mrb[40].mxu0  ;;  %v2601_v11 = vpop.f32.mrb[40].mxu1 }
 0x160   : > { %v2520_v8 = vpop.f32.mrb[41].mxu0  ;;  %v2602_v12 = vpop.f32.mrb[41].mxu1 }
 0x161   : > { %v3688_v20 = vadd.f32 %v2520_v8, %v2519_v9  ;;  %v2603_v23 = vadd.f32 %v2602_v12, %v2601_v11  ;;  %v2522_v25 = vpop.f32.mrb[42].mxu0  ;;  %v2604_v15 = vpop.f32.mrb[42].mxu1 }
 0x162   : > { %v2523_v27 = vpop.f32.mrb[43].mxu0  ;;  %v2605_v28 = vpop.f32.mrb[43].mxu1 }
 0x163   : > { %v3695_v33 = vadd.f32 %v2603_v23, %v1397_v13  ;;  %v3697_v34 = vadd.f32 %v2523_v27, %v2522_v25  ;;  %v2606_v54 = vadd.f32 %v2605_v28, %v2604_v15  ;;  %v1416_v27 = vadd.f32 %v3654_v19, %v3616_v18 }
 0x165   : > { %v3700_v26 = vadd.f32 %v2606_v54, %v1400_v32 }
 0x167   : > { %v2607_v39 = vpop.f32.mrb[44].mxu1  ;;  %v2683_v43 = vpop.f32.mrb[44].mxu0 }
 0x168   : > { %v2608_v44 = vpop.f32.mrb[45].mxu1  ;;  %v2684_v46 = vpop.f32.mrb[45].mxu0 }
 0x169   : > { %v2609_v50 = vadd.f32 %v2608_v44, %v2607_v39  ;;  %v2685_v51 = vadd.f32 %v2684_v46, %v2683_v43  ;;  %v2610_v52 = vpop.f32.mrb[46].mxu1  ;;  %v2686_v29 = vpop.f32.mrb[46].mxu0 }
 0x16a   : > { %v2611_v2 = vpop.f32.mrb[47].mxu1  ;;  %v2687_v57 = vpop.f32.mrb[47].mxu0 }
 0x16b   : > { %v3710_v61 = vadd.f32 %v2609_v50, %v1405_v38  ;;  %v1679_v63 = vadd.f32 %v2685_v51, %v3624_v36  ;;  %v2612_v0 = vadd.f32 %v2611_v2, %v2610_v52  ;;  %v2688_v1 = vadd.f32 %v2687_v57, %v2686_v29  ;;  %v3101_v50 = vld [vmem:[%s4001_s3 + $0x38] sm:$0xff]  }
 0x16c   : > { %v1413_v36 = vadd.f32 %v3648_v6, %v3616_v18  ;;  %2812 = vmatpush3.bf16.msra.mxu1 %v3101_v50 }
 0x16d   : > { %v1805_v41 = vmax.f32 %v1679_v63, 0.0  ;;  %v3713_v9 = vadd.f32 %v2612_v0, %v1408_v53  ;;  %v1682_v48 = vadd.f32 %v2688_v1, %v3628_v40  ;;  %2817 = vmatprep.subr.bf16.mxu1 %v3206_v16 }
 0x16f   : > { %1837 = vst [vmem:[%s3716_s27] sm:$0xff] %v1805_v41  ;;  %v1806_v11 = vmax.f32 %v1682_v48, 0.0  ;;  %v2613_v59 = vpop.f32.mrb[48].mxu1  ;;  %v2689_v8 = vpop.f32.mrb[48].mxu0 }
 0x170   : > { %v2614_v12 = vpop.f32.mrb[49].mxu1  ;;  %v2690_v13 = vpop.f32.mrb[49].mxu0 }
 0x171   : > { %1838 = vst [vmem:[%s3716_s27 + $0x8] sm:$0xff] %v1806_v11  ;;  %v1869_v23 = vadd.f32 %v1806_v11, %v1805_v41  ;;  %v2615_v25 = vadd.f32 %v2614_v12, %v2613_v59  ;;  %v2691_v15 = vadd.f32 %v2690_v13, %v2689_v8  ;;  %v2616_v47 = vpop.f32.mrb[50].mxu1  ;;  %v2692_v40 = vpop.f32.mrb[50].mxu0  ;;  %v1424_v41 = vadd.f32 %v3669_v45, %v3616_v18 }
 0x172   : > { %v2617_v28 = vpop.f32.mrb[51].mxu1  ;;  %v2693_v32 = vpop.f32.mrb[51].mxu0 }
 0x173   : > { %v3724_v54 = vadd.f32 %v2615_v25, %v1413_v36  ;;  %v1687_v39 = vadd.f32 %v2691_v15, %v3639_v58  ;;  %v2618_v43 = vadd.f32 %v2617_v28, %v2616_v47  ;;  %v2694_v44 = vadd.f32 %v2693_v32, %v2692_v40 }
 0x174   : > { %v1421_v58 = vadd.f32 %v3660_v31, %v3616_v18  ;;  %v1429_v28 = vadd.f32 %v3676_v56, %v3616_v18 }
 0x175   : > { %v1807_v6 = vmax.f32 %v1687_v39, 0.0  ;;  %v3727_v46 = vadd.f32 %v2618_v43, %v1416_v27  ;;  %v1690_v38 = vadd.f32 %v2694_v44, %v3644_v35 }
 0x177   : > { %1839 = vst [vmem:[%s3716_s27 + $0x10] sm:$0xff] %v1807_v6  ;;  %v1870_v19 = vadd.f32 %v1869_v23, %v1807_v6  ;;  %v1808_v51 = vmax.f32 %v1690_v38, 0.0  ;;  %v2619_v52 = vpop.f32.mrb[52].mxu1  ;;  %v2695_v29 = vpop.f32.mrb[52].mxu0 }
 0x178   : > { %v2620_v53 = vpop.f32.mrb[53].mxu1  ;;  %v2696_v2 = vpop.f32.mrb[53].mxu0 }
 0x179   : > { %1840 = vst [vmem:[%s3716_s27 + $0x18] sm:$0xff] %v1808_v51  ;;  %v1871_v35 = vadd.f32 %v1870_v19, %v1808_v51  ;;  %v2621_v57 = vadd.f32 %v2620_v53, %v2619_v52  ;;  %v2697_v63 = vadd.f32 %v2696_v2, %v2695_v29  ;;  %v2622_v0 = vpop.f32.mrb[54].mxu1  ;;  %v2698_v1 = vpop.f32.mrb[54].mxu0 }
 0x17a   : > { %v2623_v48 = vpop.f32.mrb[55].mxu1  ;;  %v2699_v11 = vpop.f32.mrb[55].mxu0 }
 0x17b   : > { %v3742_v59 = vadd.f32 %v2621_v57, %v1421_v58  ;;  %v1695_v8 = vadd.f32 %v2697_v63, %v3652_v14  ;;  %v2624_v31 = vadd.f32 %v2623_v48, %v2622_v0  ;;  %v2700_v12 = vadd.f32 %v2699_v11, %v2698_v1 }
 0x17c   : > { %v1437_v0 = vadd.f32 %v3688_v20, %v3616_v18 }
 0x17d   : > { %v1809_v13 = vmax.f32 %v1695_v8, 0.0  ;;  %v3745_v36 = vadd.f32 %v2624_v31, %v1424_v41  ;;  %v1698_v23 = vadd.f32 %v2700_v12, %v3656_v21  ;;  %v1432_v21 = vadd.f32 %v3682_v5, %v3616_v18 }
 0x17f   : > { %1841 = vst [vmem:[%s3716_s27 + $0x20] sm:$0xff] %v1809_v13  ;;  %v1872_v25 = vadd.f32 %v1871_v35, %v1809_v13  ;;  %v1810_v15 = vmax.f32 %v1698_v23, 0.0  ;;  %v2625_v47 = vpop.f32.mrb[56].mxu1  ;;  %v2701_v40 = vpop.f32.mrb[56].mxu0 }
 0x180   : > { %v2626_v45 = vpop.f32.mrb[57].mxu1  ;;  %v2702_v27 = vpop.f32.mrb[57].mxu0 }
 0x181   : > { %1842 = vst [vmem:[%s3716_s27 + $0x28] sm:$0xff] %v1810_v15  ;;  %v1873_v14 = vadd.f32 %v1872_v25, %v1810_v15  ;;  %v2627_v32 = vadd.f32 %v2626_v45, %v2625_v47  ;;  %v2703_v39 = vadd.f32 %v2702_v27, %v2701_v40  ;;  %v2628_v43 = vpop.f32.mrb[58].mxu1  ;;  %v2704_v44 = vpop.f32.mrb[58].mxu0 }
 0x182   : > { %v2629_v6 = vpop.f32.mrb[59].mxu1  ;;  %v2705_v38 = vpop.f32.mrb[59].mxu0 }
 0x183   : > { %v3754_v50 = vadd.f32 %v2627_v32, %v1429_v28  ;;  %v1703_v19 = vadd.f32 %v2703_v39, %v3667_v22  ;;  %v2630_v51 = vadd.f32 %v2629_v6, %v2628_v43  ;;  %v2706_v52 = vadd.f32 %v2705_v38, %v2704_v44 }
 0x184   : > { %v1445_v32 = vadd.f32 %v3563_v24, %v3616_v18 }
 0x185   : > { %v1811_v56 = vmax.f32 %v1703_v19, 0.0  ;;  %v3757_v29 = vadd.f32 %v2630_v51, %v1432_v21  ;;  %v1706_v53 = vadd.f32 %v2706_v52, %v3672_v60  ;;  %v1440_v60 = vadd.f32 %v3697_v34, %v3616_v18 }
 0x187   : > { %1843 = vst [vmem:[%s3716_s27 + $0x30] sm:$0xff] %v1811_v56  ;;  %v1874_v2 = vadd.f32 %v1873_v14, %v1811_v56  ;;  %v1812_v58 = vmax.f32 %v1706_v53, 0.0  ;;  %v2631_v35 = vpop.f32.mrb[60].mxu1  ;;  %v2707_v57 = vpop.f32.mrb[60].mxu0 }
 0x188   : > { %v2632_v5 = vpop.f32.mrb[61].mxu1  ;;  %v2708_v63 = vpop.f32.mrb[61].mxu0 }
 0x189   : > { %1844 = vst [vmem:[%s3716_s27 + $0x38] sm:$0xff] %v1812_v58  ;;  %v1875_v22 = vadd.f32 %v1874_v2, %v1812_v58  ;;  %v2633_v1 = vadd.f32 %v2632_v5, %v2631_v35  ;;  %v2709_v41 = vadd.f32 %v2708_v63, %v2707_v57  ;;  %v2634_v48 = vpop.f32.mrb[62].mxu1  ;;  %v2710_v11 = vpop.f32.mrb[62].mxu0 }
 0x18a   : > { %v2635_v8 = vpop.f32.mrb[63].mxu1  ;;  %v2711_v31 = vpop.f32.mrb[63].mxu0 }
 0x18b   : > { %v3766_v12 = vadd.f32 %v2633_v1, %v1437_v0  ;;  %v1711_v13 = vadd.f32 %v2709_v41, %v3680_v4  ;;  %v2636_v23 = vadd.f32 %v2635_v8, %v2634_v48  ;;  %v2712_v25 = vadd.f32 %v2711_v31, %v2710_v11 }
 0x18c   : > { %v1453_v0 = vadd.f32 %v3575_v37, %v3616_v18 }
 0x18d   : > { %v1813_v20 = vmax.f32 %v1711_v13, 0.0  ;;  %v3769_v15 = vadd.f32 %v2636_v23, %v1440_v60  ;;  %v1714_v47 = vadd.f32 %v2712_v25, %v3684_v7  ;;  %v1448_v7 = vadd.f32 %v3570_v30, %v3616_v18 }
 0x18f   : > { %1845 = vst [vmem:[%s3716_s27 + $0x40] sm:$0xff] %v1813_v20  ;;  %v1876_v40 = vadd.f32 %v1875_v22, %v1813_v20  ;;  %v1814_v45 = vmax.f32 %v1714_v47, 0.0  ;;  %v2637_v27 = vpop.f32.mrb[64].mxu1  ;;  %v2713_v28 = vpop.f32.mrb[64].mxu0 }
 0x190   : > { %v2638_v34 = vpop.f32.mrb[65].mxu1  ;;  %v2714_v14 = vpop.f32.mrb[65].mxu0 }
 0x191   : > { %1846 = vst [vmem:[%s3716_s27 + $0x48] sm:$0xff] %v1814_v45  ;;  %v1877_v4 = vadd.f32 %v1876_v40, %v1814_v45  ;;  %v2639_v39 = vadd.f32 %v2638_v34, %v2637_v27  ;;  %v2715_v43 = vadd.f32 %v2714_v14, %v2713_v28  ;;  %v2640_v44 = vpop.f32.mrb[66].mxu1  ;;  %v2716_v21 = vpop.f32.mrb[66].mxu0  ;;  %v1461_v34 = vadd.f32 %v3583_v49, %v3616_v18 }
 0x192   : > { %v2641_v6 = vpop.f32.mrb[67].mxu1  ;;  %v2717_v38 = vpop.f32.mrb[67].mxu0 }
 0x193   : > { %v3778_v19 = vadd.f32 %v2639_v39, %v1445_v32  ;;  %v1719_v51 = vadd.f32 %v2715_v43, %v3695_v33  ;;  %v2642_v52 = vadd.f32 %v2641_v6, %v2640_v44  ;;  %v2718_v56 = vadd.f32 %v2717_v38, %v2716_v21 }
 0x195   : > { %v1815_v24 = vmax.f32 %v1719_v51, 0.0  ;;  %v3781_v53 = vadd.f32 %v2642_v52, %v1448_v7  ;;  %v1722_v2 = vadd.f32 %v2718_v56, %v3700_v26  ;;  %v1456_v26 = vadd.f32 %v3579_v42, %v3616_v18 }
 0x197   : > { %1847 = vst [vmem:[%s3716_s27 + $0x50] sm:$0xff] %v1815_v24  ;;  %v1878_v58 = vadd.f32 %v1877_v4, %v1815_v24  ;;  %v1816_v35 = vmax.f32 %v1722_v2, 0.0  ;;  %v2643_v57 = vpop.f32.mrb[68].mxu1  ;;  %v2719_v5 = vpop.f32.mrb[68].mxu0 }
 0x198   : > { %v2644_v30 = vpop.f32.mrb[69].mxu1  ;;  %v2720_v63 = vpop.f32.mrb[69].mxu0 }
 0x199   : > { %1848 = vst [vmem:[%s3716_s27 + $0x58] sm:$0xff] %v1816_v35  ;;  %v1879_v33 = vadd.f32 %v1878_v58, %v1816_v35  ;;  %v2645_v22 = vadd.f32 %v2644_v30, %v2643_v57  ;;  %v2721_v1 = vadd.f32 %v2720_v63, %v2719_v5  ;;  %v2646_v41 = vpop.f32.mrb[70].mxu1  ;;  %v2722_v48 = vpop.f32.mrb[70].mxu0  ;;  %v1469_v57 = vadd.f32 %v3595_v62, %v3616_v18 }
 0x19a   : > { %v2647_v11 = vpop.f32.mrb[71].mxu1  ;;  %v2723_v60 = vpop.f32.mrb[71].mxu0 }
 0x19b   : > { %v3790_v8 = vadd.f32 %v2645_v22, %v1453_v0  ;;  %v1727_v31 = vadd.f32 %v2721_v1, %v3710_v61  ;;  %v2648_v13 = vadd.f32 %v2647_v11, %v2646_v41  ;;  %v2724_v23 = vadd.f32 %v2723_v60, %v2722_v48 }
 0x19d   : > { %v1817_v37 = vmax.f32 %v1727_v31, 0.0  ;;  %v3793_v25 = vadd.f32 %v2648_v13, %v1456_v26  ;;  %v1730_v20 = vadd.f32 %v2724_v23, %v3713_v9  ;;  %v1464_v9 = vadd.f32 %v3590_v55, %v3616_v18 }
 0x19f   : > { %1849 = vst [vmem:[%s3716_s27 + $0x60] sm:$0xff] %v1817_v37  ;;  %v1880_v47 = vadd.f32 %v1879_v33, %v1817_v37  ;;  %v1818_v40 = vmax.f32 %v1730_v20, 0.0  ;;  %v2649_v45 = vpop.f32.mrb[72].mxu1  ;;  %v2725_v27 = vpop.f32.mrb[72].mxu0 }
 0x1a0   : > { %v2650_v42 = vpop.f32.mrb[73].mxu1  ;;  %v2726_v28 = vpop.f32.mrb[73].mxu0 }
 0x1a1   : > { %1850 = vst [vmem:[%s3716_s27 + $0x68] sm:$0xff] %v1818_v40  ;;  %v1881_v61 = vadd.f32 %v1880_v47, %v1818_v40  ;;  %v2651_v14 = vadd.f32 %v2650_v42, %v2649_v45  ;;  %v2727_v32 = vadd.f32 %v2726_v28, %v2725_v27  ;;  %v2652_v4 = vpop.f32.mrb[74].mxu1  ;;  %v2728_v39 = vpop.f32.mrb[74].mxu0  ;;  %v1477_v47 = vadd.f32 %v3603_v10, %v3616_v18 }
 0x1a2   : > { %v2653_v43 = vpop.f32.mrb[75].mxu1  ;;  %v2729_v44 = vpop.f32.mrb[75].mxu0 }
 0x1a3   : > { %v3802_v21 = vadd.f32 %v2651_v14, %v1461_v34  ;;  %v1735_v7 = vadd.f32 %v2727_v32, %v3724_v54  ;;  %v2654_v6 = vadd.f32 %v2653_v43, %v2652_v4  ;;  %v2730_v38 = vadd.f32 %v2729_v44, %v2728_v39 }
 0x1a5   : > { %v1819_v49 = vmax.f32 %v1735_v7, 0.0  ;;  %v3805_v51 = vadd.f32 %v2654_v6, %v1464_v9  ;;  %v1738_v52 = vadd.f32 %v2730_v38, %v3727_v46  ;;  %v1472_v46 = vadd.f32 %v3599_v3, %v3616_v18 }
 0x1a7   : > { %1851 = vst [vmem:[%s3716_s27 + $0x70] sm:$0xff] %v1819_v49  ;;  %v1882_v56 = vadd.f32 %v1881_v61, %v1819_v49  ;;  %v1820_v24 = vmax.f32 %v1738_v52, 0.0  ;;  %v2655_v2 = vpop.f32.mrb[76].mxu1  ;;  %v2731_v58 = vpop.f32.mrb[76].mxu0 }
 0x1a8   : > { %v2656_v55 = vpop.f32.mrb[77].mxu1  ;;  %v2732_v35 = vpop.f32.mrb[77].mxu0 }
 0x1a9   : > { %1852 = vst [vmem:[%s3716_s27 + $0x78] sm:$0xff] %v1820_v24  ;;  %v1883_v54 = vadd.f32 %v1882_v56, %v1820_v24  ;;  %v2657_v5 = vadd.f32 %v2656_v55, %v2655_v2  ;;  %v2733_v30 = vadd.f32 %v2732_v35, %v2731_v58  ;;  %v2658_v63 = vpop.f32.mrb[78].mxu1  ;;  %v2734_v0 = vpop.f32.mrb[78].mxu0 }
 0x1aa   : > { %v2659_v33 = vpop.f32.mrb[79].mxu1  ;;  %v2735_v22 = vpop.f32.mrb[79].mxu0 }
 0x1ab   : > { %v3814_v1 = vadd.f32 %v2657_v5, %v1469_v57  ;;  %v1743_v41 = vadd.f32 %v2733_v30, %v3742_v59  ;;  %v2660_v48 = vadd.f32 %v2659_v33, %v2658_v63  ;;  %v2736_v26 = vadd.f32 %v2735_v22, %v2734_v0 }
 0x1ad   : > { %v1821_v62 = vmax.f32 %v1743_v41, 0.0  ;;  %v3817_v11 = vadd.f32 %v2660_v48, %v1472_v46  ;;  %v1746_v60 = vadd.f32 %v2736_v26, %v3745_v36  ;;  %v1480_v36 = vadd.f32 %v3610_v17, %v3616_v18 }
 0x1af   : > { %1853 = vst [vmem:[%s3716_s27 + $0x80] sm:$0xff] %v1821_v62  ;;  %v1884_v31 = vadd.f32 %v1883_v54, %v1821_v62  ;;  %v1822_v13 = vmax.f32 %v1746_v60, 0.0  ;;  %v2661_v23 = vpop.f32.mrb[80].mxu1  ;;  %v2737_v37 = vpop.f32.mrb[80].mxu0 }
 0x1b0   : > { %v2662_v3 = vpop.f32.mrb[81].mxu1  ;;  %v2738_v20 = vpop.f32.mrb[81].mxu0 }
 0x1b1   : > { %1854 = vst [vmem:[%s3716_s27 + $0x88] sm:$0xff] %v1822_v13  ;;  %v1885_v59 = vadd.f32 %v1884_v31, %v1822_v13  ;;  %v2663_v40 = vadd.f32 %v2662_v3, %v2661_v23  ;;  %v2739_v45 = vadd.f32 %v2738_v20, %v2737_v37  ;;  %v2664_v27 = vpop.f32.mrb[82].mxu1  ;;  %v2740_v42 = vpop.f32.mrb[82].mxu0 }
 0x1b2   : > { %v2665_v28 = vpop.f32.mrb[83].mxu1  ;;  %v2741_v34 = vpop.f32.mrb[83].mxu0 }
 0x1b3   : > { %v3826_v61 = vadd.f32 %v2663_v40, %v1477_v47  ;;  %v1751_v14 = vadd.f32 %v2739_v45, %v3754_v50  ;;  %v2666_v32 = vadd.f32 %v2665_v28, %v2664_v27  ;;  %v2742_v4 = vadd.f32 %v2741_v34, %v2740_v42 }
 0x1b5   : > { %v1823_v10 = vmax.f32 %v1751_v14, 0.0  ;;  %v3829_v39 = vadd.f32 %v2666_v32, %v1480_v36  ;;  %v1754_v9 = vadd.f32 %v2742_v4, %v3757_v29 }
 0x1b7   : > { %1855 = vst [vmem:[%s3716_s27 + $0x90] sm:$0xff] %v1823_v10  ;;  %v1886_v43 = vadd.f32 %v1885_v59, %v1823_v10  ;;  %v1824_v44 = vmax.f32 %v1754_v9, 0.0  ;;  %v2743_v7 = vpop.f32.mrb[84].mxu0 }
 0x1b8   : > { %v2744_v17 = vpop.f32.mrb[85].mxu0 }
 0x1b9   : > { %1856 = vst [vmem:[%s3716_s27 + $0x98] sm:$0xff] %v1824_v44  ;;  %v1887_v18 = vadd.f32 %v1886_v43, %v1824_v44  ;;  %v2745_v6 = vadd.f32 %v2744_v17, %v2743_v7  ;;  %v2746_v38 = vpop.f32.mrb[86].mxu0 }
 0x1ba   : > { %v2747_v49 = vpop.f32.mrb[87].mxu0 }
 0x1bb   : > { %v1759_v50 = vadd.f32 %v2745_v6, %v3766_v12  ;;  %v2748_v52 = vadd.f32 %v2747_v49, %v2746_v38 }
 0x1bd   : > { %v1825_v56 = vmax.f32 %v1759_v50, 0.0  ;;  %v1762_v24 = vadd.f32 %v2748_v52, %v3769_v15 }
 0x1bf   : > { %1857 = vst [vmem:[%s3716_s27 + $0xa0] sm:$0xff] %v1825_v56  ;;  %v1888_v29 = vadd.f32 %v1887_v18, %v1825_v56  ;;  %v1826_v2 = vmax.f32 %v1762_v24, 0.0  ;;  %v2749_v58 = vpop.f32.mrb[88].mxu0 }
 0x1c0   : > { %v2750_v55 = vpop.f32.mrb[89].mxu0 }
 0x1c1   : > { %1858 = vst [vmem:[%s3716_s27 + $0xa8] sm:$0xff] %v1826_v2  ;;  %v1889_v35 = vadd.f32 %v1888_v29, %v1826_v2  ;;  %v2751_v57 = vadd.f32 %v2750_v55, %v2749_v58  ;;  %v2752_v54 = vpop.f32.mrb[90].mxu0 }
 0x1c2   : > { %v2753_v5 = vpop.f32.mrb[91].mxu0 }
 0x1c3   : > { %v1767_v30 = vadd.f32 %v2751_v57, %v3778_v19  ;;  %v2754_v63 = vadd.f32 %v2753_v5, %v2752_v54 }
 0x1c5   : > { %v1827_v12 = vmax.f32 %v1767_v30, 0.0  ;;  %v1770_v0 = vadd.f32 %v2754_v63, %v3781_v53 }
 0x1c7   : > { %1859 = vst [vmem:[%s3716_s27 + $0xb0] sm:$0xff] %v1827_v12  ;;  %v1890_v15 = vadd.f32 %v1889_v35, %v1827_v12  ;;  %v1828_v46 = vmax.f32 %v1770_v0, 0.0  ;;  %v2755_v33 = vpop.f32.mrb[92].mxu0  ;;  %v3104_v12 = vld [vmem:[%s3986_s5 + $0x10] sm:$0xff]   ;;  %v3105_v0 = vld [vmem:[%s3986_s5 + $0x18] sm:$0xff]  }
 0x1c8   : > { %v2756_v22 = vpop.f32.mrb[93].mxu0 }
 0x1c9   : > { %1860 = vst [vmem:[%s3716_s27 + $0xb8] sm:$0xff] %v1828_v46  ;;  %v1891_v41 = vadd.f32 %v1890_v15, %v1828_v46  ;;  %v2757_v48 = vadd.f32 %v2756_v22, %v2755_v33  ;;  %v2758_v26 = vpop.f32.mrb[94].mxu0  ;;  %v3106_v15 = vld [vmem:[%s3986_s5 + $0x20] sm:$0xff]   ;;  %v3107_v46 = vld [vmem:[%s3986_s5 + $0x28] sm:$0xff]   ;;  %v3108_v33 = vld [vmem:[%s3986_s5 + $0x30] sm:$0xff]  }
 0x1ca   : > { %v2759_v62 = vpop.f32.mrb[95].mxu0  ;;  %v3109_v22 = vld [vmem:[%s3986_s5 + $0x38] sm:$0xff]  }
 0x1cb   : > { %v1775_v60 = vadd.f32 %v2757_v48, %v3790_v8  ;;  %v2760_v31 = vadd.f32 %v2759_v62, %v2758_v26 }
 0x1cd   : > { %v1829_v19 = vmax.f32 %v1775_v60, 0.0  ;;  %v1778_v13 = vadd.f32 %v2760_v31, %v3793_v25 }
 0x1cf   : > { %1861 = vst [vmem:[%s3716_s27 + $0xc0] sm:$0xff] %v1829_v19  ;;  %v1892_v53 = vadd.f32 %v1891_v41, %v1829_v19  ;;  %v1830_v23 = vmax.f32 %v1778_v13, 0.0  ;;  %v2761_v37 = vpop.f32.mrb[96].mxu0  ;;  %v1924_v41 = vld [vmem:[%s4003_s4] sm:$0x1] }
 0x1d0   : > { %v2762_v3 = vpop.f32.mrb[97].mxu0 }
 0x1d1   : > { %1862 = vst [vmem:[%s3716_s27 + $0xc8] sm:$0xff] %v1830_v23  ;;  %v1893_v20 = vadd.f32 %v1892_v53, %v1830_v23  ;;  %v2763_v47 = vadd.f32 %v2762_v3, %v2761_v37  ;;  %v2764_v59 = vpop.f32.mrb[98].mxu0 }
 0x1d2   : > { %v2765_v40 = vpop.f32.mrb[99].mxu0 }
 0x1d3   : > { %v1783_v45 = vadd.f32 %v2763_v47, %v3802_v21  ;;  %v2766_v27 = vadd.f32 %v2765_v40, %v2764_v59 }
 0x1d5   : > { %v1831_v8 = vmax.f32 %v1783_v45, 0.0  ;;  %v1786_v42 = vadd.f32 %v2766_v27, %v3805_v51 }
 0x1d7   : > { %1863 = vst [vmem:[%s3716_s27 + $0xd0] sm:$0xff] %v1831_v8  ;;  %v1894_v25 = vadd.f32 %v1893_v20, %v1831_v8  ;;  %v1832_v36 = vmax.f32 %v1786_v42, 0.0  ;;  %v2767_v28 = vpop.f32.mrb[100].mxu0 }
 0x1d8   : > { %v2768_v34 = vpop.f32.mrb[101].mxu0 }
 0x1d9   : > { %1864 = vst [vmem:[%s3716_s27 + $0xd8] sm:$0xff] %v1832_v36  ;;  %v1895_v14 = vadd.f32 %v1894_v25, %v1832_v36  ;;  %v2769_v32 = vadd.f32 %v2768_v34, %v2767_v28  ;;  %v2770_v4 = vpop.f32.mrb[102].mxu0 }
 0x1da   : > { %v2771_v10 = vpop.f32.mrb[103].mxu0 }
 0x1db   : > { %v1791_v9 = vadd.f32 %v2769_v32, %v3814_v1  ;;  %v2772_v43 = vadd.f32 %v2771_v10, %v2770_v4 }
 0x1dd   : > { %v1833_v21 = vmax.f32 %v1791_v9, 0.0  ;;  %v1794_v44 = vadd.f32 %v2772_v43, %v3817_v11 }
 0x1df   : > { %1865 = vst [vmem:[%s3716_s27 + $0xe0] sm:$0xff] %v1833_v21  ;;  %v1896_v51 = vadd.f32 %v1895_v14, %v1833_v21  ;;  %v1834_v7 = vmax.f32 %v1794_v44, 0.0  ;;  %v2773_v17 = vpop.f32.mrb[104].mxu0 }
 0x1e0   : > { %v2774_v18 = vpop.f32.mrb[105].mxu0 }
 0x1e1   : > { %1866 = vst [vmem:[%s3716_s27 + $0xe8] sm:$0xff] %v1834_v7  ;;  %v1897_v6 = vadd.f32 %v1896_v51, %v1834_v7  ;;  %v2775_v38 = vadd.f32 %v2774_v18, %v2773_v17  ;;  %v2776_v49 = vpop.f32.mrb[106].mxu0 }
 0x1e2   : > { %v2777_v50 = vpop.f32.mrb[107].mxu0 }
 0x1e3   : > { %v1799_v52 = vadd.f32 %v2775_v38, %v3826_v61  ;;  %v2778_v56 = vadd.f32 %v2777_v50, %v2776_v49  ;;  %v3102_v61 = vld [vmem:[%s3986_s5] sm:$0xff]  }
 0x1e5   : > { %v1835_v1 = vmax.f32 %v1799_v52, 0.0  ;;  %v1802_v24 = vadd.f32 %v2778_v56, %v3829_v39  ;;  %v3103_v39 = vld [vmem:[%s3986_s5 + $0x8] sm:$0xff]  }
 0x1e7   : > { %1867 = vst [vmem:[%s3716_s27 + $0xf0] sm:$0xff] %v1835_v1  ;;  %v1898_v29 = vadd.f32 %v1897_v6, %v1835_v1  ;;  %v1836_v11 = vmax.f32 %v1802_v24, 0.0 }
 0x1e9   : > { %1868 = vst [vmem:[%s3716_s27 + $0xf8] sm:$0xff] %v1836_v11  ;;  %v1899_v2 = vadd.f32 %v1898_v29, %v1836_v11  ;;  %s3116_s27 = scalar_lea.vmem %s3115_s26, 8192 }
 0x1ea   : > { %p3118_p1 = scmp.lt.s32.totalorder %s3116_s27, %s3110_s24 }
 0x1eb   : > { %v1900_v58 = vrot.slane %v1899_v2, 4 }
 0x1ec   : > { %p3119_p2 = por %p3118_p1, %p3117_p0 }
 0x1ed   : > { %v1901_v55 = vadd.f32 %v1900_v58, %v1899_v2 }
 0x1ee   : > { %p3120_p3 = pnand %p3119_p2, %p3113_p13 }
 0x1ef   : > { %v1902_v35 = vrot.slane %v1901_v55, 2 }
 0x1f1   : > { %v1903_v57 = vadd.f32 %v1902_v35, %v1901_v55 }
 0x1f3   : > { %v1904_v54 = vrot.slane %v1903_v57, 1 }
 0x1f5   : > { %v1905_v5 = vadd.f32 %v1904_v54, %v1903_v57 }
 0x1f7   : > { %v1906_v30 = vmul.f32 0.00390625, %v1905_v5 }
 0x1f9   : > { %v1907_v63 = vpack.c.bf16 %v1906_v30, %v1906_v30 }
 0x1fb   : > { %2814 = vmatmul.mubr.bf16.vlgmr.msra.gmra.mrb[84].mxu1 %v1907_v63 }
 0x1fc   : > { %2818 = vmatpush3.bf16.msra.mxu1 %v3102_v61  ;;  %2833 = vmatprep.mubr.msk.bf16.mxu1 %vm3207_vm0, %v3206_v16 }
 0x1fd   : > { %2819 = vmatprep.subr.bf16.mxu1 %v3206_v16 }
 0x200   : > { %2820 = vmatpush3.bf16.msra.mxu1 %v3103_v39 }
 0x201   : > { %2821 = vmatprep.subr.bf16.mxu1 %v3206_v16 }
 0x204   : > { %2822 = vmatpush3.bf16.msra.mxu1 %v3104_v12 }
 0x205   : > { %2823 = vmatprep.subr.bf16.mxu1 %v3206_v16 }
 0x208   : > { %2824 = vmatpush3.bf16.msra.mxu1 %v3105_v0 }
 0x209   : > { %2825 = vmatprep.subr.bf16.mxu1 %v3206_v16 }
 0x20c   : > { %2826 = vmatpush3.bf16.msra.mxu1 %v3106_v15 }
 0x20d   : > { %2827 = vmatprep.subr.bf16.mxu1 %v3206_v16 }
 0x210   : > { %2828 = vmatpush3.bf16.msra.mxu1 %v3107_v46 }
 0x211   : > { %2829 = vmatprep.subr.bf16.mxu1 %v3206_v16 }
 0x214   : > { %2830 = vmatpush3.bf16.msra.mxu1 %v3108_v33 }
 0x215   : > { %2831 = vmatprep.subr.bf16.mxu1 %v3206_v16 }
 0x218   : > { %2832 = vmatpush3.bf16.msra.mxu1 %v3109_v22 }
 0x2ce   : > { %v2007_v48 = vpop.f32.mrb[84].mxu1 }
 0x2cf   : > { %v2008_v26 = vadd.f32 %v2007_v48, %v1924_v41  ;;  %v2815_v62 = vpop.f32.mrb[85].mxu1 }
 0x2d0   : > { %v2010_v60 = vpop.f32.mrb[86].mxu1 }
 0x2d1   : > { %v2013_v31 = vmax.f32 %v2008_v26, 0.0  ;;  %v2816_v19 = vpop.f32.mrb[87].mxu1 }
 0x2d3   : > { %2014 = vst [vmem:[%s3991_s28] sm:$0x1] %v2013_v31  ;;  %v2015_v16 = vpack.c.bf16 %v2013_v31, %v2013_v31 }
 0x2d5   : > { %2834 = vmatmul.mubr.bf16.vlgmr.msra.gmra.mrb[88].mxu1 %v2015_v16 }
 0x2d6   : > { %3123 = shalt.err (!%p3120_p3)
}
 0x2d7   : > { %s3124_s29 = scalar_lea.hbm %s3902_s21, 4096  ;;  %s3128_s25 = scalar_lea.hbm %s3988_s7, 8192 }
 0x2d8   : > { %p3125_p4 = scmp.ne.s32.totalorder %s3902_s21, %s3124_s29  ;;  %p3129_p9 = scmp.lt.u32.totalorder %s3902_s21, %s3988_s7 }
 0x2d9   : > { %p3130_p10 = scmp.lt.u32.totalorder %s3128_s25, %s3124_s29  ;;  %p3132_p12 = scmp.lt.u32.totalorder %s3124_s29, %s3902_s21 }
 0x2da   : > { %p3126_p7 = pnand %p3125_p4, %p3300_p5 }
 0x2db   : > { %p3131_p11 = por %p3130_p10, %p3129_p9 }
 0x2dc   : > { %p3127_p8 = pneg %p3126_p7 }
 0x2dd   : > { %p3133_p13 = por %p3132_p12, %p3131_p11 }
 0x2df   : > { %p3134_p0 = pnand %p3133_p13, %p3127_p8 }
 0x2e1   : > { %3137 = shalt.err (!%p3134_p0)
}
 0x2e2   : > { %s3209_s24 = smov 128   ;;  %s3210_s27 = smov 8  }
 0x2e3   : > { %2854 = dma.vmem_to_hbm [thread:$0]  (%p3300_p5), %s3904_s14, 4096, %s3902_s21, %s2123_s22, %s3209_s24, %s3209_s24, %s3210_s27  }
 0x2e4   : > { %s2439_s28 = sshll.u32 %s3283_s13, 4  ;;  %s4004_s25 = scalar_lea.vmem [#allocation4], %s3703_s17 }
 0x2e5   : > { %s3934_s29 = scalar_lea.hbm %s3989_s8, %s2439_s28  ;;  %s2159_s26 = sshll.u32 %s4004_s25, 4  ;;  %s2160_s26 = int_to_ptr.vmem [resolvable:$true] %s2159_s26 }
 0x2e6   : > { %s2128_s0 = scalar_lea.sflag [#allocation5], %s3703_s17  ;;  %s3138_s1 = scalar_lea.vmem %s2160_s26, 16 }
 0x2e7   : > { %p3139_p1 = scmp.ne.s32.totalorder %s2160_s26, %s3138_s1  ;;  %s3211_s2 = smov [#allocation4]  }
 0x2e8   : > { %s3142_s3 = sshll.u32 %s3211_s2, 4  ;;  %s3143_s3 = int_to_ptr.vmem [resolvable:$false] %s3142_s3 }
 0x2e9   : > { %p3140_p2 = pnand %p3139_p1, %p3300_p5  ;;  %s3144_s4 = scalar_lea.vmem %s3143_s3, 32 }
 0x2ea   : > { %p3145_p4 = scmp.lt.s32.totalorder %s2160_s26, %s3143_s3  ;;  %p3146_p7 = scmp.lt.s32.totalorder %s3144_s4, %s3138_s1 }
 0x2eb   : > { %p3141_p3 = pneg %p3140_p2 }
 0x2ec   : > { %p3147_p8 = por %p3146_p7, %p3145_p4 }
 0x2ee   : > { %p3148_p9 = pnand %p3147_p8, %p3141_p3 }
 0x2f0   : > { %3151 = shalt.err (!%p3148_p9)
}
 0x2f1   : > { %s3152_s17 = scalar_lea.hbm %s3934_s29, 16  ;;  %s3156_s2 = scalar_lea.hbm %s3989_s8, 32 }
 0x2f2   : > { %p3153_p10 = scmp.ne.s32.totalorder %s3934_s29, %s3152_s17  ;;  %p3157_p13 = scmp.lt.u32.totalorder %s3934_s29, %s3989_s8 }
 0x2f3   : > { %p3158_p0 = scmp.lt.u32.totalorder %s3156_s2, %s3152_s17  ;;  %p3160_p2 = scmp.lt.u32.totalorder %s3152_s17, %s3934_s29 }
 0x2f4   : > { %p3154_p11 = pnand %p3153_p10, %p3300_p5 }
 0x2f5   : > { %p3159_p1 = por %p3158_p0, %p3157_p13 }
 0x2f6   : > { %p3155_p12 = pneg %p3154_p11 }
 0x2f7   : > { %p3161_p3 = por %p3160_p2, %p3159_p1 }
 0x2f9   : > { %p3162_p4 = pnand %p3161_p3, %p3155_p12 }
 0x2fb   : > { %3165 = shalt.err (!%p3162_p4)
}
 0x2fc   : > { %2855 = dma.vmem_to_hbm [thread:$0]  (%p3300_p5), %s2160_s26, 16, %s3934_s29, %s2128_s0   ;;  %v2032_v13 = vld [vmem:[%s3987_s6] sm:$0x1] }
 0x2fd   : > { %p351_p7 = scmp.lt.s32.totalorder %s3283_s13, 1 }
 0x2ff   : > { %s4012_s13 = smov (!%p351_p7, %s3283_s13), 1 }
 0x300   : > { %s353_s28 = scalar_lea.vmem %s3990_s9, %s4012_s13 }
 0x3a8   : > { %v2115_v53 = vpop.f32.mrb[88].mxu1 }
 0x3a9   : > { %v2116_v23 = vadd.f32 %v2115_v53, %v2032_v13  ;;  %v2835_v37 = vpop.f32.mrb[89].mxu1 }
 0x3aa   : > { %v2118_v3 = vpop.f32.mrb[90].mxu1 }
 0x3ab   : > { %2121 = vst [vmem:[%s353_s28] sm:$0x1] %v2116_v23  ;;  %v2836_v20 = vpop.f32.mrb[91].mxu1 }
 0x3ac PF: > { %p2865_p5 = scmp.ge.s32.totalorder %s3204_s12, 2  ;;  %s2174_s0 = sand.u32 1, %s3192_s30  }
 0x3ad   : > { %s2175_s19 = scalar_lea.sflag [#allocation3], %s2174_s0 }
 0x3ae   : > { %p2859_p8 = pnand %p2865_p5, %p3304_p6 }
 0x3b0   : > { %3183 = dma.done.wait (!%p2859_p8), %s2175_s19, 4096  }
 0x3b1   : > { %3185 = vsyncadd (!%p2859_p8), %s2175_s19, 4294963200  ;;  %s2184_s16 = scalar_lea.sflag [#allocation5], %s2174_s0 }
 0x3b2   : > { %3187 = dma.done.wait (!%p2859_p8), %s2184_s16, 16  }
 0x3b3   : > { %3189 = vsyncadd (!%p2859_p8), %s2184_s16, 4294967280  ;;  %p23_p9 = scmp.ge.s32.totalorder %s3287_s15, 4   ;;  %s4005_s30 = smov %s3196_s10 }
 0x3b4   : > { %s4006_s10 = smov %s3200_s11  ;;  %s4007_s11 = smov %s3298_s18 }
 0x3b5   : > { %s4008_s12 = smov %s3287_s15  ;;  %25 = sbr.rel (!%p23_p9) target bundleno = 11 (0xb), region = 112 }
 0x3bc   :  { %2194 = vsyncpa [#allocation3], 1 }
 0x3bd   :  { %2196 = vsyncpa [#allocation3 + $0x1], 1 }
 0x3be   :  { %2197 = vsyncpa [#allocation5], 1 }
 0x3bf   :  { %2199 = vsyncpa [#allocation5 + $0x1], 1 }

</bundles_post_ra>
